<compile_context>
chip_gen: v6e
topology: v6e:2x2x1
jax: 0.10.0
libtpu: 0.0.40
codegen_flags: <defaults>
</compile_context>

<pallas_src>
import functools

import jax
import jax.numpy as jnp
from jax import lax
from jax.experimental import pallas as pl
from jax.experimental.pallas import tpu as pltpu


def _fp_kernel(pts1t_ref, pts2_ref, fea1_ref, fea2_ref, *rest,
               n_layers, compute_dtype, approx_recip, mxu_precision):
    # rest = (W0a, W0b, b0, W1, b1, ..., out_ref); weights pre-transposed to (C_out, C_in)
    wb = rest[:-1]
    out_ref = rest[-1]

    p1t = pts1t_ref[0].astype(jnp.float32)   # (3, TN)
    p2 = pts2_ref[0].astype(jnp.float32)     # (m, 3)
    f1 = fea1_ref[0]                         # (C1, TN)
    f2 = fea2_ref[0]                         # (C2, m)

    m = p2.shape[0]
    tn = p1t.shape[1]
    cdt = compute_dtype

    # ---- pairwise squared distances (m, TN): 3 VPU broadcast passes, exact f32 ----
    d = None
    for k in range(3):
        diff = p2[:, k:k + 1] - p1t[k:k + 1, :]          # (m,1) - (1,TN) -> (m,TN)
        sq = diff * diff
        d = sq if d is None else d + sq                   # d >= 0 by construction

    # ---- three_nn: key-packed fused min/argmin --------------------------------
    # Non-negative finite f32 bit patterns are order-preserving as int32.  Clear the
    # low ceil(log2 m) mantissa bits and OR in the row index; a single int32 min per
    # neighbor yields both the (truncated) distance and the argmin row, ties broken
    # by lowest row index (matches lax.top_k).  Truncation error on the distance is
    # <= 2^-(23 - ceil(log2 m)) relative — negligible for the interpolation weights.
    nbits = max(1, (m - 1).bit_length())
    low_mask = (1 << nbits) - 1
    row = lax.broadcasted_iota(jnp.int32, (m, tn), 0)
    d_bits = pltpu.bitcast(d, jnp.int32)
    keys = (d_bits & jnp.int32(~low_mask)) | row          # (m, TN) int32

    w_acc = None                                          # unnormalized weights (m, TN)
    rs = None                                             # reciprocal sum (1, TN)
    for i in range(3):
        kmin = jnp.min(keys, axis=0, keepdims=True)                        # (1, TN)
        sel = kmin & jnp.int32(low_mask)                                   # row index
        dmin = pltpu.bitcast(kmin & jnp.int32(~low_mask), jnp.float32)     # distance
        first = row == sel                                                 # one-hot/col
        r = 1.0 / (dmin + 1e-8)
        contrib = jnp.where(first, r, 0.0)
        w_acc = contrib if w_acc is None else w_acc + contrib
        rs = r if rs is None else rs + r
        if i < 2:   # peeled: the masking pass is dead after the last neighbor
            keys = jnp.where(first, jnp.int32(0x7FFFFFFF), keys)

    # ---- three_interpolate as MXU matmul; normalize AFTER the matmul ----------
    interp = jnp.dot(f2.astype(cdt), w_acc.astype(cdt),
                     preferred_element_type=jnp.float32,
                     precision=mxu_precision)             # (C2, TN)
    interp = interp * pl.reciprocal(rs, approx=approx_recip)

    # ---- MLP layer 0: concat([interp, fea1], ch) folded into split weights ----
    w0a = wb[0][...].astype(cdt)                 # (C_out0, C2)
    w0b = wb[1][...].astype(cdt)                 # (C_out0, C1)
    b0 = wb[2][...].astype(jnp.float32)          # (C_out0, 1)
    y = (jnp.dot(w0a, interp.astype(cdt), preferred_element_type=jnp.float32,
                 precision=mxu_precision)
         + jnp.dot(w0b, f1.astype(cdt), preferred_element_type=jnp.float32,
                   precision=mxu_precision)
         + b0)
    y = jnp.maximum(y, 0.0)

    # ---- remaining 1x1-conv layers (channel-first, n on lanes) ----------------
    for l in range(1, n_layers):
        wl = wb[3 + 2 * (l - 1)][...].astype(cdt)          # (C_out_l, C_in_l)
        bl = wb[4 + 2 * (l - 1)][...].astype(jnp.float32)  # (C_out_l, 1)
        y = jnp.dot(wl, y.astype(cdt), preferred_element_type=jnp.float32,
                    precision=mxu_precision) + bl
        y = jnp.maximum(y, 0.0)

    out_ref[0] = y.astype(out_ref.dtype)         # lane-dense (c_out, TN) store


def _round_up(x, k):
    return -(-x // k) * k


def _pad2_bytes(r, c, itemsize=4):
    """Bytes of an (r, c) f32 block after (8, 128) tile padding."""
    return itemsize * _round_up(max(int(r), 1), 8) * _round_up(max(int(c), 1), 128)


def _chip_vmem_bytes():
    try:
        return int(pltpu.get_tpu_info().vmem_capacity_bytes)
    except Exception:
        return 64 * 2 ** 20   # conservative (v7x per-TensorCore)


def _choose_tn(n, requested, m, vmem_cap):
    """Largest TN <= requested that divides n, preferring multiples of 256 (full MXU
    N dim on v6e/v7x) then 128, capped so the ~10 live f32 (m, TN) temporaries of the
    NN phase stay within roughly a third of the chip's VMEM."""
    m_pad = _round_up(max(m, 1), 8)
    budget = max(4 * 2 ** 20, vmem_cap // 3)
    cap = max(128, (budget // (4 * 10 * m_pad)) // 128 * 128)
    tn = min(requested, n, cap)
    if tn >= n:
        return n
    for step in (256, 128):
        c = (tn // step) * step
        while c >= step:
            if n % c == 0:
                return c
            c -= step
    # TODO(synk): awkward n with no 128-multiple divisor falls back to the full n,
    # which can exceed the VMEM budget for very large n; pad n upstream instead.
    return n


def _vmem_limit_bytes(tn, m, c1, c2, c_out, params, vmem_cap):
    # (8,128)-padded block sizes, double-buffered by the BlockSpec pipeline.
    tile_in = (_pad2_bytes(3, tn)        # pts1t tile (3 -> 8 sublanes)
               + _pad2_bytes(m, 3)       # pts2 (3 -> 128 lanes)
               + _pad2_bytes(c1, tn)
               + _pad2_bytes(c2, m))
    tile_params = sum(_pad2_bytes(p.shape[0], p.shape[1]) for p in params)
    tile_out = _pad2_bytes(c_out, tn)
    # live (m, TN) temporaries of the NN phase + interp / activation slabs
    temps = (10 * _pad2_bytes(m, tn) + _pad2_bytes(c2, tn)
             + 2 * _pad2_bytes(max(c_out, 64), tn))
    est = 2 * (tile_in + tile_params + tile_out) + temps
    hi = max(32 * 2 ** 20, vmem_cap - 8 * 2 ** 20)     # clamp to chip VMEM - headroom
    return int(min(hi, max(32 * 2 ** 20, 2 * est)))


def pointnet_fp_forward(pts1, pts2, fea1, fea2, weights, biases, *,
                        tile_n=512, compute_dtype=jnp.bfloat16,
                        out_dtype=jnp.float32):
    """
    pts1: (B, n, 3)   pts2: (B, m, 3)   fea1: (B, C1, n)   fea2: (B, C2, m)
    weights[l]: (C_in_l, C_out_l)   biases[l]: (1, C_out_l)
    returns: (B, mlp[-1], n)   (matches the PyTorch module's output layout)
    """
    B, n, _ = pts1.shape
    m = pts2.shape[1]
    C1 = fea1.shape[1]
    C2 = fea2.shape[1]
    n_layers = len(weights)
    c_out = weights[-1].shape[1]

    vmem_cap = _chip_vmem_bytes()
    tn = _choose_tn(n, tile_n, m, vmem_cap)

    # only the tiny coordinate tensor is transposed; features stay channel-first.
    pts1t = jnp.transpose(pts1, (0, 2, 1))          # (B, 3, n)

    # pre-transpose MLP weights to (C_out, C_in); split layer 0 for the fused concat.
    w0t = jnp.transpose(weights[0])                 # (C_out0, C2 + C1)
    params = [w0t[:, :C2], w0t[:, C2:], jnp.reshape(biases[0], (-1, 1))]
    for wl, bl in zip(weights[1:], biases[1:]):
        params.append(jnp.transpose(wl))
        params.append(jnp.reshape(bl, (-1, 1)))

    in_specs = [
        pl.BlockSpec((1, 3, tn), lambda b, t: (b, 0, t)),
        pl.BlockSpec((1, m, 3), lambda b, t: (b, 0, 0)),
        pl.BlockSpec((1, C1, tn), lambda b, t: (b, 0, t)),
        pl.BlockSpec((1, C2, m), lambda b, t: (b, 0, 0)),
    ]
    args = [pts1t, pts2, fea1, fea2]
    for p in params:
        in_specs.append(pl.BlockSpec(p.shape, lambda b, t: (0, 0)))
        args.append(p)

    vmem_limit = _vmem_limit_bytes(tn, m, C1, C2, c_out, params, vmem_cap)

    is_f32 = compute_dtype == jnp.float32
    out = pl.pallas_call(
        functools.partial(
            _fp_kernel,
            n_layers=n_layers,
            compute_dtype=compute_dtype,
            approx_recip=not is_f32,
            # HIGHEST only on the strict f32 validation path; the perf path uses
            # bf16 MXU operands with f32 accumulation.
            mxu_precision=(lax.Precision.HIGHEST if is_f32
                           else lax.Precision.DEFAULT)),
        out_shape=jax.ShapeDtypeStruct((B, c_out, n), out_dtype),
        grid=(B, n // tn),
        in_specs=in_specs,
        out_specs=pl.BlockSpec((1, c_out, tn), lambda b, t: (b, 0, t)),
        compiler_params=pltpu.CompilerParams(
            dimension_semantics=("parallel", "parallel"),
            vmem_limit_bytes=vmem_limit),
    )(*args)
    return out


def _reference_forward(pts1, pts2, fea1, fea2, weights, biases):
    """Pure-JAX reference mirroring the PyTorch semantics (for verification)."""
    d = jnp.sum((pts1[:, :, None, :] - pts2[:, None, :, :]) ** 2, axis=-1)  # (B,n,m)
    neg_top, idx = lax.top_k(-d, 3)                                         # (B,n,3)
    dist = -neg_top
    recip = 1.0 / (dist + 1e-8)
    w = recip / jnp.sum(recip, axis=-1, keepdims=True)                      # (B,n,3)
    m = pts2.shape[1]
    onehot = jax.nn.one_hot(idx, m, dtype=jnp.float32)                      # (B,n,3,m)
    wd = jnp.sum(w[..., None] * onehot, axis=2)                             # (B,n,m)
    f2 = jnp.transpose(fea2, (0, 2, 1))                                     # (B,m,C2)
    interp = jnp.einsum("bnm,bmc->bnc", wd, f2, precision="highest")        # (B,n,C2)
    x = jnp.concatenate([interp, jnp.transpose(fea1, (0, 2, 1))], axis=-1)  # (B,n,C)
    for wl, bl in zip(weights, biases):
        x = jnp.einsum("bnc,cd->bnd", x, wl, precision="highest") + bl[None]
        x = jnp.maximum(x, 0.0)
    return jnp.transpose(x, (0, 2, 1))                                      # (B,C_last,n)


if __name__ == "__main__":
    B, n, m, C1, C2 = 2, 256, 64, 8, 16
    mlp = [64, 32]
    in_channel = C1 + C2

    key = jax.random.PRNGKey(0)
    k1, k2, k3, k4, kw = jax.random.split(key, 5)
    pts1 = jax.random.normal(k1, (B, n, 3), jnp.float32)
    pts2 = jax.random.normal(k2, (B, m, 3), jnp.float32)
    fea1 = jax.random.normal(k3, (B, C1, n), jnp.float32)
    fea2 = jax.random.normal(k4, (B, C2, m), jnp.float32)

    dims = [in_channel] + mlp
    weights, biases = [], []
    for li in range(len(mlp)):
        kw, ka, kb = jax.random.split(kw, 3)
        weights.append(0.1 * jax.random.normal(ka, (dims[li], dims[li + 1]), jnp.float32))
        biases.append(0.1 * jax.random.normal(kb, (1, dims[li + 1]), jnp.float32))

    ref = jax.block_until_ready(
        _reference_forward(pts1, pts2, fea1, fea2, weights, biases))

    # strict check: f32 operands (HIGHEST-precision MXU), exact reciprocal
    out_f32 = jax.block_until_ready(
        pointnet_fp_forward(pts1, pts2, fea1, fea2, weights, biases,
                            compute_dtype=jnp.float32))
    assert out_f32.shape == (B, mlp[-1], n), out_f32.shape
    err_f32 = float(jnp.max(jnp.abs(out_f32 - ref)))
    assert jnp.allclose(out_f32, ref, atol=3e-3, rtol=3e-3), err_f32

    # performance path: bf16 MXU operands (f32 accumulation), approx reciprocal
    out_bf16 = jax.block_until_ready(
        pointnet_fp_forward(pts1, pts2, fea1, fea2, weights, biases,
                            compute_dtype=jnp.bfloat16))
    assert out_bf16.shape == (B, mlp[-1], n), out_bf16.shape
    err_bf16 = float(jnp.max(jnp.abs(out_bf16 - ref)))
    assert jnp.allclose(out_bf16, ref, atol=7e-2, rtol=7e-2), err_bf16

    print("KERNEL_OK")
</pallas_src>

<mosaic_0001>
module attributes {stable_mosaic.version = 11 : i64} {
  func.func @_fp_kernel(%arg0: i32, %arg1: i32, %arg2: memref<1x3x256xf32, #tpu.memory_space<vmem>>, %arg3: memref<1x64x3xf32, #tpu.memory_space<vmem>>, %arg4: memref<1x8x256xf32, #tpu.memory_space<vmem>>, %arg5: memref<1x16x64xf32, #tpu.memory_space<vmem>>, %arg6: memref<64x16xf32, #tpu.memory_space<vmem>>, %arg7: memref<64x8xf32, #tpu.memory_space<vmem>>, %arg8: memref<64x1xf32, #tpu.memory_space<vmem>>, %arg9: memref<32x64xf32, #tpu.memory_space<vmem>>, %arg10: memref<32x1xf32, #tpu.memory_space<vmem>>, %arg11: memref<1x32x256xf32, #tpu.memory_space<vmem>>) attributes {dimension_semantics = [#tpu.dimension_semantics<parallel>, #tpu.dimension_semantics<parallel>], iteration_bounds = array<i64: 2, 1>, scalar_prefetch = 0 : i64, scratch_operands = 0 : i64, tpu.core_type = #tpu.core_type<tc>, window_params = [{transform_indices = @transform_0, window_bounds = array<i64: 1, 3, 256>}, {transform_indices = @transform_1, window_bounds = array<i64: 1, 64, 3>}, {transform_indices = @transform_2, window_bounds = array<i64: 1, 8, 256>}, {transform_indices = @transform_3, window_bounds = array<i64: 1, 16, 64>}, {pipeline_mode = #tpu.pipeline_mode<synchronous>, transform_indices = @transform_4, window_bounds = array<i64: 64, 16>}, {pipeline_mode = #tpu.pipeline_mode<synchronous>, transform_indices = @transform_5, window_bounds = array<i64: 64, 8>}, {pipeline_mode = #tpu.pipeline_mode<synchronous>, transform_indices = @transform_6, window_bounds = array<i64: 64, 1>}, {pipeline_mode = #tpu.pipeline_mode<synchronous>, transform_indices = @transform_7, window_bounds = array<i64: 32, 64>}, {pipeline_mode = #tpu.pipeline_mode<synchronous>, transform_indices = @transform_8, window_bounds = array<i64: 32, 1>}, {transform_indices = @transform_9, window_bounds = array<i64: 1, 32, 256>}]} {
    %c0 = arith.constant 0 : index
    %c0_0 = arith.constant 0 : index
    %c0_1 = arith.constant 0 : index
    %0 = vector.load %arg2[%c0, %c0_0, %c0_1] : memref<1x3x256xf32, #tpu.memory_space<vmem>>, vector<1x3x256xf32>
    %1 = vector.shape_cast %0 : vector<1x3x256xf32> to vector<3x256xf32>
    %c0_2 = arith.constant 0 : index
    %c0_3 = arith.constant 0 : index
    %c0_4 = arith.constant 0 : index
    %2 = vector.load %arg3[%c0_2, %c0_3, %c0_4] : memref<1x64x3xf32, #tpu.memory_space<vmem>>, vector<1x64x3xf32>
    %3 = vector.shape_cast %2 : vector<1x64x3xf32> to vector<64x3xf32>
    %c0_5 = arith.constant 0 : index
    %c0_6 = arith.constant 0 : index
    %c0_7 = arith.constant 0 : index
    %4 = vector.load %arg4[%c0_5, %c0_6, %c0_7] : memref<1x8x256xf32, #tpu.memory_space<vmem>>, vector<1x8x256xf32>
    %5 = vector.shape_cast %4 : vector<1x8x256xf32> to vector<8x256xf32>
    %c0_8 = arith.constant 0 : index
    %c0_9 = arith.constant 0 : index
    %c0_10 = arith.constant 0 : index
    %6 = vector.load %arg5[%c0_8, %c0_9, %c0_10] : memref<1x16x64xf32, #tpu.memory_space<vmem>>, vector<1x16x64xf32>
    %7 = vector.shape_cast %6 : vector<1x16x64xf32> to vector<16x64xf32>
    %8 = vector.extract_strided_slice %3 {offsets = [0, 0], sizes = [64, 1], strides = [1, 1]} : vector<64x3xf32> to vector<64x1xf32>
    %9 = vector.extract_strided_slice %1 {offsets = [0, 0], sizes = [1, 256], strides = [1, 1]} : vector<3x256xf32> to vector<1x256xf32>
    %10 = vector.broadcast %8 : vector<64x1xf32> to vector<64x256xf32>
    %11 = vector.broadcast %9 : vector<1x256xf32> to vector<64x256xf32>
    %12 = arith.subf %10, %11 : vector<64x256xf32>
    %13 = arith.mulf %12, %12 : vector<64x256xf32>
    %14 = vector.extract_strided_slice %3 {offsets = [0, 1], sizes = [64, 1], strides = [1, 1]} : vector<64x3xf32> to vector<64x1xf32>
    %15 = vector.extract_strided_slice %1 {offsets = [1, 0], sizes = [1, 256], strides = [1, 1]} : vector<3x256xf32> to vector<1x256xf32>
    %16 = vector.broadcast %14 : vector<64x1xf32> to vector<64x256xf32>
    %17 = vector.broadcast %15 : vector<1x256xf32> to vector<64x256xf32>
    %18 = arith.subf %16, %17 : vector<64x256xf32>
    %19 = arith.mulf %18, %18 : vector<64x256xf32>
    %20 = arith.addf %13, %19 : vector<64x256xf32>
    %21 = vector.extract_strided_slice %3 {offsets = [0, 2], sizes = [64, 1], strides = [1, 1]} : vector<64x3xf32> to vector<64x1xf32>
    %22 = vector.extract_strided_slice %1 {offsets = [2, 0], sizes = [1, 256], strides = [1, 1]} : vector<3x256xf32> to vector<1x256xf32>
    %23 = vector.broadcast %21 : vector<64x1xf32> to vector<64x256xf32>
    %24 = vector.broadcast %22 : vector<1x256xf32> to vector<64x256xf32>
    %25 = arith.subf %23, %24 : vector<64x256xf32>
    %26 = arith.mulf %25, %25 : vector<64x256xf32>
    %27 = arith.addf %20, %26 : vector<64x256xf32>
    %28 = tpu.iota {dimensions = array<i32: 0>} : vector<64x256xi32>
    %29 = tpu.bitcast %27 : vector<64x256xf32> -> vector<64x256xi32>
    %c-64_i32 = arith.constant -64 : i32
    %30 = vector.broadcast %c-64_i32 : i32 to vector<64x256xi32>
    %31 = arith.andi %29, %30 : vector<64x256xi32>
    %32 = arith.ori %31, %28 : vector<64x256xi32>
    %cst = arith.constant dense<2147483647> : vector<256xi32>
    %33 = vector.multi_reduction <minsi>, %32, %cst [0] : vector<64x256xi32> to vector<256xi32>
    %34 = vector.shape_cast %33 : vector<256xi32> to vector<1x256xi32>
    %c63_i32 = arith.constant 63 : i32
    %35 = vector.broadcast %c63_i32 : i32 to vector<1x256xi32>
    %36 = arith.andi %34, %35 : vector<1x256xi32>
    %c-64_i32_11 = arith.constant -64 : i32
    %37 = vector.broadcast %c-64_i32_11 : i32 to vector<1x256xi32>
    %38 = arith.andi %34, %37 : vector<1x256xi32>
    %39 = tpu.bitcast %38 : vector<1x256xi32> -> vector<1x256xf32>
    %40 = vector.broadcast %36 : vector<1x256xi32> to vector<64x256xi32>
    %41 = arith.cmpi eq, %28, %40 : vector<64x256xi32>
    %cst_12 = arith.constant 9.99999993E-9 : f32
    %42 = vector.broadcast %cst_12 : f32 to vector<1x256xf32>
    %43 = arith.addf %39, %42 : vector<1x256xf32>
    %cst_13 = arith.constant 1.000000e+00 : f32
    %44 = vector.broadcast %cst_13 : f32 to vector<1x256xf32>
    %45 = arith.divf %44, %43 : vector<1x256xf32>
    %cst_14 = arith.constant 0.000000e+00 : f32
    %46 = vector.shape_cast %45 : vector<1x256xf32> to vector<1x256xf32>
    %47 = vector.broadcast %46 : vector<1x256xf32> to vector<64x256xf32>
    %48 = vector.broadcast %cst_14 : f32 to vector<64x256xf32>
    %49 = arith.select %41, %47, %48 : vector<64x256xi1>, vector<64x256xf32>
    %c2147483647_i32 = arith.constant 2147483647 : i32
    %50 = vector.broadcast %c2147483647_i32 : i32 to vector<64x256xi32>
    %51 = arith.select %41, %50, %32 : vector<64x256xi1>, vector<64x256xi32>
    %cst_15 = arith.constant dense<2147483647> : vector<256xi32>
    %52 = vector.multi_reduction <minsi>, %51, %cst_15 [0] : vector<64x256xi32> to vector<256xi32>
    %53 = vector.shape_cast %52 : vector<256xi32> to vector<1x256xi32>
    %c63_i32_16 = arith.constant 63 : i32
    %54 = vector.broadcast %c63_i32_16 : i32 to vector<1x256xi32>
    %55 = arith.andi %53, %54 : vector<1x256xi32>
    %c-64_i32_17 = arith.constant -64 : i32
    %56 = vector.broadcast %c-64_i32_17 : i32 to vector<1x256xi32>
    %57 = arith.andi %53, %56 : vector<1x256xi32>
    %58 = tpu.bitcast %57 : vector<1x256xi32> -> vector<1x256xf32>
    %59 = vector.broadcast %55 : vector<1x256xi32> to vector<64x256xi32>
    %60 = arith.cmpi eq, %28, %59 : vector<64x256xi32>
    %cst_18 = arith.constant 9.99999993E-9 : f32
    %61 = vector.broadcast %cst_18 : f32 to vector<1x256xf32>
    %62 = arith.addf %58, %61 : vector<1x256xf32>
    %cst_19 = arith.constant 1.000000e+00 : f32
    %63 = vector.broadcast %cst_19 : f32 to vector<1x256xf32>
    %64 = arith.divf %63, %62 : vector<1x256xf32>
    %cst_20 = arith.constant 0.000000e+00 : f32
    %65 = vector.shape_cast %64 : vector<1x256xf32> to vector<1x256xf32>
    %66 = vector.broadcast %65 : vector<1x256xf32> to vector<64x256xf32>
    %67 = vector.broadcast %cst_20 : f32 to vector<64x256xf32>
    %68 = arith.select %60, %66, %67 : vector<64x256xi1>, vector<64x256xf32>
    %69 = arith.addf %49, %68 : vector<64x256xf32>
    %70 = arith.addf %45, %64 : vector<1x256xf32>
    %c2147483647_i32_21 = arith.constant 2147483647 : i32
    %71 = vector.broadcast %c2147483647_i32_21 : i32 to vector<64x256xi32>
    %72 = arith.select %60, %71, %51 : vector<64x256xi1>, vector<64x256xi32>
    %cst_22 = arith.constant dense<2147483647> : vector<256xi32>
    %73 = vector.multi_reduction <minsi>, %72, %cst_22 [0] : vector<64x256xi32> to vector<256xi32>
    %74 = vector.shape_cast %73 : vector<256xi32> to vector<1x256xi32>
    %c63_i32_23 = arith.constant 63 : i32
    %75 = vector.broadcast %c63_i32_23 : i32 to vector<1x256xi32>
    %76 = arith.andi %74, %75 : vector<1x256xi32>
    %c-64_i32_24 = arith.constant -64 : i32
    %77 = vector.broadcast %c-64_i32_24 : i32 to vector<1x256xi32>
    %78 = arith.andi %74, %77 : vector<1x256xi32>
    %79 = tpu.bitcast %78 : vector<1x256xi32> -> vector<1x256xf32>
    %80 = vector.broadcast %76 : vector<1x256xi32> to vector<64x256xi32>
    %81 = arith.cmpi eq, %28, %80 : vector<64x256xi32>
    %cst_25 = arith.constant 9.99999993E-9 : f32
    %82 = vector.broadcast %cst_25 : f32 to vector<1x256xf32>
    %83 = arith.addf %79, %82 : vector<1x256xf32>
    %cst_26 = arith.constant 1.000000e+00 : f32
    %84 = vector.broadcast %cst_26 : f32 to vector<1x256xf32>
    %85 = arith.divf %84, %83 : vector<1x256xf32>
    %cst_27 = arith.constant 0.000000e+00 : f32
    %86 = vector.shape_cast %85 : vector<1x256xf32> to vector<1x256xf32>
    %87 = vector.broadcast %86 : vector<1x256xf32> to vector<64x256xf32>
    %88 = vector.broadcast %cst_27 : f32 to vector<64x256xf32>
    %89 = arith.select %81, %87, %88 : vector<64x256xi1>, vector<64x256xf32>
    %90 = arith.addf %69, %89 : vector<64x256xf32>
    %91 = arith.addf %70, %85 : vector<1x256xf32>
    %cst_28 = arith.constant dense<0.000000e+00> : vector<16x256xf32>
    %92 = tpu.matmul %7, %90, %cst_28 {dimension_numbers = #tpu.dot_dimension_numbers<[1], [0], [0], [1], [0, 0, 1, 1], [], []>, precision = #tpu.contract_precision<fp32>} : vector<16x64xf32>, vector<64x256xf32>, vector<16x256xf32> -> vector<16x256xf32>
    %93 = tpu.reciprocal %91 : vector<1x256xf32> -> vector<1x256xf32>
    %94 = vector.broadcast %93 : vector<1x256xf32> to vector<16x256xf32>
    %95 = arith.mulf %92, %94 : vector<16x256xf32>
    %c0_29 = arith.constant 0 : index
    %c0_30 = arith.constant 0 : index
    %96 = vector.load %arg6[%c0_29, %c0_30] : memref<64x16xf32, #tpu.memory_space<vmem>>, vector<64x16xf32>
    %c0_31 = arith.constant 0 : index
    %c0_32 = arith.constant 0 : index
    %97 = vector.load %arg7[%c0_31, %c0_32] : memref<64x8xf32, #tpu.memory_space<vmem>>, vector<64x8xf32>
    %c0_33 = arith.constant 0 : index
    %c0_34 = arith.constant 0 : index
    %98 = vector.load %arg8[%c0_33, %c0_34] : memref<64x1xf32, #tpu.memory_space<vmem>>, vector<64x1xf32>
    %cst_35 = arith.constant dense<0.000000e+00> : vector<64x256xf32>
    %99 = tpu.matmul %96, %95, %cst_35 {dimension_numbers = #tpu.dot_dimension_numbers<[1], [0], [0], [1], [0, 0, 1, 1], [], []>, precision = #tpu.contract_precision<fp32>} : vector<64x16xf32>, vector<16x256xf32>, vector<64x256xf32> -> vector<64x256xf32>
    %cst_36 = arith.constant dense<0.000000e+00> : vector<64x256xf32>
    %100 = tpu.matmul %97, %5, %cst_36 {dimension_numbers = #tpu.dot_dimension_numbers<[1], [0], [0], [1], [0, 0, 1, 1], [], []>, precision = #tpu.contract_precision<fp32>} : vector<64x8xf32>, vector<8x256xf32>, vector<64x256xf32> -> vector<64x256xf32>
    %101 = arith.addf %99, %100 : vector<64x256xf32>
    %102 = vector.broadcast %98 : vector<64x1xf32> to vector<64x256xf32>
    %103 = arith.addf %101, %102 : vector<64x256xf32>
    %cst_37 = arith.constant 0.000000e+00 : f32
    %104 = vector.broadcast %cst_37 : f32 to vector<64x256xf32>
    %105 = arith.maximumf %103, %104 : vector<64x256xf32>
    %c0_38 = arith.constant 0 : index
    %c0_39 = arith.constant 0 : index
    %106 = vector.load %arg9[%c0_38, %c0_39] : memref<32x64xf32, #tpu.memory_space<vmem>>, vector<32x64xf32>
    %c0_40 = arith.constant 0 : index
    %c0_41 = arith.constant 0 : index
    %107 = vector.load %arg10[%c0_40, %c0_41] : memref<32x1xf32, #tpu.memory_space<vmem>>, vector<32x1xf32>
    %cst_42 = arith.constant dense<0.000000e+00> : vector<32x256xf32>
    %108 = tpu.matmul %106, %105, %cst_42 {dimension_numbers = #tpu.dot_dimension_numbers<[1], [0], [0], [1], [0, 0, 1, 1], [], []>, precision = #tpu.contract_precision<fp32>} : vector<32x64xf32>, vector<64x256xf32>, vector<32x256xf32> -> vector<32x256xf32>
    %109 = vector.broadcast %107 : vector<32x1xf32> to vector<32x256xf32>
    %110 = arith.addf %108, %109 : vector<32x256xf32>
    %cst_43 = arith.constant 0.000000e+00 : f32
    %111 = vector.broadcast %cst_43 : f32 to vector<32x256xf32>
    %112 = arith.maximumf %110, %111 : vector<32x256xf32>
    %c0_44 = arith.constant 0 : index
    %c0_45 = arith.constant 0 : index
    %c0_46 = arith.constant 0 : index
    %113 = vector.load %arg11[%c0_44, %c0_45, %c0_46] : memref<1x32x256xf32, #tpu.memory_space<vmem>>, vector<1x32x256xf32>
    %114 = vector.shape_cast %113 : vector<1x32x256xf32> to vector<32x256xf32>
    %115 = vector.shape_cast %112 : vector<32x256xf32> to vector<1x32x256xf32>
    tpu.vector_store %arg11[%c0_44, %c0_45, %c0_46], %115 {strides = array<i32>} : memref<1x32x256xf32, #tpu.memory_space<vmem>>, vector<1x32x256xf32>,
    return
  }
  func.func @transform_0(%arg0: i32, %arg1: i32) -> (i32, i32, i32) {
    %c0_i32 = arith.constant 0 : i32
    %c0_i32_0 = arith.constant 0 : i32
    return %arg0, %c0_i32, %arg1 : i32, i32, i32
  }
  func.func @transform_1(%arg0: i32, %arg1: i32) -> (i32, i32, i32) {
    %c0_i32 = arith.constant 0 : i32
    %c0_i32_0 = arith.constant 0 : i32
    %c0_i32_1 = arith.constant 0 : i32
    return %arg0, %c0_i32, %c0_i32_0 : i32, i32, i32
  }
  func.func @transform_2(%arg0: i32, %arg1: i32) -> (i32, i32, i32) {
    %c0_i32 = arith.constant 0 : i32
    %c0_i32_0 = arith.constant 0 : i32
    return %arg0, %c0_i32, %arg1 : i32, i32, i32
  }
  func.func @transform_3(%arg0: i32, %arg1: i32) -> (i32, i32, i32) {
    %c0_i32 = arith.constant 0 : i32
    %c0_i32_0 = arith.constant 0 : i32
    %c0_i32_1 = arith.constant 0 : i32
    return %arg0, %c0_i32, %c0_i32_0 : i32, i32, i32
  }
  func.func @transform_4(%arg0: i32, %arg1: i32) -> (i32, i32) {
    %c0_i32 = arith.constant 0 : i32
    %c0_i32_0 = arith.constant 0 : i32
    %c0_i32_1 = arith.constant 0 : i32
    return %c0_i32, %c0_i32_0 : i32, i32
  }
  func.func @transform_5(%arg0: i32, %arg1: i32) -> (i32, i32) {
    %c0_i32 = arith.constant 0 : i32
    %c0_i32_0 = arith.constant 0 : i32
    %c0_i32_1 = arith.constant 0 : i32
    return %c0_i32, %c0_i32_0 : i32, i32
  }
  func.func @transform_6(%arg0: i32, %arg1: i32) -> (i32, i32) {
    %c0_i32 = arith.constant 0 : i32
    %c0_i32_0 = arith.constant 0 : i32
    %c0_i32_1 = arith.constant 0 : i32
    return %c0_i32, %c0_i32_0 : i32, i32
  }
  func.func @transform_7(%arg0: i32, %arg1: i32) -> (i32, i32) {
    %c0_i32 = arith.constant 0 : i32
    %c0_i32_0 = arith.constant 0 : i32
    %c0_i32_1 = arith.constant 0 : i32
    return %c0_i32, %c0_i32_0 : i32, i32
  }
  func.func @transform_8(%arg0: i32, %arg1: i32) -> (i32, i32) {
    %c0_i32 = arith.constant 0 : i32
    %c0_i32_0 = arith.constant 0 : i32
    %c0_i32_1 = arith.constant 0 : i32
    return %c0_i32, %c0_i32_0 : i32, i32
  }
  func.func @transform_9(%arg0: i32, %arg1: i32) -> (i32, i32, i32) {
    %c0_i32 = arith.constant 0 : i32
    %c0_i32_0 = arith.constant 0 : i32
    return %arg0, %c0_i32, %arg1 : i32, i32, i32
  }
}

</mosaic_0001>

<bundles_post_ra>
// kernel: tpu_custom_call.1
= control target key start
LH: loop header
LB: loop body
LE: loop exit
PB: predicated region body
PF: predicated region fallthrough
CT: control target
= control target key end

     0   :  { %14 = vsyncpa [#allocation3], 0  ;;  %s7255_s0 = inlined_call_operand.vmem [shape: f32[2,3,256], index: 0, kind: input, shape index: {}]   ;;  %s7256_s1 = inlined_call_operand.vmem [shape: f32[2,64,3], index: 1, kind: input, shape index: {}]   ;;  %s7257_s2 = inlined_call_operand.vmem [shape: f32[2,8,256], index: 2, kind: input, shape index: {}]   ;;  %s7258_s3 = inlined_call_operand.vmem [shape: f32[2,16,64], index: 3, kind: input, shape index: {}]   ;;  %s7259_s4 = inlined_call_operand.vmem [shape: f32[64,16], index: 4, kind: input, shape index: {}]   ;;  %s7260_s5 = inlined_call_operand.vmem [shape: f32[64,8], index: 5, kind: input, shape index: {}]   ;;  %s7261_s6 = inlined_call_operand.vmem [shape: f32[64,1], index: 6, kind: input, shape index: {}]   ;;  %s7262_s7 = inlined_call_operand.vmem [shape: f32[32,64], index: 7, kind: input, shape index: {}]   ;;  %s7263_s8 = inlined_call_operand.vmem [shape: f32[32,1], index: 8, kind: input, shape index: {}]   ;;  %s7264_s9 = inlined_call_operand.hbm [shape: f32[2,32,256], index: 9, kind: output, shape index: {}]  }
   0x1   :  { %16 = vsyncpa [#allocation3 + $0x1], 0  ;;  %s4866_s30 = smov 0   ;;  %s4868_s10 = smov 0  }
   0x2   :  { %s4870_s11 = smov 0   ;;  %s4872_s12 = smov 0  }
   0x3   :  { %s4874_s13 = smov 0   ;;  %s4876_s14 = smov 0  }
   0x4 LB: > { %s4617_s15 = sadd.s32 4294967295, %s4807_s14   ;;  %s4618_s16 = sadd.s32 4294967294, %s4807_s14   ;;  %s4807_s14 = sphi %s4876_s14, %s22_s14   ;;  %s4803_s13 = sphi %s4874_s13, %s7392_s13   ;;  %s4799_s12 = sphi %s4872_s12, %s7391_s12   ;;  %s4795_s11 = sphi %s4870_s11, %s7390_s11   ;;  %s4791_s10 = sphi %s4868_s10, %s7389_s10   ;;  %s4787_s30 = sphi %s4866_s30, %s7388_s30  }
   0x5   : > { %s34_s17 = sadd.s32 1, %s4803_s13  ;;  %s256_s18 = sadd.s32 1, %s4795_s11 }
   0x6   : > { %p36_p0 = scmp.ge.s32.totalorder %s34_s17, 2  ;;  %p266_p1 = scmp.ne.s32.totalorder %s4795_s11, %s4791_s10 }
   0x7   : > { %p267_p2 = scmp.eq.s32.totalorder %s4617_s15, 1  ;;  %p272_p3 = scmp.ne.s32.totalorder %s4791_s10, %s4787_s30 }
   0x8   : > { %s7394_s17 = smov (%p36_p0, %s34_s17), 0  ;;  %p273_p5 = scmp.eq.s32.totalorder %s4618_s16, 1 }
   0x9   : > { %p4906_p4 = por %p267_p2, %p266_p1  ;;  %s251_s20 = ssub.s32 %s4803_s13, %s7394_s17 }
   0xa   : > { %p4621_p6 = scmp.ge.s32.totalorder %s4807_s14, 1  ;;  %p254_p7 = scmp.eq.s32.totalorder %s251_s20, 0 }
   0xb   : > { %p4913_p8 = por %p273_p5, %p272_p3  ;;  %p348_p9 = scmp.lt.s32.totalorder %s4807_s14, 3 }
   0xc   : > { %s4919_s22 = scalar_select %p254_p7, %s4795_s11, %s256_s18  }
   0xd   : > { %p349_p10 = pnand %p4621_p6, %p348_p9 }
   0xf   : > { %352 = sbr.rel (%p349_p10) target bundleno = 1196 (0x4ac), region = 56 }
  0x14   : > { %p408_p11 = scmp.lt.s32.totalorder %s4799_s12, 1  ;;  %v4809_v0 = vmov 1   ;;  %v4810_v1 = vmov 0   ;;  %v4811_v9 = vmov 2   ;;  %v492_v13 = vlaneseq }
  0x15   : > { %4703 = vset.pattern.permute.xlu0 %v4809_v0  ;;  %4702 = vset.pattern.permute.xlu1 %v4810_v1 }
  0x16   : > { %s4923_s23 = scalar_select %p408_p11, %s4799_s12, 1  ;;  %v4940_v16 = vshrl.u32 %v492_v13, 7 }
  0x18   : > { %s4637_s24 = sshll.u32 %s4923_s23, 6  ;;  %s4636_s28 = sshll.u32 %s4923_s23, 3  ;;  %v576_v19 = vsub.s32 1, %v4940_v16  ;;  %v580_v20 = vsub.s32 5, %v4940_v16  ;;  %v494_v21 = vsub.s32 0, %v4940_v16  ;;  %v498_v22 = vsub.s32 4, %v4940_v16 }
  0x19   : > { %s4929_s27 = scalar_lea.vmem %s7256_s1, %s4637_s24  ;;  %s415_s16 = scalar_lea.vmem %s7255_s0, %s4636_s28  ;;  %v674_v27 = vsub.s32 2, %v4940_v16  ;;  %v678_v29 = vsub.s32 6, %v4940_v16  ;;  %v4974_v48 = vadd.s32 24, %v4940_v16  ;;  %v4977_v49 = vadd.s32 8, %v4940_v16 }
  0x1a   : > { %v441_v2 = vld [vmem:[%s4929_s27 + $0x10] sm:$0xff]  ;;  %v439_v3 = vld [vmem:[%s4929_s27] sm:$0xff]  ;;  %v442_v4 = vld [vmem:[%s4929_s27 + $0x18] sm:$0xff]  ;;  %v4982_v52 = vadd.s32 32, %v4940_v16  ;;  %v4985_v53 = vadd.s32 16, %v4940_v16  ;;  %s4638_s18 = sshll.u32 %s4923_s23, 4 }
  0x1b   : > { %463 = vperm.xlu1 %4702, %v441_v2   ;;  %543 = vperm.xlu0 %4703, %v439_v3   ;;  %v440_v5 = vld [vmem:[%s4929_s27 + $0x8] sm:$0xff]  ;;  %v443_v7 = vld [vmem:[%s4929_s27 + $0x20] sm:$0xff]  ;;  %v446_v8 = vld [vmem:[%s4929_s27 + $0x38] sm:$0xff]  ;;  %s5307_s25 = scalar_lea.vmem %s7258_s3, %s4638_s18  ;;  %s430_s15 = scalar_lea.vmem %s7257_s2, %s4638_s18 }
  0x1c   : > { %v444_v6 = vld [vmem:[%s4929_s27 + $0x28] sm:$0xff]  ;;  %v445_v10 = vld [vmem:[%s4929_s27 + $0x30] sm:$0xff]  ;;  %v438_v23 = vld [vmem:[%s415_s16] sm:$0x77]  ;;  %s404_s27 = sand.u32 1, %s4791_s10  }
  0x1d   : > { %v577_v26 = vrot.slane %v438_v23, %v576_v19  ;;  %v581_v28 = vrot.slane %v438_v23, %v580_v20  ;;  %v495_v30 = vrot.slane %v438_v23, %v494_v21  ;;  %v499_v31 = vrot.slane %v438_v23, %v498_v22  ;;  %s4622_s28 = sshll.u32 %s404_s27, 6 }
  0x1e   : > { %v675_v35 = vrot.slane %v438_v23, %v674_v27  ;;  %v679_v37 = vrot.slane %v438_v23, %v678_v29  ;;  %s7187_s29 = scalar_lea.vmem [#allocation2], %s4622_s28 }
  0x1f   : > { %468 = vperm.xlu1 %4702, %v442_v4   ;;  %555 = vperm.xlu0 %4703, %v442_v4   ;;  %v4951_v33 = vrot.slane %v577_v26, %v576_v19  ;;  %v4955_v36 = vrot.slane %v581_v28, %v576_v19  ;;  %v4957_v38 = vrot.slane %v495_v30, %v494_v21  ;;  %s4496_s23 = sshll.u32 %s7187_s29, 4  ;;  %s7204_s23 = int_to_ptr.vmem [resolvable:$true] %s4496_s23 }
  0x20   : > { %v4959_v39 = vrot.slane %v499_v31, %v494_v21  ;;  %v4966_v44 = vrot.slane %v675_v35, %v674_v27  ;;  %v4971_v47 = vrot.slane %v679_v37, %v674_v27  ;;  %s4731_s24 = scalar_lea.vmem %s7204_s23, 1024 }
  0x21   : > { %p4732_p12 = scmp.ne.s32.totalorder %s7204_s23, %s4731_s24 }
  0x23   : > { %4704 = vset.pattern.permute.xlu1 %v4809_v0  ;;  %4705 = vset.pattern.permute.xlu0 %v4810_v1  ;;  %p4733_p13 = pnand %p4732_p12, %p4906_p4 }
  0x24   : > { %547 = vperm.xlu1 %4704, %v440_v5   ;;  %453 = vperm.xlu0 %4705, %v439_v3  }
  0x25   : > { %p4734_p0 = pneg %p4733_p13 }
  0x28   : > { %551 = vperm.xlu1 %4704, %v441_v2   ;;  %458 = vperm.xlu0 %4705, %v440_v5  }
  0x2c   : > { %4706 = vset.pattern.permute.xlu1 %v4810_v1  ;;  %478 = vperm.xlu0 %4705, %v444_v6  }
  0x2d   : > { %473 = vperm.xlu1 %4706, %v443_v7  }
  0x30   : > { %488 = vperm.xlu0 %4705, %v446_v8  }
  0x31   : > { %4707 = vset.pattern.permute.xlu1 %v4809_v0 }
  0x32   : > { %559 = vperm.xlu1 %4707, %v443_v7  }
  0x34   : > { %4710 = vset.pattern.permute.xlu0 %v4811_v9 }
  0x35   : > { %641 = vperm.xlu0 %4710, %v439_v3  }
  0x36   : > { %563 = vperm.xlu1 %4707, %v444_v6  }
  0x39   : > { %653 = vperm.xlu0 %4710, %v442_v4  }
  0x3a   : > { %4708 = vset.pattern.permute.xlu1 %v4811_v9 }
  0x3b   : > { %645 = vperm.xlu1 %4708, %v440_v5  }
  0x3d   : > { %657 = vperm.xlu0 %4710, %v443_v7  }
  0x3f   : > { %649 = vperm.xlu1 %4708, %v441_v2  }
  0x41   : > { %669 = vperm.xlu0 %4710, %v446_v8  }
  0x43   : > { %4709 = vset.pattern.permute.xlu1 %v4810_v1 }
  0x44   : > { %483 = vperm.xlu1 %4709, %v445_v10  }
  0x45   : > { %4714 = vset.pattern.permute.xlu0 %v4810_v1 }
  0x48   : > { %4711 = vset.pattern.permute.xlu1 %v4809_v0 }
  0x49   : > { %567 = vperm.xlu1 %4711, %v445_v10  }
  0x4d   : > { %571 = vperm.xlu1 %4711, %v446_v8  }
  0x51   : > { %4712 = vset.pattern.permute.xlu1 %v4811_v9 }
  0x52   : > { %661 = vperm.xlu1 %4712, %v444_v6  }
  0x56   : > { %665 = vperm.xlu1 %4712, %v445_v10  }
  0x5a   : > { %4713 = vset.pattern.permute.xlu1 %v4810_v1 }
  0x96   : > { %v464_v11 = vpop.permute.xlu1 %463  ;;  %v544_v12 = vpop.permute.xlu0 %543 }
  0x97   : > { %v592_v50 = vsub.f32 %v544_v12, %v4951_v33  ;;  %v514_v54 = vsub.f32 %v464_v11, %v4957_v38  ;;  %v593_v55 = vsub.f32 %v544_v12, %v4955_v36  ;;  %v515_v58 = vsub.f32 %v464_v11, %v4959_v39 }
  0x98   : > { %v4998_v11 = vadd.s32 56, %v4940_v16 }
  0x99   : > { %v608_v4 = vmul.f32 %v592_v50, %v592_v50  ;;  %v609_v8 = vmul.f32 %v593_v55, %v593_v55  ;;  %v530_v12 = vmul.f32 %v514_v54, %v514_v54  ;;  %v531_v13 = vmul.f32 %v515_v58, %v515_v58 }
  0x9a   : > { %v469_v14 = vpop.permute.xlu1 %468  ;;  %v556_v15 = vpop.permute.xlu0 %555 }
  0x9b   : > { %v516_v41 = vsub.f32 %v469_v14, %v4957_v38  ;;  %v517_v42 = vsub.f32 %v469_v14, %v4959_v39  ;;  %v598_v43 = vsub.f32 %v556_v15, %v4951_v33  ;;  %v599_v45 = vsub.f32 %v556_v15, %v4955_v36 }
  0x9c   : > { %v5001_v15 = vadd.s32 40, %v4940_v16 }
  0x9d   : > { %v532_v59 = vmul.f32 %v516_v41, %v516_v41  ;;  %v533_v60 = vmul.f32 %v517_v42, %v517_v42  ;;  %v614_v61 = vmul.f32 %v598_v43, %v598_v43  ;;  %v615_v63 = vmul.f32 %v599_v45, %v599_v45 }
  0x9f   : > { %v548_v17 = vpop.permute.xlu1 %547  ;;  %v454_v18 = vpop.permute.xlu0 %453  ;;  %v630_v14 = vadd.f32 %v614_v61, %v532_v59 }
  0xa0   : > { %v510_v51 = vsub.f32 %v454_v18, %v4957_v38  ;;  %v511_v56 = vsub.f32 %v454_v18, %v4959_v39  ;;  %v594_v0 = vsub.f32 %v548_v17, %v4951_v33  ;;  %v595_v1 = vsub.f32 %v548_v17, %v4955_v36 }
  0xa1   : > { %v631_v17 = vadd.f32 %v615_v63, %v533_v60 }
  0xa2   : > { %v526_v5 = vmul.f32 %v510_v51, %v510_v51  ;;  %v527_v9 = vmul.f32 %v511_v56, %v511_v56  ;;  %v610_v18 = vmul.f32 %v594_v0, %v594_v0  ;;  %v611_v19 = vmul.f32 %v595_v1, %v595_v1 }
  0xa3   : > { %v552_v24 = vpop.permute.xlu1 %551  ;;  %v459_v25 = vpop.permute.xlu0 %458 }
  0xa4   : > { %v596_v57 = vsub.f32 %v552_v24, %v4951_v33  ;;  %v597_v2 = vsub.f32 %v552_v24, %v4955_v36  ;;  %v512_v6 = vsub.f32 %v459_v25, %v4957_v38  ;;  %v513_v7 = vsub.f32 %v459_v25, %v4959_v39 }
  0xa5   : > { %v624_v22 = vadd.f32 %v608_v4, %v526_v5  ;;  %v625_v27 = vadd.f32 %v609_v8, %v527_v9 }
  0xa6   : > { %v612_v10 = vmul.f32 %v596_v57, %v596_v57  ;;  %v613_v20 = vmul.f32 %v597_v2, %v597_v2  ;;  %v528_v23 = vmul.f32 %v512_v6, %v512_v6  ;;  %v529_v24 = vmul.f32 %v513_v7, %v513_v7 }
  0xa7   : > { %v479_v32 = vpop.permute.xlu0 %478 }
  0xa8   : > { %v4953_v34 = vpop.permute.xlu1 %473  ;;  %v520_v25 = vsub.f32 %v479_v32, %v4957_v38  ;;  %v628_v28 = vadd.f32 %v612_v10, %v530_v12  ;;  %v521_v31 = vsub.f32 %v479_v32, %v4959_v39  ;;  %v629_v42 = vadd.f32 %v613_v20, %v531_v13 }
  0xa9   : > { %v518_v43 = vsub.f32 %v4953_v34, %v4957_v38  ;;  %v519_v45 = vsub.f32 %v4953_v34, %v4959_v39  ;;  %v626_v51 = vadd.f32 %v610_v18, %v528_v23  ;;  %v627_v54 = vadd.f32 %v611_v19, %v529_v24 }
  0xaa   : > { %v536_v55 = vmul.f32 %v520_v25, %v520_v25 }
  0xab   : > { %v4961_v40 = vpop.permute.xlu0 %488  ;;  %v534_v1 = vmul.f32 %v518_v43, %v518_v43  ;;  %v535_v2 = vmul.f32 %v519_v45, %v519_v45 }
  0xac   : > { %v525_v25 = vsub.f32 %v4961_v40, %v4959_v39 }
  0xad   : > { %v4969_v46 = vpop.permute.xlu1 %559 }
  0xae   : > { %v600_v50 = vsub.f32 %v4969_v46, %v4951_v33  ;;  %v601_v4 = vsub.f32 %v4969_v46, %v4955_v36  ;;  %v524_v46 = vsub.f32 %v4961_v40, %v4957_v38  ;;  %v5030_v40 = vadd.s32 48, %v4940_v16 }
  0xb0   : > { %v642_v62 = vpop.permute.xlu0 %641  ;;  %v616_v5 = vmul.f32 %v600_v50, %v600_v50 }
  0xb1   : > { %v564_v3 = vpop.permute.xlu1 %563  ;;  %v690_v29 = vsub.f32 %v642_v62, %v4966_v44  ;;  %v691_v30 = vsub.f32 %v642_v62, %v4971_v47  ;;  %v537_v62 = vmul.f32 %v521_v31, %v521_v31 }
  0xb2   : > { %v602_v13 = vsub.f32 %v564_v3, %v4951_v33  ;;  %v603_v18 = vsub.f32 %v564_v3, %v4955_v36 }
  0xb3   : > { %v706_v57 = vmul.f32 %v690_v29, %v690_v29  ;;  %v707_v58 = vmul.f32 %v691_v30, %v691_v30  ;;  %v632_v29 = vadd.f32 %v616_v5, %v534_v1 }
  0xb4   : > { %v654_v21 = vpop.permute.xlu0 %653 }
  0xb5   : > { %v696_v35 = vsub.f32 %v654_v21, %v4966_v44  ;;  %v697_v37 = vsub.f32 %v654_v21, %v4971_v47  ;;  %v722_v10 = vadd.f32 %v706_v57, %v624_v22  ;;  %v723_v12 = vadd.f32 %v707_v58, %v625_v27 }
  0xb6   : > { %v646_v26 = vpop.permute.xlu1 %645 }
  0xb7   : > { %v692_v41 = vsub.f32 %v646_v26, %v4966_v44  ;;  %v693_v32 = vsub.f32 %v646_v26, %v4971_v47  ;;  %v712_v63 = vmul.f32 %v696_v35, %v696_v35  ;;  %v713_v0 = vmul.f32 %v697_v37, %v697_v37 }
  0xb8   : > { %v658_v59 = vpop.permute.xlu0 %657  ;;  %v617_v26 = vmul.f32 %v601_v4, %v601_v4  ;;  %v763_v35 = vand.u32 4294967232, %v722_v10  ;;  %v764_v3 = vand.u32 4294967232, %v723_v12  ;;  %v618_v37 = vmul.f32 %v602_v13, %v602_v13 }
  0xb9   : > { %v708_v34 = vmul.f32 %v692_v41, %v692_v41  ;;  %v709_v6 = vmul.f32 %v693_v32, %v693_v32  ;;  %v698_v7 = vsub.f32 %v658_v59, %v4966_v44  ;;  %v728_v20 = vadd.f32 %v712_v63, %v630_v14 }
  0xba   : > { %v650_v56 = vpop.permute.xlu1 %649  ;;  %v729_v21 = vadd.f32 %v713_v0, %v631_v17  ;;  %v699_v24 = vsub.f32 %v658_v59, %v4971_v47  ;;  %v619_v14 = vmul.f32 %v603_v18, %v603_v18  ;;  %v541_v32 = vmul.f32 %v525_v25, %v525_v25 }
  0xbb   : > { %v694_v60 = vsub.f32 %v650_v56, %v4966_v44  ;;  %v695_v61 = vsub.f32 %v650_v56, %v4971_v47  ;;  %v724_v23 = vadd.f32 %v708_v34, %v626_v51  ;;  %v725_v22 = vadd.f32 %v709_v6, %v627_v54 }
  0xbc   : > { %v714_v27 = vmul.f32 %v698_v7, %v698_v7  ;;  %v769_v17 = vand.u32 4294967232, %v728_v20  ;;  %v770_v41 = vand.u32 4294967232, %v729_v21  ;;  %v715_v45 = vmul.f32 %v699_v24, %v699_v24 }
  0xbd   : > { %v710_v8 = vmul.f32 %v694_v60, %v694_v60  ;;  %v711_v9 = vmul.f32 %v695_v61, %v695_v61  ;;  %v765_v43 = vand.u32 4294967232, %v724_v23  ;;  %v540_v51 = vmul.f32 %v524_v46, %v524_v46 }
  0xbe   : > { %v633_v56 = vadd.f32 %v617_v26, %v535_v2  ;;  %v766_v57 = vand.u32 4294967232, %v725_v22  ;;  %v730_v54 = vadd.f32 %v714_v27, %v632_v29  ;;  %v5033_v59 = vor.u32 %v763_v35, %v4940_v16 }
  0xbf   : > { %v484_v19 = vpop.permute.xlu1 %483  ;;  %v726_v30 = vadd.f32 %v710_v8, %v628_v28  ;;  %v727_v31 = vadd.f32 %v711_v9, %v629_v42  ;;  %v670_v42 = vpop.permute.xlu0 %669  ;;  %v5036_v60 = vor.u32 %v764_v3, %v4940_v16  ;;  %v634_v61 = vadd.f32 %v618_v37, %v536_v55 }
  0xc0   : > { %v635_v63 = vadd.f32 %v619_v14, %v537_v62  ;;  %v5039_v0 = vor.u32 %v769_v17, %v4974_v48  ;;  %v5042_v34 = vor.u32 %v770_v41, %v4974_v48  ;;  %v5045_v1 = vor.u32 %v765_v43, %v4977_v49 }
  0xc1   : > { %v767_v58 = vand.u32 4294967232, %v726_v30  ;;  %v768_v28 = vand.u32 4294967232, %v727_v31  ;;  %v731_v2 = vadd.f32 %v715_v45, %v633_v56  ;;  %v704_v5 = vsub.f32 %v670_v42, %v4966_v44 }
  0xc2   : > { %v705_v6 = vsub.f32 %v670_v42, %v4971_v47  ;;  %v5052_v62 = vor.u32 %v766_v57, %v4977_v49  ;;  %v771_v8 = vand.u32 4294967232, %v730_v54  ;;  %vm797_vm0 = vcmp.lt.s32.totalorder %v5045_v1, %v5039_v0 }
  0xc3   : > { %v5055_v9 = vor.u32 %v767_v58, %v4985_v53  ;;  %v5058_v10 = vor.u32 %v768_v28, %v4985_v53  ;;  %v772_v21 = vand.u32 4294967232, %v731_v2  ;;  %v522_v23 = vsub.f32 %v484_v19, %v4957_v38 }
  0xc4   : > { %v568_v50 = vpop.permute.xlu1 %567  ;;  %v523_v24 = vsub.f32 %v484_v19, %v4959_v39  ;;  %v720_v46 = vmul.f32 %v704_v5, %v704_v5  ;;  %v721_v25 = vmul.f32 %v705_v6, %v705_v6  ;;  %vm820_vm3 = vcmp.lt.s32.totalorder %v5052_v62, %v5042_v34 }
  0xc5   : > { %v604_v12 = vsub.f32 %v568_v50, %v4951_v33  ;;  %v605_v13 = vsub.f32 %v568_v50, %v4955_v36  ;;  %vm795_vm1 = vcmp.lt.s32.totalorder %v5033_v59, %v5055_v9  ;;  %vm818_vm2 = vcmp.lt.s32.totalorder %v5036_v60, %v5058_v10 }
  0xc6   : > { %v5075_v39 = vor.u32 %v771_v8, %v4982_v52  ;;  %v796_v3 = vsel %vm795_vm1, %v5033_v59, %v5055_v9  ;;  %v819_v37 = vsel %vm818_vm2, %v5036_v60, %v5058_v10  ;;  %v538_v14 = vmul.f32 %v522_v23, %v522_v23 }
  0xc7   : > { %v620_v27 = vmul.f32 %v604_v12, %v604_v12  ;;  %v621_v30 = vmul.f32 %v605_v13, %v605_v13  ;;  %v539_v17 = vmul.f32 %v523_v24, %v523_v24  ;;  %v7297_v13 = vmov 0.0  }
  0xc8   : > { %v572_v4 = vpop.permute.xlu1 %571  ;;  %vm799_vm4 = vcmp.lt.s32.totalorder %v796_v3, %v5075_v39  ;;  %1220 = vmatprep.mubr.f32.mxu0 %v7297_v13  ;;  %1387 = vmatprep.mubr.f32.mxu1 %v7297_v13 }
  0xc9   : > { %v606_v7 = vsub.f32 %v572_v4, %v4951_v33  ;;  %v607_v55 = vsub.f32 %v572_v4, %v4955_v36  ;;  %v637_v56 = vadd.f32 %v621_v30, %v539_v17  ;;  %v798_v4 = vsel %vm797_vm0, %v5045_v1, %v5039_v0 }
  0xca   : > { %v800_v24 = vsel %vm799_vm4, %v796_v3, %v5075_v39 }
  0xcb   : > { %v622_v18 = vmul.f32 %v606_v7, %v606_v7  ;;  %v623_v20 = vmul.f32 %v607_v55, %v607_v55 }
  0xcd   : > { %v638_v26 = vadd.f32 %v622_v18, %v540_v51  ;;  %v639_v29 = vadd.f32 %v623_v20, %v541_v32  ;;  %v662_v22 = vpop.permute.xlu1 %661  ;;  %v636_v32 = vadd.f32 %v620_v27, %v538_v14 }
  0xce   : > { %v700_v33 = vsub.f32 %v662_v22, %v4966_v44  ;;  %v701_v36 = vsub.f32 %v662_v22, %v4971_v47 }
  0xcf   : > { %v736_v38 = vadd.f32 %v720_v46, %v638_v26  ;;  %v737_v31 = vadd.f32 %v721_v25, %v639_v29 }
  0xd0   : > { %v716_v19 = vmul.f32 %v700_v33, %v700_v33  ;;  %v717_v35 = vmul.f32 %v701_v36, %v701_v36 }
  0xd1   : > { %v666_v41 = vpop.permute.xlu1 %665  ;;  %v777_v57 = vand.u32 4294967232, %v736_v38  ;;  %v778_v54 = vand.u32 4294967232, %v737_v31 }
  0xd2   : > { %v732_v43 = vadd.f32 %v716_v19, %v634_v61  ;;  %v733_v45 = vadd.f32 %v717_v35, %v635_v63  ;;  %v702_v50 = vsub.f32 %v666_v41, %v4966_v44  ;;  %v703_v51 = vsub.f32 %v666_v41, %v4971_v47 }
  0xd3   : > { %v821_v44 = vsel %vm820_vm3, %v5052_v62, %v5042_v34  ;;  %v5094_v47 = vor.u32 %v772_v21, %v4982_v52  ;;  %v5105_v7 = vor.u32 %v777_v57, %v4998_v11  ;;  %v5108_v55 = vor.u32 %v778_v54, %v4998_v11 }
  0xd4   : > { %v773_v58 = vand.u32 4294967232, %v732_v43  ;;  %v774_v28 = vand.u32 4294967232, %v733_v45  ;;  %v718_v42 = vmul.f32 %v702_v50, %v702_v50  ;;  %v719_v2 = vmul.f32 %v703_v51, %v703_v51 }
  0xd5   : > { %vm822_vm5 = vcmp.lt.s32.totalorder %v819_v37, %v5094_v47 }
  0xd6   : > { %v5098_v61 = vor.u32 %v773_v58, %v5001_v15  ;;  %v5101_v63 = vor.u32 %v774_v28, %v5001_v15  ;;  %v734_v5 = vadd.f32 %v718_v42, %v636_v32  ;;  %v735_v6 = vadd.f32 %v719_v2, %v637_v56 }
  0xd7   : > { %v823_v46 = vsel %vm822_vm5, %v819_v37, %v5094_v47 }
  0xd8   : > { %vm801_vm6 = vcmp.lt.s32.totalorder %v798_v4, %v5098_v61  ;;  %vm824_vm7 = vcmp.lt.s32.totalorder %v821_v44, %v5101_v63  ;;  %v775_v8 = vand.u32 4294967232, %v734_v5  ;;  %v776_v12 = vand.u32 4294967232, %v735_v6 }
  0xd9   : > { %v802_v18 = vsel %vm801_vm6, %v798_v4, %v5098_v61  ;;  %v825_v20 = vsel %vm824_vm7, %v821_v44, %v5101_v63 }
  0xda   : > { %vm805_vm8 = vcmp.lt.s32.totalorder %v802_v18, %v5105_v7  ;;  %vm828_vm9 = vcmp.lt.s32.totalorder %v825_v20, %v5108_v55  ;;  %v791_v21 = vor.u32 %v775_v8, %v5030_v40  ;;  %v5120_v23 = vor.u32 %v776_v12, %v5030_v40 }
  0xdb   : > { %v806_v26 = vsel %vm805_vm8, %v802_v18, %v5105_v7  ;;  %v829_v22 = vsel %vm828_vm9, %v825_v20, %v5108_v55 }
  0xdc   : > { %vm803_vm10 = vcmp.lt.s32.totalorder %v800_v24, %v791_v21  ;;  %vm826_vm11 = vcmp.lt.s32.totalorder %v823_v46, %v5120_v23 }
  0xdd   : > { %v804_v25 = vsel %vm803_vm10, %v800_v24, %v791_v21  ;;  %v827_v29 = vsel %vm826_vm11, %v823_v46, %v5120_v23 }
  0xde   : > { %vm807_vm12 = vcmp.lt.s32.totalorder %v804_v25, %v806_v26  ;;  %vm830_vm13 = vcmp.lt.s32.totalorder %v827_v29, %v829_v22 }
  0xdf   : > { %v808_v33 = vsel %vm807_vm12, %v804_v25, %v806_v26  ;;  %v831_v36 = vsel %vm830_vm13, %v827_v29, %v829_v22 }
  0xe0   : > { %v809_v27 = vrot.slane %v808_v33, 4  ;;  %v832_v30 = vrot.slane %v831_v36, 4 }
  0xe2   : > { %vm810_vm14 = vcmp.lt.s32.totalorder %v808_v33, %v809_v27  ;;  %vm833_vm15 = vcmp.lt.s32.totalorder %v831_v36, %v832_v30 }
  0xe3   : > { %v811_v38 = vsel %vm810_vm14, %v808_v33, %v809_v27  ;;  %v834_v31 = vsel %vm833_vm15, %v831_v36, %v832_v30  ;;  %v449_v30 = vld [vmem:[%s5307_s25] sm:$0xff] }
  0xe4   : > { %v812_v19 = vrot.slane %v811_v38, 2  ;;  %v835_v35 = vrot.slane %v834_v31, 2 }
  0xe6   : > { %vm813_vm0 = vcmp.lt.s32.totalorder %v811_v38, %v812_v19  ;;  %vm836_vm1 = vcmp.lt.s32.totalorder %v834_v31, %v835_v35 }
  0xe7   : > { %v814_v3 = vsel %vm813_vm0, %v811_v38, %v812_v19  ;;  %v837_v37 = vsel %vm836_vm1, %v834_v31, %v835_v35 }
  0xe8   : > { %v815_v14 = vrot.slane %v814_v3, 1  ;;  %v838_v17 = vrot.slane %v837_v37, 1 }
  0xea   : > { %vm816_vm2 = vcmp.lt.s32.totalorder %v814_v3, %v815_v14  ;;  %vm839_vm3 = vcmp.lt.s32.totalorder %v837_v37, %v838_v17 }
  0xeb   : > { %v5132_v41 = vsel %vm816_vm2, %v814_v3, %v815_v14  ;;  %v5134_v43 = vsel %vm839_vm3, %v837_v37, %v838_v17 }
  0xec   : > { %v5137_v45 = vand.u32 63, %v5132_v41  ;;  %v5140_v50 = vand.u32 63, %v5134_v43  ;;  %v843_v26 = vand.u32 4294967232, %v5132_v41  ;;  %v844_v33 = vand.u32 4294967232, %v5134_v43 }
  0xee   : > { %vm7265_vm4 = vcmp.eq.s32.totalorder %v4940_v16, %v5137_v45  ;;  %vm7266_vm5 = vcmp.eq.s32.totalorder %v4940_v16, %v5140_v50  ;;  %vm7267_vm6 = vcmp.eq.s32.totalorder %v4977_v49, %v5137_v45  ;;  %vm7268_vm7 = vcmp.eq.s32.totalorder %v4977_v49, %v5140_v50 }
  0xef   : > { %vm7269_vm8 = vcmp.eq.s32.totalorder %v4985_v53, %v5137_v45  ;;  %vm7270_vm9 = vcmp.eq.s32.totalorder %v4985_v53, %v5140_v50  ;;  %vm7271_vm10 = vcmp.eq.s32.totalorder %v4974_v48, %v5137_v45  ;;  %vm7272_vm11 = vcmp.eq.s32.totalorder %v4974_v48, %v5140_v50 }
  0xf0   : > { %vm7275_vm12 = vcmp.eq.s32.totalorder %v4982_v52, %v5137_v45  ;;  %vm7278_vm13 = vcmp.eq.s32.totalorder %v4982_v52, %v5140_v50  ;;  %vm7279_vm14 = vcmp.eq.s32.totalorder %v5001_v15, %v5137_v45  ;;  %vm7280_vm15 = vcmp.eq.s32.totalorder %v5001_v15, %v5140_v50 }
  0xf1   : > { %vm859_vm0 = vcmp.eq.s32.totalorder %v5030_v40, %v5137_v45  ;;  %vm860_vm1 = vcmp.eq.s32.totalorder %v5030_v40, %v5140_v50  ;;  %v5174_v51 = vsel %vm7265_vm4, 2147483647, %v5033_v59  ;;  %vm861_vm2 = vcmp.eq.s32.totalorder %v4998_v11, %v5137_v45 }
  0xf2   : > { %v5182_v32 = vsel %vm7266_vm5, 2147483647, %v5036_v60  ;;  %v5188_v56 = vsel %vm7267_vm6, 2147483647, %v5045_v1  ;;  %v5194_v59 = vsel %vm7268_vm7, 2147483647, %v5052_v62  ;;  %vm862_vm3 = vcmp.eq.s32.totalorder %v4998_v11, %v5140_v50 }
  0xf3   : > { %v5202_v60 = vsel %vm7269_vm8, 2147483647, %v5055_v9  ;;  %v5208_v1 = vsel %vm7270_vm9, 2147483647, %v5058_v10  ;;  %v5214_v62 = vsel %vm7271_vm10, 2147483647, %v5039_v0 }
  0xf4   : > { %v5220_v57 = vsel %vm7272_vm11, 2147483647, %v5042_v34  ;;  %v5226_v9 = vsel %vm7275_vm12, 2147483647, %v5075_v39  ;;  %v5232_v10 = vsel %vm7278_vm13, 2147483647, %v5094_v47  ;;  %vm901_vm4 = vcmp.lt.s32.totalorder %v5174_v51, %v5202_v60 }
  0xf5   : > { %v5238_v0 = vsel %vm7279_vm14, 2147483647, %v5098_v61  ;;  %v5244_v34 = vsel %vm7280_vm15, 2147483647, %v5101_v63  ;;  %v5249_v39 = vsel %vm859_vm0, 2147483647, %v791_v21  ;;  %v902_v42 = vsel %vm901_vm4, %v5174_v51, %v5202_v60 }
  0xf6   : > { %v5257_v54 = vsel %vm860_vm1, 2147483647, %v5120_v23  ;;  %v5263_v58 = vsel %vm861_vm2, 2147483647, %v5105_v7  ;;  %v5269_v28 = vsel %vm862_vm3, 2147483647, %v5108_v55  ;;  %vm903_vm5 = vcmp.lt.s32.totalorder %v5188_v56, %v5214_v62 }
  0xf7   : > { %vm905_vm6 = vcmp.lt.s32.totalorder %v902_v42, %v5226_v9  ;;  %vm924_vm7 = vcmp.lt.s32.totalorder %v5182_v32, %v5208_v1  ;;  %vm926_vm8 = vcmp.lt.s32.totalorder %v5194_v59, %v5220_v57  ;;  %v904_v2 = vsel %vm903_vm5, %v5188_v56, %v5214_v62 }
  0xf8   : > { %v906_v4 = vsel %vm905_vm6, %v902_v42, %v5226_v9  ;;  %v925_v44 = vsel %vm924_vm7, %v5182_v32, %v5208_v1  ;;  %v927_v47 = vsel %vm926_vm8, %v5194_v59, %v5220_v57  ;;  %vm907_vm4 = vcmp.lt.s32.totalorder %v904_v2, %v5238_v0 }
  0xf9   : > { %vm909_vm9 = vcmp.lt.s32.totalorder %v906_v4, %v5249_v39  ;;  %vm928_vm10 = vcmp.lt.s32.totalorder %v925_v44, %v5232_v10  ;;  %vm930_vm11 = vcmp.lt.s32.totalorder %v927_v47, %v5244_v34  ;;  %v908_v61 = vsel %vm907_vm4, %v904_v2, %v5238_v0 }
  0xfa   : > { %v910_v63 = vsel %vm909_vm9, %v906_v4, %v5249_v39  ;;  %v929_v5 = vsel %vm928_vm10, %v925_v44, %v5232_v10  ;;  %v931_v6 = vsel %vm930_vm11, %v927_v47, %v5244_v34  ;;  %vm911_vm5 = vcmp.lt.s32.totalorder %v908_v61, %v5263_v58 }
  0xfb   : > { %vm932_vm6 = vcmp.lt.s32.totalorder %v929_v5, %v5257_v54  ;;  %vm934_vm7 = vcmp.lt.s32.totalorder %v931_v6, %v5269_v28  ;;  %v912_v7 = vsel %vm911_vm5, %v908_v61, %v5263_v58  ;;  %v863_v38 = vadd.f32 1e-08, %v843_v26 }
  0xfc   : > { %v933_v55 = vsel %vm932_vm6, %v929_v5, %v5257_v54  ;;  %v935_v8 = vsel %vm934_vm7, %v931_v6, %v5269_v28  ;;  %vm913_vm8 = vcmp.lt.s32.totalorder %v910_v63, %v912_v7  ;;  %vm1133_vm6 = vcmask 523264  }
  0xfd   : > { %vm936_vm9 = vcmp.lt.s32.totalorder %v933_v55, %v935_v8  ;;  %v914_v12 = vsel %vm913_vm8, %v910_v63, %v912_v7  ;;  %v864_v35 = vadd.f32 1e-08, %v844_v33  ;;  %v5317_v14 = vsel %vm1133_vm6, %v449_v30, 0 }
  0xfe   : > { %v937_v18 = vsel %vm936_vm9, %v933_v55, %v935_v8  ;;  %v915_v20 = vrot.slane %v914_v12, 4  ;;  %4715 = vrcp.f32 %v863_v38  ;;  %v5328_v17 = vand.u32 4294901760, %v5317_v14 }
  0xff   : > { %v938_v21 = vrot.slane %v937_v18, 4  ;;  %4717 = vrcp.f32 %v864_v35 }
 0x100   : > { %vm916_vm10 = vcmp.lt.s32.totalorder %v914_v12, %v915_v20 }
 0x101   : > { %vm939_vm11 = vcmp.lt.s32.totalorder %v937_v18, %v938_v21  ;;  %v917_v23 = vsel %vm916_vm10, %v914_v12, %v915_v20 }
 0x102   : > { %v940_v24 = vsel %vm939_vm11, %v937_v18, %v938_v21  ;;  %v918_v46 = vrot.slane %v917_v23, 2 }
 0x103   : > { %v941_v25 = vrot.slane %v940_v24, 2 }
 0x104   : > { %vm919_vm4 = vcmp.lt.s32.totalorder %v917_v23, %v918_v46 }
 0x105   : > { %vm942_vm5 = vcmp.lt.s32.totalorder %v940_v24, %v941_v25  ;;  %v920_v29 = vsel %vm919_vm4, %v917_v23, %v918_v46 }
 0x106   : > { %v943_v22 = vsel %vm942_vm5, %v940_v24, %v941_v25  ;;  %v921_v36 = vrot.slane %v920_v29, 1  ;;  %v450_v25 = vld [vmem:[%s5307_s25 + $0x8] sm:$0xff]  ;;  %s4813_s25 = smov [#allocation2]  }
 0x107   : > { %v944_v27 = vrot.slane %v943_v22, 1  ;;  %s4735_s26 = sshll.u32 %s4813_s25, 4  ;;  %s4736_s26 = int_to_ptr.vmem [resolvable:$false] %s4735_s26 }
 0x108   : > { %vm922_vm7 = vcmp.lt.s32.totalorder %v920_v29, %v921_v36  ;;  %s4737_s28 = scalar_lea.vmem %s4736_s26, 2048  ;;  %p4738_p1 = scmp.lt.s32.totalorder %s7204_s23, %s4736_s26 }
 0x109   : > { %vm945_vm8 = vcmp.lt.s32.totalorder %v943_v22, %v944_v27  ;;  %v923_v31 = vsel %vm922_vm7, %v920_v29, %v921_v36  ;;  %v1138_v36 = vsel %vm1133_vm6, %v450_v25, 0  ;;  %p4739_p2 = scmp.lt.s32.totalorder %s4737_s28, %s4731_s24 }
 0x10a   : > { %v946_v19 = vsel %vm945_vm8, %v943_v22, %v944_v27  ;;  %v5312_v3 = vand.u32 63, %v923_v31  ;;  %v949_v41 = vand.u32 4294967232, %v923_v31  ;;  %v5434_v38 = vand.u32 4294901760, %v1138_v36 }
 0x10b   : > { %v5314_v37 = vand.u32 63, %v946_v19  ;;  %v950_v44 = vand.u32 4294967232, %v946_v19  ;;  %v5410_v12 = vpop.eup %4715  ;;  %p4740_p3 = por %p4739_p2, %p4738_p1 }
 0x10c   : > { %vm7273_vm9 = vcmp.eq.s32.totalorder %v4940_v16, %v5312_v3  ;;  %vm7276_vm11 = vcmp.eq.s32.totalorder %v4985_v53, %v5312_v3  ;;  %vm7281_vm5 = vcmp.eq.s32.totalorder %v4982_v52, %v5312_v3  ;;  %vm7286_vm8 = vcmp.eq.s32.totalorder %v5030_v40, %v5312_v3  ;;  %v5416_v20 = vpop.eup %4717 }
 0x10d   : > { %vm7274_vm10 = vcmp.eq.s32.totalorder %v4940_v16, %v5314_v37  ;;  %vm7277_vm4 = vcmp.eq.s32.totalorder %v4985_v53, %v5314_v37  ;;  %v1009_v43 = vsel %vm7273_vm9, 2147483647, %v5174_v51  ;;  %vm7284_vm7 = vcmp.eq.s32.totalorder %v4982_v52, %v5314_v37  ;;  %p4741_p5 = pnand %p4740_p3, %p4734_p0 }
 0x10e   : > { %v1010_v42 = vsel %vm7274_vm10, 2147483647, %v5182_v32  ;;  %v1013_v2 = vsel %vm7276_vm11, 2147483647, %v5202_v60  ;;  %v1014_v4 = vsel %vm7277_vm4, 2147483647, %v5208_v1  ;;  %vm7282_vm9 = vcmp.eq.s32.totalorder %v4977_v49, %v5314_v37 }
 0x10f   : > { %vm7283_vm10 = vcmp.eq.s32.totalorder %v4974_v48, %v5314_v37  ;;  %vm966_vm12 = vcmp.eq.s32.totalorder %v5030_v40, %v5314_v37  ;;  %v1017_v51 = vsel %vm7281_vm5, 2147483647, %v5226_v9  ;;  %vm1025_vm11 = vcmp.lt.s32.totalorder %v1009_v43, %v1013_v2 }
 0x110   : > { %vm1048_vm4 = vcmp.lt.s32.totalorder %v1010_v42, %v1014_v4  ;;  %v1018_v32 = vsel %vm7284_vm7, 2147483647, %v5232_v10  ;;  %v1026_v60 = vsel %vm1025_vm11, %v1009_v43, %v1013_v2  ;;  %vm7285_vm13 = vcmp.eq.s32.totalorder %v5001_v15, %v5314_v37 }
 0x111   : > { %v1049_v1 = vsel %vm1048_vm4, %v1010_v42, %v1014_v4  ;;  %vm1029_vm14 = vcmp.lt.s32.totalorder %v1026_v60, %v1017_v51  ;;  %v1012_v47 = vsel %vm7282_vm9, 2147483647, %v5194_v59  ;;  %v1016_v9 = vsel %vm7283_vm10, 2147483647, %v5220_v57 }
 0x112   : > { %vm1052_vm15 = vcmp.lt.s32.totalorder %v1049_v1, %v1018_v32  ;;  %v969_v61 = vadd.f32 1e-08, %v949_v41  ;;  %v970_v63 = vadd.f32 1e-08, %v950_v44  ;;  %v1022_v10 = vsel %vm966_vm12, 2147483647, %v5257_v54 }
 0x113   : > { %v1053_v5 = vsel %vm1052_vm15, %v1049_v1, %v1018_v32  ;;  %vm968_vm4 = vcmp.eq.s32.totalorder %v4998_v11, %v5314_v37  ;;  %vm1050_vm5 = vcmp.lt.s32.totalorder %v1012_v47, %v1016_v9  ;;  %vm7287_vm9 = vcmp.eq.s32.totalorder %v4977_v49, %v5312_v3 }
 0x114   : > { %vm1056_vm11 = vcmp.lt.s32.totalorder %v1053_v5, %v1022_v10  ;;  %v1030_v59 = vsel %vm1029_vm14, %v1026_v60, %v1017_v51  ;;  %v1020_v57 = vsel %vm7285_vm13, 2147483647, %v5244_v34  ;;  %v1051_v6 = vsel %vm1050_vm5, %v1012_v47, %v1016_v9 }
 0x115   : > { %vm959_vm10 = vcmp.eq.s32.totalorder %v4974_v48, %v5312_v3  ;;  %v1021_v54 = vsel %vm7286_vm8, 2147483647, %v5249_v39  ;;  %vm1054_vm15 = vcmp.lt.s32.totalorder %v1051_v6, %v1020_v57  ;;  %vm963_vm7 = vcmp.eq.s32.totalorder %v5001_v15, %v5312_v3 }
 0x116   : > { %v1011_v7 = vsel %vm7287_vm9, 2147483647, %v5188_v56  ;;  %v1057_v55 = vsel %vm1056_vm11, %v1053_v5, %v1022_v10  ;;  %v1024_v34 = vsel %vm968_vm4, 2147483647, %v5269_v28  ;;  %v1055_v8 = vsel %vm1054_vm15, %v1051_v6, %v1020_v57 }
 0x117   : > { %v1015_v39 = vsel %vm959_vm10, 2147483647, %v5214_v62  ;;  %vm1033_vm14 = vcmp.lt.s32.totalorder %v1030_v59, %v1021_v54  ;;  %vm1058_vm5 = vcmp.lt.s32.totalorder %v1055_v8, %v1024_v34  ;;  %vm967_vm13 = vcmp.eq.s32.totalorder %v4998_v11, %v5312_v3 }
 0x118   : > { %vm1027_vm8 = vcmp.lt.s32.totalorder %v1011_v7, %v1015_v39  ;;  %v1059_v56 = vsel %vm1058_vm5, %v1055_v8, %v1024_v34  ;;  %v1019_v28 = vsel %vm963_vm7, 2147483647, %v5238_v0  ;;  %4719 = vrcp.f32 %v969_v61 }
 0x119   : > { %v1028_v18 = vsel %vm1027_vm8, %v1011_v7, %v1015_v39  ;;  %vm1060_vm11 = vcmp.lt.s32.totalorder %v1057_v55, %v1059_v56  ;;  %v5420_v62 = vsub.f32 %v5317_v14, %v5328_v17  ;;  %v1034_v21 = vsel %vm1033_vm14, %v1030_v59, %v1021_v54 }
 0x11a   : > { %vm1031_vm15 = vcmp.lt.s32.totalorder %v1028_v18, %v1019_v28  ;;  %v1061_v23 = vsel %vm1060_vm11, %v1057_v55, %v1059_v56  ;;  %v1023_v24 = vsel %vm967_vm13, 2147483647, %v5263_v58  ;;  %4721 = vrcp.f32 %v970_v63 }
 0x11b   : > { %v1032_v46 = vsel %vm1031_vm15, %v1028_v18, %v1019_v28  ;;  %v1062_v0 = vrot.slane %v1061_v23, 4  ;;  %v7288_v29 = vand.u32 4294901760, %v5420_v62  ;;  %v5438_v43 = vsub.f32 %v1138_v36, %v5434_v38 }
 0x11c   : > { %vm1035_vm8 = vcmp.lt.s32.totalorder %v1032_v46, %v1023_v24  ;;  %v883_v4 = vsel %vm861_vm2, %v5410_v12, 0.0  ;;  %v881_v51 = vsel %vm859_vm0, %v5410_v12, 0.0  ;;  %v884_v32 = vsel %vm862_vm3, %v5416_v20, 0.0 }
 0x11d   : > { %v1036_v26 = vsel %vm1035_vm8, %v1032_v46, %v1023_v24  ;;  %vm1063_vm5 = vcmp.lt.s32.totalorder %v1061_v23, %v1062_v0  ;;  %v5432_v58 = vsub.f32 %v5420_v62, %v7288_v29  ;;  %v882_v47 = vsel %vm860_vm1, %v5416_v20, 0.0 }
 0x11e   : > { %vm1037_vm9 = vcmp.lt.s32.totalorder %v1034_v21, %v1036_v26  ;;  %v1064_v22 = vsel %vm1063_vm5, %v1061_v23, %v1062_v0  ;;  %vm7315_vm2 = vcmp.eq.s32.totalorder %v5001_v15, %v5140_v50  ;;  %vm7316_vm0 = vcmp.eq.s32.totalorder %v5001_v15, %v5137_v45 }
 0x11f   : > { %v1038_v33 = vsel %vm1037_vm9, %v1034_v21, %v1036_v26  ;;  %v1065_v27 = vrot.slane %v1064_v22, 2  ;;  %v1225_v41 = vand.u32 4294901760, %v5432_v58  ;;  %v880_v61 = vsel %vm7315_vm2, %v5416_v20, 0.0 }
 0x120   : > { %v1039_v30 = vrot.slane %v1038_v33, 4  ;;  %v879_v63 = vsel %vm7316_vm0, %v5410_v12, 0.0  ;;  %vm7317_vm3 = vcmp.eq.s32.totalorder %v4982_v52, %v5140_v50  ;;  %vm7318_vm1 = vcmp.eq.s32.totalorder %v4982_v52, %v5137_v45 }
 0x121   : > { %vm1066_vm14 = vcmp.lt.s32.totalorder %v1064_v22, %v1065_v27  ;;  %v878_v10 = vsel %vm7317_vm3, %v5416_v20, 0.0  ;;  %v877_v5 = vsel %vm7318_vm1, %v5410_v12, 0.0  ;;  %vm7319_vm5 = vcmp.eq.s32.totalorder %v4974_v48, %v5140_v50 }
 0x122   : > { %vm1040_vm11 = vcmp.lt.s32.totalorder %v1038_v33, %v1039_v30  ;;  %v1067_v31 = vsel %vm1066_vm14, %v1064_v22, %v1065_v27  ;;  %v876_v57 = vsel %vm7319_vm5, %v5416_v20, 0.0  ;;  %vm7320_vm14 = vcmp.eq.s32.totalorder %v4974_v48, %v5137_v45 }
 0x123   : > { %v1041_v19 = vsel %vm1040_vm11, %v1038_v33, %v1039_v30  ;;  %v1068_v35 = vrot.slane %v1067_v31, 1  ;;  %v875_v6 = vsel %vm7320_vm14, %v5410_v12, 0.0  ;;  %vm7321_vm11 = vcmp.eq.s32.totalorder %v4985_v53, %v5140_v50 }
 0x124   : > { %v1042_v14 = vrot.slane %v1041_v19, 2  ;;  %v874_v55 = vsel %vm7321_vm11, %v5416_v20, 0.0  ;;  %vm7326_vm2 = vcmp.eq.s32.totalorder %v4940_v16, %v5137_v45  ;;  %vm7328_vm0 = vcmp.eq.s32.totalorder %v5001_v15, %v5314_v37 }
 0x125   : > { %vm1069_vm15 = vcmp.lt.s32.totalorder %v1067_v31, %v1068_v35  ;;  %v4720_v42 = vpop.eup %4719  ;;  %v869_v23 = vsel %vm7326_vm2, %v5410_v12, 0.0  ;;  %vm7329_vm3 = vcmp.eq.s32.totalorder %v4982_v52, %v5314_v37  ;;  %vm7330_vm1 = vcmp.eq.s32.totalorder %v4982_v52, %v5312_v3 }
 0x126   : > { %vm1043_vm8 = vcmp.lt.s32.totalorder %v1041_v19, %v1042_v14  ;;  %v1070_v2 = vsel %vm1069_vm15, %v1067_v31, %v1068_v35  ;;  %v989_v54 = vsel %vm967_vm13, %v4720_v42, 0.0  ;;  %vm7322_vm15 = vcmp.eq.s32.totalorder %v4985_v53, %v5137_v45 }
 0x127   : > { %v1044_v44 = vsel %vm1043_vm8, %v1041_v19, %v1042_v14  ;;  %v1074_v60 = vand.u32 4294967232, %v1070_v2  ;;  %v4722_v9 = vpop.eup %4721  ;;  %v873_v34 = vsel %vm7322_vm15, %v5410_v12, 0.0  ;;  %vm7323_vm13 = vcmp.eq.s32.totalorder %v4977_v49, %v5140_v50 }
 0x128   : > { %v1045_v1 = vrot.slane %v1044_v44, 1  ;;  %v990_v8 = vsel %vm968_vm4, %v4722_v9, 0.0  ;;  %v988_v56 = vsel %vm966_vm12, %v4722_v9, 0.0  ;;  %v872_v28 = vsel %vm7323_vm13, %v5416_v20, 0.0 }
 0x129   : > { %v1094_v59 = vadd.f32 1e-08, %v1074_v60  ;;  %vm7324_vm8 = vcmp.eq.s32.totalorder %v4977_v49, %v5137_v45  ;;  %vm7325_vm4 = vcmp.eq.s32.totalorder %v4940_v16, %v5140_v50  ;;  %v5513_v24 = vadd.f32 %v989_v54, %v883_v4 }
 0x12a   : > { %vm1046_vm9 = vcmp.lt.s32.totalorder %v1044_v44, %v1045_v1  ;;  %v871_v18 = vsel %vm7324_vm8, %v5410_v12, 0.0  ;;  %v870_v21 = vsel %vm7325_vm4, %v5416_v20, 0.0  ;;  %vm7327_vm12 = vcmp.eq.s32.totalorder %v5030_v40, %v5312_v3 }
 0x12b   : > { %v1047_v7 = vsel %vm1046_vm9, %v1044_v44, %v1045_v1  ;;  %4723 = vrcp.f32 %v1094_v59  ;;  %v987_v0 = vsel %vm7327_vm12, %v4720_v42, 0.0  ;;  %v985_v25 = vsel %vm963_vm7, %v4720_v42, 0.0 }
 0x12c   : > { %v1073_v39 = vand.u32 4294967232, %v1047_v7  ;;  %v1006_v26 = vadd.f32 %v990_v8, %v884_v32  ;;  %v1004_v22 = vadd.f32 %v988_v56, %v882_v47  ;;  %v986_v50 = vsel %vm7328_vm0, %v4722_v9, 0.0 }
 0x12d   : > { %v984_v45 = vsel %vm7329_vm3, %v4722_v9, 0.0  ;;  %v983_v33 = vsel %vm7330_vm1, %v4720_v42, 0.0  ;;  %vm7331_vm9 = vcmp.eq.s32.totalorder %v4974_v48, %v5314_v37  ;;  %v981_v27 = vsel %vm959_vm10, %v4720_v42, 0.0 }
 0x12e   : > { %v1093_v46 = vadd.f32 1e-08, %v1073_v39  ;;  %v982_v36 = vsel %vm7331_vm9, %v4722_v9, 0.0  ;;  %v1003_v30 = vadd.f32 %v987_v0, %v881_v51  ;;  %vm7332_vm7 = vcmp.eq.s32.totalorder %v4985_v53, %v5314_v37 }
 0x12f   : > { %v980_v31 = vsel %vm7332_vm7, %v4722_v9, 0.0  ;;  %vm7333_vm5 = vcmp.eq.s32.totalorder %v4985_v53, %v5312_v3  ;;  %vm7334_vm14 = vcmp.eq.s32.totalorder %v4977_v49, %v5314_v37  ;;  %v1072_v14 = vand.u32 63, %v1070_v2 }
 0x130   : > { %4725 = vrcp.f32 %v1093_v46  ;;  %v979_v19 = vsel %vm7333_vm5, %v4720_v42, 0.0  ;;  %v978_v35 = vsel %vm7334_vm14, %v4722_v9, 0.0  ;;  %v1002_v4 = vadd.f32 %v986_v50, %v880_v61 }
 0x131   : > { %v1001_v44 = vadd.f32 %v985_v25, %v879_v63  ;;  %vm7335_vm11 = vcmp.eq.s32.totalorder %v4977_v49, %v5312_v3  ;;  %v1000_v51 = vadd.f32 %v984_v45, %v878_v10  ;;  %v999_v60 = vadd.f32 %v983_v33, %v877_v5 }
 0x132   : > { %v977_v32 = vsel %vm7335_vm11, %v4720_v42, 0.0  ;;  %v998_v1 = vadd.f32 %v982_v36, %v876_v57  ;;  %v5548_v47 = vadd.f32 %v981_v27, %v875_v6  ;;  %v5550_v59 = vand.u32 63, %v1047_v7 }
 0x133   : > { %v996_v54 = vadd.f32 %v980_v31, %v874_v55  ;;  %v5552_v8 = vadd.f32 %v979_v19, %v873_v34  ;;  %v5554_v39 = vadd.f32 %v978_v35, %v872_v28  ;;  %v5556_v56 = vadd.f32 %v977_v32, %v871_v18 }
 0x134   : > { %vm7336_vm10 = vcmp.eq.s32.totalorder %v4940_v16, %v5314_v37  ;;  %vm7337_vm15 = vcmp.eq.s32.totalorder %v4940_v16, %v5312_v3  ;;  %v5565_v63 = vadd.f32 %v4720_v42, %v5410_v12  ;;  %vm1092_vm13 = vcmp.eq.s32.totalorder %v4998_v11, %v1072_v14 }
 0x135   : > { %v976_v2 = vsel %vm7336_vm10, %v4722_v9, 0.0  ;;  %v975_v61 = vsel %vm7337_vm15, %v4720_v42, 0.0  ;;  %vm1090_vm8 = vcmp.eq.s32.totalorder %v5030_v40, %v1072_v14  ;;  %vm1088_vm4 = vcmp.eq.s32.totalorder %v5001_v15, %v1072_v14 }
 0x136   : > { %vm1086_vm2 = vcmp.eq.s32.totalorder %v4982_v52, %v1072_v14  ;;  %vm1084_vm12 = vcmp.eq.s32.totalorder %v4974_v48, %v1072_v14  ;;  %vm1082_vm0 = vcmp.eq.s32.totalorder %v4985_v53, %v1072_v14  ;;  %vm1080_vm3 = vcmp.eq.s32.totalorder %v4977_v49, %v1072_v14 }
 0x137   : > { %v5575_v3 = vadd.f32 %v4722_v9, %v5416_v20  ;;  %vm1091_vm1 = vcmp.eq.s32.totalorder %v4998_v11, %v5550_v59  ;;  %v5579_v37 = vadd.f32 %v976_v2, %v870_v21  ;;  %vm1078_vm9 = vcmp.eq.s32.totalorder %v4940_v16, %v1072_v14 }
 0x138   : > { %v5582_v12 = vadd.f32 %v975_v61, %v869_v23  ;;  %v5584_v42 = vpop.eup %4723  ;;  %vm1089_vm7 = vcmp.eq.s32.totalorder %v5030_v40, %v5550_v59  ;;  %vm1087_vm5 = vcmp.eq.s32.totalorder %v5001_v15, %v5550_v59  ;;  %vm1085_vm14 = vcmp.eq.s32.totalorder %v4982_v52, %v5550_v59 }
 0x139   : > { %vm1083_vm11 = vcmp.eq.s32.totalorder %v4974_v48, %v5550_v59  ;;  %v1114_v20 = vsel %vm1092_vm13, %v5584_v42, 0.0  ;;  %v1112_v9 = vsel %vm1090_vm8, %v5584_v42, 0.0  ;;  %v1110_v10 = vsel %vm1088_vm4, %v5584_v42, 0.0 }
 0x13a   : > { %v1108_v5 = vsel %vm1086_vm2, %v5584_v42, 0.0  ;;  %vm1081_vm10 = vcmp.eq.s32.totalorder %v4985_v53, %v5550_v59  ;;  %v1130_v57 = vadd.f32 %v1114_v20, %v1006_v26  ;;  %v1128_v6 = vadd.f32 %v1112_v9, %v1004_v22 }
 0x13b   : > { %v1126_v7 = vadd.f32 %v1110_v10, %v1002_v4  ;;  %v5608_v55 = vadd.f32 %v1108_v5, %v1000_v51  ;;  %v1106_v34 = vsel %vm1084_vm12, %v5584_v42, 0.0  ;;  %v1104_v28 = vsel %vm1082_vm0, %v5584_v42, 0.0 }
 0x13c   : > { %v1102_v18 = vsel %vm1080_vm3, %v5584_v42, 0.0  ;;  %v1100_v21 = vsel %vm1078_vm9, %v5584_v42, 0.0  ;;  %v5624_v46 = vand.u32 4294901760, %v1130_v57  ;;  %v5626_v0 = vand.u32 4294901760, %v1128_v6 }
 0x13d   : > { %v5622_v23 = vpop.eup %4725  ;;  %v5628_v25 = vand.u32 4294901760, %v1126_v7  ;;  %v5631_v26 = vand.u32 4294901760, %v5608_v55  ;;  %vm1079_vm15 = vcmp.eq.s32.totalorder %v4977_v49, %v5550_v59  ;;  %vm1077_vm13 = vcmp.eq.s32.totalorder %v4940_v16, %v5550_v59 }
 0x13e   : > { %v1113_v22 = vsel %vm1091_vm1, %v5622_v23, 0.0  ;;  %v1111_v50 = vsel %vm1089_vm7, %v5622_v23, 0.0  ;;  %v1109_v45 = vsel %vm1087_vm5, %v5622_v23, 0.0  ;;  %v1107_v33 = vsel %vm1085_vm14, %v5622_v23, 0.0  ;;  %1157 = vmatprep.subr.mxu0 %v5624_v46 }
 0x13f   : > { %v1129_v11 = vadd.f32 %v1113_v22, %v5513_v24  ;;  %v1127_v36 = vadd.f32 %v1111_v50, %v1003_v30  ;;  %v1125_v27 = vadd.f32 %v1109_v45, %v1001_v44  ;;  %v1123_v31 = vadd.f32 %v1107_v33, %v999_v60 }
 0x140   : > { %v1122_v40 = vadd.f32 %v1106_v34, %v998_v1  ;;  %v5656_v19 = vsub.f32 %v1130_v57, %v5624_v46  ;;  %v1105_v52 = vsel %vm1083_vm11, %v5622_v23, 0.0  ;;  %v1120_v15 = vadd.f32 %v1104_v28, %v996_v54 }
 0x141   : > { %v5662_v35 = vand.u32 4294901760, %v1129_v11  ;;  %v5664_v14 = vand.u32 4294901760, %v1127_v36  ;;  %v5666_v24 = vand.u32 4294901760, %v1125_v27  ;;  %v5668_v30 = vand.u32 4294901760, %v1123_v31 }
 0x142   : > { %v5670_v4 = vand.u32 4294901760, %v1122_v40  ;;  %v1261_v44 = vand.u32 4294901760, %v5656_v19  ;;  %v1121_v32 = vadd.f32 %v1105_v52, %v5548_v47  ;;  %v5674_v51 = vand.u32 4294901760, %v1120_v15 }
 0x143   : > { %1159 = vmatpush1.msra.mxu0 %v5662_v35  ;;  %v5678_v48 = vsub.f32 %v1129_v11, %v5662_v35  ;;  %v5681_v60 = vsub.f32 %v1128_v6, %v5626_v0  ;;  %v1103_v1 = vsel %vm1081_vm10, %v5622_v23, 0.0  ;;  %v5688_v54 = vsub.f32 %v1127_v36, %v5664_v14 }
 0x144   : > { %1161 = vmatprep.subr.mxu0 %v5626_v0  ;;  %v1262_v47 = vsub.f32 %v5656_v19, %v1261_v44  ;;  %v5694_v2 = vand.u32 4294901760, %v1121_v32  ;;  %v1119_v61 = vadd.f32 %v1103_v1, %v5552_v8  ;;  %v1118_v20 = vadd.f32 %v1102_v18, %v5554_v39 }
 0x145   : > { %1163 = vmatpush1.msra.mxu0 %v5664_v14  ;;  %v1267_v53 = vand.u32 4294901760, %v5678_v48  ;;  %v1273_v9 = vand.u32 4294901760, %v5681_v60  ;;  %v1279_v10 = vand.u32 4294901760, %v5688_v54  ;;  %v5703_v5 = vsub.f32 %v1126_v7, %v5628_v25 }
 0x146   : > { %1165 = vmatprep.subr.mxu0 %v5628_v25  ;;  %v1263_v57 = vand.u32 4294901760, %v1262_v47  ;;  %v5706_v6 = vand.u32 4294901760, %v1119_v61  ;;  %v5708_v34 = vand.u32 4294901760, %v1118_v20  ;;  %v1101_v8 = vsel %vm1079_vm15, %v5622_v23, 0.0 }
 0x147   : > { %1167 = vmatpush1.msra.mxu0 %v5666_v24  ;;  %v1268_v39 = vsub.f32 %v5678_v48, %v1267_v53  ;;  %v1274_v7 = vsub.f32 %v5681_v60, %v1273_v9  ;;  %v1280_v28 = vsub.f32 %v5688_v54, %v1279_v10  ;;  %v1285_v18 = vand.u32 4294901760, %v5703_v5 }
 0x148   : > { %1169 = vmatprep.subr.mxu0 %v5631_v26  ;;  %1264 = vmatprep.subr.mxu1 %v1263_v57  ;;  %v1117_v49 = vadd.f32 %v1101_v8, %v5556_v56  ;;  %v5728_v22 = vsub.f32 %v1125_v27, %v5666_v24  ;;  %v1116_v50 = vadd.f32 %v1100_v21, %v5579_v37  ;;  %v1099_v45 = vsel %vm1077_vm13, %v5622_v23, 0.0 }
 0x149   : > { %1171 = vmatpush1.msra.mxu0 %v5668_v30  ;;  %v1269_v33 = vand.u32 4294901760, %v1268_v39  ;;  %v1275_v11 = vand.u32 4294901760, %v1274_v7  ;;  %v1281_v36 = vand.u32 4294901760, %v1280_v28  ;;  %v1286_v52 = vsub.f32 %v5703_v5, %v1285_v18 }
 0x14a   : > { %1173 = vmatprep.subr.mxu0 %v5670_v4  ;;  %v5740_v56 = vand.u32 4294901760, %v1117_v49  ;;  %v1291_v37 = vand.u32 4294901760, %v5728_v22  ;;  %v5743_v21 = vand.u32 4294901760, %v1116_v50  ;;  %v5747_v16 = vsub.f32 %v5608_v55, %v5631_v26 }
 0x14b   : > { %1175 = vmatpush1.msra.mxu0 %v5694_v2  ;;  %1270 = vmatpush1.msra.mxu1 %v1269_v33  ;;  %v1287_v59 = vand.u32 4294901760, %v1286_v52  ;;  %v1115_v27 = vadd.f32 %v1099_v45, %v5582_v12  ;;  %v5752_v1 = vsub.f32 %v1123_v31, %v5668_v30  ;;  %v5755_v47 = vsub.f32 %v1122_v40, %v5670_v4 }
 0x14c   : > { %1177 = vmatprep.subr.mxu0 %v5674_v51  ;;  %1276 = vmatprep.subr.mxu1 %v1275_v11  ;;  %v1292_v55 = vsub.f32 %v5728_v22, %v1291_v37  ;;  %v1297_v57 = vand.u32 4294901760, %v5747_v16  ;;  %v5763_v8 = vsub.f32 %v1121_v32, %v5694_v2  ;;  %v5766_v12 = vsub.f32 %v1120_v15, %v5674_v51 }
 0x14d   : > { %1179 = vmatpush1.msra.mxu0 %v5706_v6  ;;  %1282 = vmatpush1.msra.mxu1 %v1281_v36  ;;  %v5769_v31 = vand.u32 4294901760, %v1115_v27  ;;  %v1303_v40 = vand.u32 4294901760, %v5752_v1  ;;  %v7289_v39 = vand.u32 4294901760, %v5755_v47  ;;  %v5774_v7 = vsub.f32 %v1119_v61, %v5706_v6 }
 0x14e   : > { %1181 = vmatprep.subr.mxu0 %v5708_v34  ;;  %1288 = vmatprep.subr.mxu1 %v1287_v59  ;;  %v1293_v32 = vand.u32 4294901760, %v1292_v55  ;;  %v1298_v15 = vsub.f32 %v5747_v16, %v1297_v57  ;;  %v7290_v28 = vand.u32 4294901760, %v5763_v8  ;;  %v7291_v45 = vand.u32 4294901760, %v5766_v12 }
 0x14f   : > { %1183 = vmatpush1.msra.mxu0 %v5740_v56  ;;  %v1304_v33 = vsub.f32 %v5752_v1, %v1303_v40  ;;  %v1310_v61 = vsub.f32 %v5755_v47, %v7289_v39  ;;  %v7292_v11 = vand.u32 4294901760, %v5774_v7  ;;  %v5791_v36 = vsub.f32 %v1118_v20, %v5708_v34 }
 0x150   : > { %1294 = vmatpush1.msra.mxu1 %v1293_v32  ;;  %1185 = vmatprep.subr.mxu0 %v5743_v21  ;;  %v1299_v52 = vand.u32 4294901760, %v1298_v15  ;;  %v1316_v59 = vsub.f32 %v5763_v8, %v7290_v28  ;;  %v1322_v55 = vsub.f32 %v5766_v12, %v7291_v45  ;;  %v5801_v29 = vsub.f32 %v1117_v49, %v5740_v56 }
 0x151   : > { %1187 = vmatpush1.msra.mxu0 %v5769_v31  ;;  %v1305_v39 = vand.u32 4294901760, %v1304_v33  ;;  %v1328_v20 = vsub.f32 %v5774_v7, %v7292_v11  ;;  %v1333_v32 = vand.u32 4294901760, %v5791_v36  ;;  %v1311_v15 = vand.u32 4294901760, %v1310_v61 }
 0x152   : > { %1300 = vmatprep.subr.mxu1 %v1299_v52  ;;  %1420 = vmatprep.subr.mxu0 %v5656_v19  ;;  %v1339_v28 = vand.u32 4294901760, %v5801_v29  ;;  %v5811_v45 = vsub.f32 %v1116_v50, %v5743_v21  ;;  %v1317_v49 = vand.u32 4294901760, %v1316_v59  ;;  %v5819_v11 = vsub.f32 %v1115_v27, %v5769_v31 }
 0x153   : > { %1306 = vmatpush1.msra.mxu1 %v1305_v39  ;;  %1226 = vmatmul.mubr.f32.vlgmr.msra.gmra.mxu0 %v1225_v41  ;;  %v1334_v33 = vsub.f32 %v5791_v36, %v1333_v32  ;;  %v1323_v61 = vand.u32 4294901760, %v1322_v55  ;;  %v1234_v58 = vand.u32 4294901760, %v5438_v43  ;;  %v1329_v41 = vand.u32 4294901760, %v1328_v20 }
 0x154   : > { %1312 = vmatprep.subr.mxu1 %v1311_v15  ;;  %1423 = vmatpush1.msra.mxu0 %v5678_v48  ;;  %v1340_v50 = vsub.f32 %v5801_v29, %v1339_v28  ;;  %v1345_v39 = vand.u32 4294901760, %v5811_v45  ;;  %v1351_v52 = vand.u32 4294901760, %v5819_v11  ;;  %v5835_v55 = vadd.f32 %v5622_v23, %v5565_v63  ;;  %v1851_v48 = vld [vmem:[%s7260_s5 + $0x8] sm:$0xff] }
 0x155   : > { %1318 = vmatpush1.msra.mxu1 %v1317_v49  ;;  %1426 = vmatprep.subr.mxu0 %v5681_v60  ;;  %v1335_v27 = vand.u32 4294901760, %v1334_v33  ;;  %v5843_v49 = vadd.f32 %v5584_v42, %v5575_v3  ;;  %v1235_v63 = vsub.f32 %v5438_v43, %v1234_v58  ;;  %v1850_v42 = vld [vmem:[%s7260_s5] sm:$0xff]  ;;  %vm1866_vm8 = vcmask 64512  }
 0x156   : > { %1324 = vmatprep.subr.mxu1 %v1323_v61  ;;  %1429 = vmatpush1.msra.mxu0 %v5688_v54  ;;  %v1346_v59 = vsub.f32 %v5811_v45, %v1345_v39  ;;  %v1341_v15 = vand.u32 4294901760, %v1340_v50  ;;  %v1352_v20 = vsub.f32 %v5819_v11, %v1351_v52  ;;  %v1868_v19 = vsel %vm1866_vm8, %v1850_v42, 0  ;;  %v447_v60 = vld [vmem:[%s430_s15] sm:$0xff] }
 0x157   : > { %1330 = vmatpush1.msra.mxu1 %v1329_v41  ;;  %1432 = vmatprep.subr.mxu0 %v5703_v5  ;;  %v1236_v3 = vand.u32 4294901760, %v1235_v63  ;;  %v5905_v54 = vand.u32 4294901760, %v1868_v19  ;;  %v5919_v5 = vand.u32 4294901760, %v447_v60  ;;  %4727 = vrcp.f32 %v5835_v55  ;;  %v1843_v55 = vld [vmem:[%s7259_s4 + $0x8] sm:$0xff] }
 0x158   : > { %1336 = vmatprep.subr.mxu1 %v1335_v27  ;;  %1435 = vmatpush1.msra.mxu0 %v5728_v22  ;;  %v1347_v33 = vand.u32 4294901760, %v1346_v59  ;;  %v1353_v23 = vand.u32 4294901760, %v1352_v20  ;;  %v7339_v22 = vand.u32 4294901760, %v5755_v47  ;;  %vm2699_vm4 = vcmask 130048  }
 0x159   : > { %1342 = vmatpush1.msra.mxu1 %v1341_v15  ;;  %1438 = vmatprep.subr.mxu0 %v5747_v16  ;;  %v7340_v16 = vand.u32 4294901760, %v5763_v8  ;;  %4729 = vrcp.f32 %v5843_v49  ;;  %v1861_v49 = vld [vmem:[%s7261_s6 + $0x18] sm:$0xff] }
 0x15a   : > { %1348 = vmatprep.subr.mxu1 %v1347_v33  ;;  %1441 = vmatpush1.msra.mxu0 %v5752_v1  ;;  %v7341_v1 = vand.u32 4294901760, %v5766_v12 }
 0x15b   : > { %1354 = vmatpush1.msra.mxu1 %v1353_v23  ;;  %1444 = vmatprep.subr.mxu0 %v5755_v47 }
 0x15c   : > { %1389 = vmatmul.mubr.f32.vlgmr.msra.gmra.mxu1 %v5328_v17  ;;  %1532 = vmatprep.subr.mxu1 %v5624_v46 }
 0x15d   : > { %1447 = vmatpush1.msra.mxu0 %v5763_v8  ;;  %1534 = vmatpush1.msra.mxu1 %v5662_v35  ;;  %v5946_v8 = vsub.f32 %v447_v60, %v5919_v5 }
 0x15e   : > { %1450 = vmatprep.subr.mxu0 %v5766_v12  ;;  %1536 = vmatprep.subr.mxu1 %v5626_v0 }
 0x15f   : > { %1231 = vmatprep.mubr.f32.mxu0 %v7297_v13  ;;  %1453 = vmatpush1.msra.mxu0 %v5774_v7 }
 0x160   : > { %1538 = vmatpush1.msra.mxu1 %v5664_v14  ;;  %1237 = vmatmul.mubr.f32.gmra.mxu0 %v1236_v3 }
 0x161   : > { %1456 = vmatprep.subr.mxu0 %v5791_v36  ;;  %1540 = vmatprep.subr.mxu1 %v5628_v25 }
 0x162   : > { %1459 = vmatpush1.msra.mxu0 %v5801_v29  ;;  %1542 = vmatpush1.msra.mxu1 %v5666_v24 }
 0x163   : > { %1462 = vmatprep.subr.mxu0 %v5811_v45  ;;  %1544 = vmatprep.subr.mxu1 %v5631_v26 }
 0x164   : > { %1465 = vmatpush1.msra.mxu0 %v5819_v11  ;;  %1498 = vmatprep.mubr.f32.mxu0 %v7297_v13 }
 0x165   : > { %1546 = vmatpush1.msra.mxu1 %v5668_v30  ;;  %1394 = vmatprep.mubr.f32.mxu1 %v7297_v13 }
 0x166   : > { %1501 = vmatmul.mubr.f32.vlgmr.msra.gmra.mxu0 %v5420_v62  ;;  %1548 = vmatprep.subr.mxu1 %v5670_v4 }
 0x167   : > { %1633 = vmatprep.subr.mxu0 %v1261_v44  ;;  %1396 = vmatmul.mubr.f32.gmra.mxu1 %v5434_v38  ;;  %v448_v44 = vld [vmem:[%s430_s15 + $0x8] sm:$0xff]  ;;  %s4640_s15 = sshll.u32 %s4799_s12, 10  ;;  %s7210_s12 = scalar_lea.sflag [#allocation3], %s404_s27 }
 0x168   : > { %1550 = vmatpush1.msra.mxu1 %v5694_v2  ;;  %1637 = vmatpush1.msra.mxu0 %v1267_v53  ;;  %v5912_v53 = vand.u32 4294901760, %v448_v44  ;;  %s7202_s20 = scalar_lea.hbm %s7264_s9, %s4640_s15 }
 0x169   : > { %1552 = vmatprep.subr.mxu1 %v5674_v51  ;;  %1641 = vmatprep.subr.mxu0 %v1273_v9  ;;  %v1871_v9 = vsel %vm1866_vm8, %v1851_v48, 0 }
 0x16a   : > { %1506 = vmatprep.mubr.f32.mxu0 %v7297_v13  ;;  %1554 = vmatpush1.msra.mxu1 %v5706_v6  ;;  %v5939_v47 = vsub.f32 %v448_v44, %v5912_v53 }
 0x16b   : > { %1645 = vmatpush1.msra.mxu0 %v1279_v10  ;;  %1556 = vmatprep.subr.mxu1 %v5708_v34  ;;  %v7338_v10 = vand.u32 4294901760, %v5420_v62  ;;  %v5933_v62 = vand.u32 4294901760, %v1871_v9 }
 0x16c   : > { %1509 = vmatmul.mubr.f32.gmra.mxu0 %v5438_v43  ;;  %1649 = vmatprep.subr.mxu0 %v1285_v18  ;;  %v1852_v18 = vld [vmem:[%s7260_s5 + $0x10] sm:$0xff]  ;;  %v1854_v43 = vld [vmem:[%s7260_s5 + $0x20] sm:$0xff] }
 0x16d   : > { %1558 = vmatpush1.msra.mxu1 %v5740_v56  ;;  %1653 = vmatpush1.msra.mxu0 %v1291_v37  ;;  %v5928_v37 = vsub.f32 %v1868_v19, %v5905_v54  ;;  %v5959_v12 = vsub.f32 %v1871_v9, %v5933_v62  ;;  %v1880_v45 = vsel %vm1866_vm8, %v1854_v43, 0  ;;  %v1842_v43 = vld [vmem:[%s7259_s4] sm:$0xff] }
 0x16e   : > { %1560 = vmatprep.subr.mxu1 %v5743_v21  ;;  %1657 = vmatprep.subr.mxu0 %v1297_v57  ;;  %v7342_v57 = vand.u32 4294901760, %v5774_v7 }
 0x16f   : > { %1562 = vmatpush1.msra.mxu1 %v5769_v31  ;;  %1595 = vmatprep.mubr.f32.mxu1 %v7297_v13 }
 0x170   : > { %1661 = vmatpush1.msra.mxu0 %v1303_v40  ;;  %1599 = vmatmul.mubr.f32.vlgmr.msra.gmra.mxu1 %v7338_v10 }
 0x171   : > { %1665 = vmatprep.subr.mxu0 %v7339_v22  ;;  %1758 = vmatprep.subr.mxu1 %v5624_v46  ;;  %v1874_v46 = vsel %vm1866_vm8, %v1852_v18, 0 }
 0x172   : > { %1669 = vmatpush1.msra.mxu0 %v7340_v16  ;;  %1760 = vmatpush1.msra.mxu1 %v5662_v35  ;;  %v1853_v35 = vld [vmem:[%s7260_s5 + $0x18] sm:$0xff]  ;;  %v5961_v40 = vand.u32 4294901760, %v1874_v46 }
 0x173   : > { %1673 = vmatprep.subr.mxu0 %v7341_v1  ;;  %1762 = vmatprep.subr.mxu1 %v5626_v0  ;;  %v1960_v0 = vand.u32 4294901760, %v5928_v37  ;;  %v1877_v7 = vsel %vm1866_vm8, %v1853_v35, 0 }
 0x174   : > { %1604 = vmatprep.mubr.f32.mxu1 %v7297_v13  ;;  %1677 = vmatpush1.msra.mxu0 %v7342_v57 }
 0x175   : > { %1764 = vmatpush1.msra.mxu1 %v5664_v14  ;;  %1681 = vmatprep.subr.mxu0 %v1333_v32  ;;  %v2078_v14 = vand.u32 4294901760, %v5939_v47  ;;  %v1961_v29 = vsub.f32 %v5928_v37, %v1960_v0  ;;  %v6005_v32 = vand.u32 4294901760, %v1880_v45 }
 0x176   : > { %1608 = vmatmul.mubr.f32.gmra.mxu1 %v1234_v58  ;;  %1766 = vmatprep.subr.mxu1 %v5628_v25  ;;  %v2084_v25 = vand.u32 4294901760, %v5946_v8 }
 0x177   : > { %1685 = vmatpush1.msra.mxu0 %v1339_v28  ;;  %1768 = vmatpush1.msra.mxu1 %v5666_v24  ;;  %v1971_v24 = vand.u32 4294901760, %v5959_v12  ;;  %v5985_v28 = vsub.f32 %v1874_v46, %v5961_v40  ;;  %v2079_v11 = vsub.f32 %v5939_v47, %v2078_v14  ;;  %v6035_v59 = vsub.f32 %v1880_v45, %v6005_v32 }
 0x178   : > { %1689 = vmatprep.subr.mxu0 %v1345_v39  ;;  %1770 = vmatprep.subr.mxu1 %v5631_v26  ;;  %v5987_v26 = vand.u32 4294901760, %v1877_v7  ;;  %v2085_v36 = vsub.f32 %v5946_v8, %v2084_v25  ;;  %v1856_v39 = vld [vmem:[%s7260_s5 + $0x30] sm:$0xff] }
 0x179   : > { %1693 = vmatpush1.msra.mxu0 %v1351_v52  ;;  %1726 = vmatprep.mubr.f32.mxu0 %v7297_v13  ;;  %v1982_v61 = vand.u32 4294901760, %v5985_v28  ;;  %v1886_v52 = vsel %vm1866_vm8, %v1856_v39, 0 }
 0x17a   : > { %1772 = vmatpush1.msra.mxu1 %v5668_v30  ;;  %1728 = vmatmul.mubr.f32.vlgmr.msra.gmra.mxu0 %v5328_v17  ;;  %v1855_v30 = vld [vmem:[%s7260_s5 + $0x28] sm:$0xff]  ;;  %v6014_v50 = vsub.f32 %v1877_v7, %v5987_v26  ;;  %v2086_v58 = vand.u32 4294901760, %v2085_v36 }
 0x17b   : > { %1774 = vmatprep.subr.mxu1 %v5670_v4  ;;  %1733 = vmatprep.mubr.f32.mxu0 %v7297_v13  ;;  %v1962_v4 = vand.u32 4294901760, %v1961_v29  ;;  %v1983_v27 = vsub.f32 %v5985_v28, %v1982_v61 }
 0x17c   : > { %1776 = vmatpush1.msra.mxu1 %v5694_v2  ;;  %1821 = vmatprep.mubr.f32.mxu1 %v7297_v13  ;;  %v1972_v2 = vsub.f32 %v5959_v12, %v1971_v24 }
 0x17d   : > { %1778 = vmatprep.subr.mxu1 %v5674_v51  ;;  %1922 = vmatprep.subr.mxu0 %v5912_v53  ;;  %v1883_v51 = vsel %vm1866_vm8, %v1855_v30, 0  ;;  %v1984_v20 = vand.u32 4294901760, %v1983_v27 }
 0x17e   : > { %1780 = vmatpush1.msra.mxu1 %v5706_v6  ;;  %1735 = vmatmul.mubr.f32.gmra.mxu0 %v5434_v38  ;;  %v2080_v6 = vand.u32 4294901760, %v2079_v11  ;;  %v6025_v41 = vand.u32 4294901760, %v1883_v51  ;;  %v2701_v11 = vsel %vm2699_vm4, %v1842_v43, 0 }
 0x17f   : > { %1782 = vmatprep.subr.mxu1 %v5708_v34  ;;  %1924 = vmatpush1.msra.mxu0 %v5919_v5  ;;  %v1973_v34 = vand.u32 4294901760, %v1972_v2 }
 0x180   : > { %1784 = vmatpush1.msra.mxu1 %v5740_v56  ;;  %1957 = vmatprep.mubr.f32.mxu0 %v7297_v13  ;;  %v1993_v56 = vand.u32 4294901760, %v6014_v50  ;;  %v6052_v63 = vsub.f32 %v1883_v51, %v6025_v41  ;;  %v1862_v51 = vld [vmem:[%s7261_s6 + $0x20] sm:$0xff] }
 0x181   : > { %1786 = vmatprep.subr.mxu1 %v5743_v21  ;;  %2209 = vmatprep.subr.mxu0 %v5939_v47  ;;  %v1857_v21 = vld [vmem:[%s7260_s5 + $0x38] sm:$0xff] }
 0x182   : > { %1788 = vmatpush1.msra.mxu1 %v5769_v31  ;;  %1963 = vmatmul.mubr.f32.vlgmr.msra.gmra.mxu0 %v1962_v4  ;;  %v6043_v31 = vand.u32 4294901760, %v1886_v52  ;;  %v1889_v15 = vsel %vm1866_vm8, %v1857_v21, 0  ;;  %v1994_v33 = vsub.f32 %v6014_v50, %v1993_v56  ;;  %v2015_v19 = vand.u32 4294901760, %v6052_v63 }
 0x183   : > { %1823 = vmatmul.mubr.f32.vlgmr.msra.gmra.mxu1 %v5328_v17  ;;  %2081 = vmatprep.subr.mxu1 %v2080_v6  ;;  %v2004_v17 = vand.u32 4294901760, %v6035_v59  ;;  %v6060_v23 = vand.u32 4294901760, %v1889_v15 }
 0x184   : > { %1828 = vmatprep.mubr.f32.mxu1 %v7297_v13  ;;  %2087 = vmatpush1.msra.mxu1 %v2086_v58  ;;  %v1995_v3 = vand.u32 4294901760, %v1994_v33  ;;  %v6067_v44 = vsub.f32 %v1886_v52, %v6043_v31  ;;  %v2016_v48 = vsub.f32 %v6052_v63, %v2015_v19  ;;  %v1844_v52 = vld [vmem:[%s7259_s4 + $0x10] sm:$0xff] }
 0x185   : > { %1968 = vmatprep.mubr.f32.mxu0 %v7297_v13  ;;  %2212 = vmatpush1.msra.mxu0 %v5946_v8  ;;  %v2005_v42 = vsub.f32 %v6035_v59, %v2004_v17  ;;  %v6079_v9 = vsub.f32 %v1889_v15, %v6060_v23 }
 0x186   : > { %1974 = vmatmul.mubr.f32.gmra.mxu0 %v1973_v34  ;;  %2341 = vmatprep.subr.mxu1 %v5912_v53  ;;  %v2026_v60 = vand.u32 4294901760, %v6067_v44  ;;  %v2017_v10 = vand.u32 4294901760, %v2016_v48  ;;  %v1859_v34 = vld [vmem:[%s7261_s6 + $0x8] sm:$0xff]  ;;  %v4728_v48 = vpop.eup %4727 }
 0x187   : > { %1830 = vmatmul.mubr.f32.gmra.mxu1 %v5434_v38  ;;  %1979 = vmatprep.mubr.f32.mxu0 %v7297_v13  ;;  %v2006_v38 = vand.u32 4294901760, %v2005_v42  ;;  %v2037_v18 = vand.u32 4294901760, %v6079_v9 }
 0x188   : > { %2120 = vmatprep.mubr.f32.mxu1 %v7297_v13  ;;  %2482 = vmatprep.subr.mxu0 %v2078_v14 }
 0x189   : > { %v2038_v16 = vsub.f32 %v6079_v9, %v2037_v18 }
 0x18a   : > { %1985 = vmatmul.mubr.f32.gmra.mxu0 %v1984_v20 }
 0x18b   : > { %2122 = vmatmul.mubr.f32.vlgmr.msra.gmra.mxu1 %v5905_v54  ;;  %1990 = vmatprep.mubr.f32.mxu0 %v7297_v13  ;;  %v2039_v1 = vand.u32 4294901760, %v2038_v16 }
 0x18c   : > { %2127 = vmatprep.mubr.f32.mxu1 %v7297_v13  ;;  %2343 = vmatpush1.msra.mxu1 %v5919_v5 }
 0x18d   : > { %2607 = vmatprep.subr.mxu1 %v5912_v53  ;;  %v2027_v53 = vsub.f32 %v6067_v44, %v2026_v60 }
 0x18e   : > { %1996 = vmatmul.mubr.f32.gmra.mxu0 %v1995_v3 }
 0x18f   : > { %2129 = vmatmul.mubr.f32.gmra.mxu1 %v5933_v62  ;;  %2001 = vmatprep.mubr.f32.mxu0 %v7297_v13  ;;  %v2028_v22 = vand.u32 4294901760, %v2027_v53 }
 0x190   : > { %2134 = vmatprep.mubr.f32.mxu1 %v7297_v13 }
 0x192   : > { %2007 = vmatmul.mubr.f32.gmra.mxu0 %v2006_v38  ;;  %v3634_v38 = vld [vmem:[%s7263_s8] sm:$0xff] }
 0x193   : > { %2136 = vmatmul.mubr.f32.gmra.mxu1 %v5961_v40  ;;  %2012 = vmatprep.mubr.f32.mxu0 %v7297_v13 }
 0x194   : > { %2141 = vmatprep.mubr.f32.mxu1 %v7297_v13 }
 0x196   : > { %2018 = vmatmul.mubr.f32.gmra.mxu0 %v2017_v10  ;;  %v1845_v10 = vld [vmem:[%s7259_s4 + $0x18] sm:$0xff] }
 0x197   : > { %2143 = vmatmul.mubr.f32.gmra.mxu1 %v5987_v26  ;;  %2023 = vmatprep.mubr.f32.mxu0 %v7297_v13 }
 0x198   : > { %2148 = vmatprep.mubr.f32.mxu1 %v7297_v13 }
 0x19a   : > { %2029 = vmatmul.mubr.f32.gmra.mxu0 %v2028_v22 }
 0x19b   : > { %2150 = vmatmul.mubr.f32.gmra.mxu1 %v6005_v32  ;;  %2034 = vmatprep.mubr.f32.mxu0 %v7297_v13 }
 0x19c   : > { %2155 = vmatprep.mubr.f32.mxu1 %v7297_v13 }
 0x19e   : > { %2040 = vmatmul.mubr.f32.gmra.mxu0 %v2039_v1 }
 0x19f   : > { %2157 = vmatmul.mubr.f32.gmra.mxu1 %v6025_v41  ;;  %2245 = vmatprep.mubr.f32.mxu0 %v7297_v13 }
 0x1a0   : > { %2162 = vmatprep.mubr.f32.mxu1 %v7297_v13 }
 0x1a2   : > { %2248 = vmatmul.mubr.f32.vlgmr.msra.gmra.mxu0 %v5928_v37 }
 0x1a3   : > { %2164 = vmatmul.mubr.f32.gmra.mxu1 %v6043_v31  ;;  %2253 = vmatprep.mubr.f32.mxu0 %v7297_v13 }
 0x1a4   : > { %2169 = vmatprep.mubr.f32.mxu1 %v7297_v13  ;;  %2486 = vmatpush1.msra.mxu0 %v2084_v25  ;;  %v1865_v25 = vld [vmem:[%s7261_s6 + $0x38] sm:$0xff] }
 0x1a5   : > { %3595 = vperm.xlu1 %4713, %v1865_v25  }
 0x1a6   : > { %2256 = vmatmul.mubr.f32.gmra.mxu0 %v5959_v12 }
 0x1a7   : > { %2171 = vmatmul.mubr.f32.gmra.mxu1 %v6060_v23  ;;  %2261 = vmatprep.mubr.f32.mxu0 %v7297_v13 }
 0x1a8   : > { %2376 = vmatprep.mubr.f32.mxu1 %v7297_v13 }
 0x1aa   : > { %2264 = vmatmul.mubr.f32.gmra.mxu0 %v5985_v28  ;;  %v1863_v28 = vld [vmem:[%s7261_s6 + $0x28] sm:$0xff] }
 0x1ab   : > { %2380 = vmatmul.mubr.f32.vlgmr.msra.gmra.mxu1 %v1960_v0  ;;  %2269 = vmatprep.mubr.f32.mxu0 %v7297_v13 }
 0x1ac   : > { %2385 = vmatprep.mubr.f32.mxu1 %v7297_v13  ;;  %2609 = vmatpush1.msra.mxu1 %v5919_v5 }
 0x1ad   : > { %3585 = vperm.xlu1 %4713, %v1863_v28  }
 0x1ae   : > { %2272 = vmatmul.mubr.f32.gmra.mxu0 %v6014_v50  ;;  %v6196_v50 = vand.u32 4294901760, %v2701_v11 }
 0x1af   : > { %2389 = vmatmul.mubr.f32.gmra.mxu1 %v1971_v24  ;;  %2277 = vmatprep.mubr.f32.mxu0 %v7297_v13  ;;  %v1864_v24 = vld [vmem:[%s7261_s6 + $0x30] sm:$0xff] }
 0x1b0   : > { %2394 = vmatprep.mubr.f32.mxu1 %v7297_v13  ;;  %3590 = vperm.xlu0 %4714, %v1864_v24   ;;  %v6210_v33 = vsub.f32 %v2701_v11, %v6196_v50 }
 0x1b1   : > { %3580 = vperm.xlu1 %4713, %v1862_v51  }
 0x1b2   : > { %2280 = vmatmul.mubr.f32.gmra.mxu0 %v6035_v59 }
 0x1b3   : > { %2398 = vmatmul.mubr.f32.gmra.mxu1 %v1982_v61  ;;  %2285 = vmatprep.mubr.f32.mxu0 %v7297_v13  ;;  %v2704_v61 = vsel %vm2699_vm4, %v1843_v55, 0 }
 0x1b4   : > { %2403 = vmatprep.mubr.f32.mxu1 %v7297_v13  ;;  %3575 = vperm.xlu0 %4714, %v1861_v49   ;;  %v3635_v49 = vld [vmem:[%s7263_s8 + $0x8] sm:$0xff] }
 0x1b6   : > { %2288 = vmatmul.mubr.f32.gmra.mxu0 %v6052_v63  ;;  %v1860_v63 = vld [vmem:[%s7261_s6 + $0x10] sm:$0xff] }
 0x1b7   : > { %2407 = vmatmul.mubr.f32.gmra.mxu1 %v1993_v56  ;;  %2293 = vmatprep.mubr.f32.mxu0 %v7297_v13  ;;  %v6207_v56 = vand.u32 4294901760, %v2704_v61 }
 0x1b8   : > { %2412 = vmatprep.mubr.f32.mxu1 %v7297_v13  ;;  %3565 = vperm.xlu0 %4714, %v1859_v34  }
 0x1b9   : > { %3570 = vperm.xlu1 %4713, %v1860_v63  }
 0x1ba   : > { %2296 = vmatmul.mubr.f32.gmra.mxu0 %v6067_v44 }
 0x1bb   : > { %2416 = vmatmul.mubr.f32.gmra.mxu1 %v2004_v17  ;;  %2301 = vmatprep.mubr.f32.mxu0 %v7297_v13  ;;  %v2707_v17 = vsel %vm2699_vm4, %v1844_v52, 0  ;;  %v1847_v52 = vld [vmem:[%s7259_s4 + $0x28] sm:$0xff] }
 0x1bc   : > { %2421 = vmatprep.mubr.f32.mxu1 %v7297_v13  ;;  %3640 = vperm.xlu0 %4714, %v3634_v38  }
 0x1be   : > { %2304 = vmatmul.mubr.f32.gmra.mxu0 %v6079_v9  ;;  %v6222_v9 = vsub.f32 %v2704_v61, %v6207_v56 }
 0x1bf   : > { %2425 = vmatmul.mubr.f32.gmra.mxu1 %v2015_v19  ;;  %2519 = vmatprep.mubr.f32.mxu0 %v7297_v13 }
 0x1c0   : > { %2430 = vmatprep.mubr.f32.mxu1 %v7297_v13  ;;  %v2806_v24 = vand.u32 4294901760, %v6222_v9 }
 0x1c2   : > { %2521 = vmatmul.mubr.f32.vlgmr.msra.gmra.mxu0 %v5905_v54 }
 0x1c3   : > { %2434 = vmatmul.mubr.f32.gmra.mxu1 %v2026_v60  ;;  %2526 = vmatprep.mubr.f32.mxu0 %v7297_v13 }
 0x1c4   : > { %2439 = vmatprep.mubr.f32.mxu1 %v7297_v13 }
 0x1c6   : > { %2528 = vmatmul.mubr.f32.gmra.mxu0 %v5933_v62 }
 0x1c7   : > { %2443 = vmatmul.mubr.f32.gmra.mxu1 %v2037_v18  ;;  %2533 = vmatprep.mubr.f32.mxu0 %v7297_v13 }
 0x1c8   : > { %2642 = vmatprep.mubr.f32.mxu1 %v7297_v13 }
 0x1ca   : > { %2535 = vmatmul.mubr.f32.gmra.mxu0 %v5961_v40 }
 0x1cb   : > { %2644 = vmatmul.mubr.f32.vlgmr.msra.gmra.mxu1 %v5905_v54  ;;  %2540 = vmatprep.mubr.f32.mxu0 %v7297_v13 }
 0x1cc   : > { %2649 = vmatprep.mubr.f32.mxu1 %v7297_v13 }
 0x1ce   : > { %2542 = vmatmul.mubr.f32.gmra.mxu0 %v5987_v26 }
 0x1cf   : > { %2651 = vmatmul.mubr.f32.gmra.mxu1 %v5933_v62  ;;  %2547 = vmatprep.mubr.f32.mxu0 %v7297_v13 }
 0x1d0   : > { %2656 = vmatprep.mubr.f32.mxu1 %v7297_v13 }
 0x1d2   : > { %2549 = vmatmul.mubr.f32.gmra.mxu0 %v6005_v32 }
 0x1d3   : > { %2658 = vmatmul.mubr.f32.gmra.mxu1 %v5961_v40  ;;  %2554 = vmatprep.mubr.f32.mxu0 %v7297_v13 }
 0x1d4   : > { %2663 = vmatprep.mubr.f32.mxu1 %v7297_v13 }
 0x1d6   : > { %2556 = vmatmul.mubr.f32.gmra.mxu0 %v6025_v41 }
 0x1d7   : > { %2665 = vmatmul.mubr.f32.gmra.mxu1 %v5987_v26  ;;  %2561 = vmatprep.mubr.f32.mxu0 %v7297_v13 }
 0x1d8   : > { %2670 = vmatprep.mubr.f32.mxu1 %v7297_v13 }
 0x1da   : > { %2563 = vmatmul.mubr.f32.gmra.mxu0 %v6043_v31 }
 0x1db   : > { %2672 = vmatmul.mubr.f32.gmra.mxu1 %v6005_v32  ;;  %2568 = vmatprep.mubr.f32.mxu0 %v7297_v13 }
 0x1dc   : > { %2677 = vmatprep.mubr.f32.mxu1 %v7297_v13 }
 0x1de   : > { %2570 = vmatmul.mubr.f32.gmra.mxu0 %v6060_v23 }
 0x1df   : > { %2679 = vmatmul.mubr.f32.gmra.mxu1 %v6025_v41  ;;  %2792 = vmatprep.mubr.f32.mxu0 %v7297_v13 }
 0x1e0   : > { %2684 = vmatprep.mubr.f32.mxu1 %v7297_v13 }
 0x1e3   : > { %2686 = vmatmul.mubr.f32.gmra.mxu1 %v6043_v31 }
 0x1e4   : > { %2691 = vmatprep.mubr.f32.mxu1 %v7297_v13 }
 0x1e7   : > { %2693 = vmatmul.mubr.f32.gmra.mxu1 %v6060_v23 }
 0x1e8   : > { %2965 = vmatprep.mubr.f32.mxu1 %v7297_v13 }
 0x213   : > { %v1227_v54 = vpop.f32.mrf.mxu0 }
 0x215   : > { %v1229_v5 = vpop.f32.mrf.mxu0 }
 0x21c   : > { %v1390_v47 = vpop.f32.mrf.mxu1 }
 0x21d   : > { %v1391_v26 = vadd.f32 %v1390_v47, %v1227_v54  ;;  %v4730_v54 = vpop.eup %4729  ;;  %v1858_v47 = vld [vmem:[%s7261_s6] sm:$0xff] }
 0x21e   : > { %v1392_v57 = vpop.f32.mrf.mxu1  ;;  %3560 = vperm.xlu1 %4713, %v1858_v47  }
 0x21f   : > { %v1393_v36 = vadd.f32 %v1392_v57, %v1229_v5 }
 0x220   : > { %v1238_v37 = vpop.f32.mrf.mxu0 }
 0x222   : > { %v1240_v62 = vpop.f32.mrf.mxu0  ;;  %3645 = vperm.xlu1 %4713, %v3635_v49  }
 0x226   : > { %v1502_v46 = vpop.f32.mrf.mxu0 }
 0x227   : > { %v1397_v8 = vpop.f32.mrf.mxu1  ;;  %v1503_v4 = vadd.f32 %v1502_v46, %v1391_v26 }
 0x228   : > { %v1504_v35 = vpop.f32.mrf.mxu0  ;;  %v1398_v32 = vadd.f32 %v1397_v8, %v1238_v37  ;;  %v2795_v37 = vand.u32 4294901760, %v6210_v33 }
 0x229   : > { %v1399_v0 = vpop.f32.mrf.mxu1  ;;  %v1505_v39 = vadd.f32 %v1504_v35, %v1393_v36  ;;  %v2710_v35 = vsel %vm2699_vm4, %v1845_v10, 0 }
 0x22a   : > { %v1400_v6 = vadd.f32 %v1399_v0, %v1240_v62  ;;  %v6228_v62 = vand.u32 4294901760, %v2707_v17  ;;  %v2796_v28 = vsub.f32 %v6210_v33, %v2795_v37 }
 0x22c   : > { %v1510_v12 = vpop.f32.mrf.mxu0  ;;  %v6251_v26 = vsub.f32 %v2707_v17, %v6228_v62  ;;  %v2797_v17 = vand.u32 4294901760, %v2796_v28 }
 0x22d   : > { %v1511_v59 = vadd.f32 %v1510_v12, %v1398_v32  ;;  %v3636_v12 = vld [vmem:[%s7263_s8 + $0x10] sm:$0xff] }
 0x22e   : > { %v1512_v14 = vpop.f32.mrf.mxu0  ;;  %3650 = vperm.xlu0 %4714, %v3636_v12  }
 0x22f   : > { %v1513_v23 = vadd.f32 %v1512_v14, %v1400_v6 }
 0x230   : > { %v1600_v40 = vpop.f32.mrf.mxu1 }
 0x231   : > { %v1601_v58 = vadd.f32 %v1600_v40, %v1503_v4 }
 0x232   : > { %v1602_v7 = vpop.f32.mrf.mxu1 }
 0x233   : > { %v1603_v21 = vadd.f32 %v1602_v7, %v1505_v39  ;;  %v1846_v7 = vld [vmem:[%s7259_s4 + $0x20] sm:$0xff] }
 0x234   : > { %v2713_v32 = vsel %vm2699_vm4, %v1846_v7, 0 }
 0x236   : > { %v1609_v30 = vpop.f32.mrf.mxu1 }
 0x237   : > { %v1610_v3 = vadd.f32 %v1609_v30, %v1511_v59 }
 0x238   : > { %v1611_v27 = vpop.f32.mrf.mxu1 }
 0x239   : > { %v1612_v53 = vadd.f32 %v1611_v27, %v1513_v23  ;;  %v2817_v27 = vand.u32 4294901760, %v6251_v26 }
 0x23a   : > { %v1729_v29 = vpop.f32.mrf.mxu0 }
 0x23b   : > { %v1730_v31 = vadd.f32 %v1729_v29, %v1601_v58 }
 0x23c   : > { %v1731_v45 = vpop.f32.mrf.mxu0 }
 0x23d   : > { %v1732_v42 = vadd.f32 %v1731_v45, %v1603_v21  ;;  %v6253_v45 = vand.u32 4294901760, %v2710_v35  ;;  %v6288_v21 = vand.u32 4294901760, %v2713_v32 }
 0x23e   : > { %v1736_v2 = vpop.f32.mrf.mxu0 }
 0x23f   : > { %v1737_v18 = vadd.f32 %v1736_v2, %v1610_v3  ;;  %v6286_v59 = vsub.f32 %v2710_v35, %v6253_v45 }
 0x240   : > { %v1738_v41 = vpop.f32.mrf.mxu0 }
 0x241   : > { %v1739_v46 = vadd.f32 %v1738_v41, %v1612_v53  ;;  %v2807_v41 = vsub.f32 %v6222_v9, %v2806_v24  ;;  %v1848_v53 = vld [vmem:[%s7259_s4 + $0x30] sm:$0xff] }
 0x242   : > { %v1964_v15 = vpop.f32.mrf.mxu0 }
 0x243   : > { %v1824_v20 = vpop.f32.mrf.mxu1 }
 0x244   : > { %v1825_v19 = vadd.f32 %v1824_v20, %v1730_v31  ;;  %v6216_v44 = vpop.f32.mrf.mxu0 }
 0x245   : > { %v1826_v60 = vpop.f32.mrf.mxu1 }
 0x246   : > { %v1838_v22 = vmul.f32 %v4728_v48, %v1825_v19  ;;  %v1827_v16 = vadd.f32 %v1826_v60, %v1732_v42  ;;  %v1975_v1 = vpop.f32.mrf.mxu0  ;;  %v2716_v19 = vsel %vm2699_vm4, %v1847_v52, 0  ;;  %v2808_v60 = vand.u32 4294901760, %v2807_v41 }
 0x247   : > { %v1831_v5 = vpop.f32.mrf.mxu1 }
 0x248   : > { %v1839_v57 = vmul.f32 %v4730_v54, %v1827_v16  ;;  %v1832_v8 = vadd.f32 %v1831_v5, %v1737_v18  ;;  %v6234_v0 = vpop.f32.mrf.mxu0  ;;  %v6239_v40 = vand.u32 4294901760, %v1838_v22  ;;  %v2818_v16 = vsub.f32 %v6251_v26, %v2817_v27 }
 0x249   : > { %v1833_v14 = vpop.f32.mrf.mxu1 }
 0x24a   : > { %v6244_v43 = vand.u32 4294901760, %v1839_v57  ;;  %v1840_v25 = vmul.f32 %v4728_v48, %v1832_v8  ;;  %v1834_v29 = vadd.f32 %v1833_v14, %v1739_v46  ;;  %v1986_v55 = vpop.f32.mrf.mxu0  ;;  %v6267_v61 = vsub.f32 %v1838_v22, %v6239_v40 }
 0x24b   : > { %v2123_v11 = vpop.f32.mrf.mxu1  ;;  %v2719_v14 = vsel %vm2699_vm4, %v1848_v53, 0 }
 0x24c   : > { %v6258_v30 = vand.u32 4294901760, %v1840_v25  ;;  %v1841_v36 = vmul.f32 %v4730_v54, %v1834_v29  ;;  %v6261_v4 = vsub.f32 %v1839_v57, %v6244_v43  ;;  %v6264_v2 = vpop.f32.mrf.mxu0  ;;  %v6269_v51 = vadd.f32 %v2123_v11, %v1964_v15  ;;  %v3637_v15 = vld [vmem:[%s7263_s8 + $0x18] sm:$0xff] }
 0x24d   : > { %v6271_v39 = vpop.f32.mrf.mxu1  ;;  %v2929_v42 = vand.u32 4294901760, %v6267_v61  ;;  %3655 = vperm.xlu1 %4713, %v3637_v15   ;;  %v6319_v54 = vsub.f32 %v2713_v32, %v6288_v21  ;;  %v6324_v57 = vand.u32 4294901760, %v2716_v19  ;;  %v1849_v29 = vld [vmem:[%s7259_s4 + $0x38] sm:$0xff]  ;;  %v2819_v11 = vand.u32 4294901760, %v2818_v16 }
 0x24e   : > { %v6274_v6 = vsub.f32 %v1840_v25, %v6258_v30  ;;  %v6276_v58 = vand.u32 4294901760, %v1841_v36  ;;  %v1997_v34 = vpop.f32.mrf.mxu0  ;;  %v2923_v23 = vand.u32 4294901760, %v6261_v4  ;;  %v2722_v53 = vsel %vm2699_vm4, %v1849_v29, 0 }
 0x24f   : > { %v2130_v31 = vpop.f32.mrf.mxu1  ;;  %v2930_v12 = vsub.f32 %v6267_v61, %v2929_v42  ;;  %v6346_v52 = vsub.f32 %v2716_v19, %v6324_v57 }
 0x250   : > { %v2917_v20 = vand.u32 4294901760, %v6274_v6  ;;  %2753 = vmatprep.subr.mxu0 %v6276_v58  ;;  %v2910_v63 = vsub.f32 %v1841_v36, %v6276_v58  ;;  %v6297_v3 = vpop.f32.mrf.mxu0  ;;  %v6302_v38 = vadd.f32 %v2130_v31, %v1975_v1  ;;  %v2828_v1 = vand.u32 4294901760, %v6286_v59 }
 0x251   : > { %2755 = vmatpush1.msra.mxu0 %v6258_v30  ;;  %v6304_v48 = vpop.f32.mrf.mxu1  ;;  %v2924_v46 = vsub.f32 %v6261_v4, %v2923_v23  ;;  %v7295_v36 = vand.u32 4294901760, %v6319_v54  ;;  %v6348_v31 = vand.u32 4294901760, %v2719_v14 }
 0x252   : > { %2757 = vmatprep.subr.mxu0 %v6244_v43  ;;  %v2911_v10 = vand.u32 4294901760, %v2910_v63  ;;  %v2008_v18 = vpop.f32.mrf.mxu0  ;;  %v2918_v22 = vsub.f32 %v6274_v6, %v2917_v20  ;;  %v2829_v49 = vsub.f32 %v6286_v59, %v2828_v1 }
 0x253   : > { %2759 = vmatpush1.msra.mxu0 %v6239_v40  ;;  %v2137_v5 = vpop.f32.mrf.mxu1  ;;  %v2925_v41 = vand.u32 4294901760, %v2924_v46  ;;  %v2840_v19 = vsub.f32 %v6319_v54, %v7295_v36 }
 0x254   : > { %2798 = vmatmul.mubr.f32.vlgmr.msra.gmra.mxu0 %v2797_v17  ;;  %3052 = vmatprep.subr.mxu0 %v2910_v63  ;;  %v2912_v47 = vsub.f32 %v2910_v63, %v2911_v10  ;;  %v6326_v8 = vadd.f32 %v2137_v5, %v1986_v55  ;;  %v2010_v35 = vpop.f32.mrf.mxu0  ;;  %v2919_v28 = vand.u32 4294901760, %v2918_v22  ;;  %v2931_v63 = vand.u32 4294901760, %v2930_v12 }
 0x255   : > { %3055 = vmatpush1.msra.mxu0 %v6274_v6  ;;  %2803 = vmatprep.mubr.f32.mxu0 %v7297_v13  ;;  %v6334_v7 = vpop.f32.mrf.mxu1  ;;  %v2830_v16 = vand.u32 4294901760, %v2829_v49  ;;  %v6362_v5 = vsub.f32 %v2719_v14, %v6348_v31  ;;  %v2841_v14 = vand.u32 4294901760, %v2840_v19 }
 0x256   : > { %3058 = vmatprep.subr.mxu0 %v6261_v4  ;;  %v2913_v25 = vand.u32 4294901760, %v2912_v47  ;;  %v2019_v55 = vpop.f32.mrf.mxu0  ;;  %v6364_v47 = vand.u32 4294901760, %v2722_v53 }
 0x257   : > { %3061 = vmatpush1.msra.mxu0 %v6267_v61  ;;  %v2144_v32 = vpop.f32.mrf.mxu1  ;;  %v7294_v49 = vand.u32 4294901760, %v6362_v5 }
 0x258   : > { %2809 = vmatmul.mubr.f32.gmra.mxu0 %v2808_v60  ;;  %2914 = vmatprep.subr.mxu1 %v2913_v25  ;;  %v6350_v15 = vadd.f32 %v2144_v32, %v1997_v34  ;;  %v2021_v17 = vpop.f32.mrf.mxu0  ;;  %v6381_v32 = vsub.f32 %v2722_v53, %v6364_v47 }
 0x259   : > { %3331 = vmatprep.subr.mxu0 %v2911_v10  ;;  %2920 = vmatpush1.msra.mxu1 %v2919_v28  ;;  %v6353_v22 = vpop.f32.mrf.mxu1  ;;  %v7293_v10 = vand.u32 4294901760, %v6346_v52 }
 0x25a   : > { %2926 = vmatprep.subr.mxu1 %v2925_v41  ;;  %2814 = vmatprep.mubr.f32.mxu0 %v7297_v13  ;;  %v2030_v60 = vpop.f32.mrf.mxu0 }
 0x25b   : > { %2932 = vmatpush1.msra.mxu1 %v2931_v63  ;;  %v2151_v34 = vpop.f32.mrf.mxu1 }
 0x25c   : > { %2820 = vmatmul.mubr.f32.gmra.mxu0 %v2819_v11  ;;  %2967 = vmatmul.mubr.f32.vlgmr.msra.gmra.mxu1 %v6196_v50  ;;  %v6366_v46 = vadd.f32 %v2151_v34, %v2008_v18  ;;  %v2032_v12 = vpop.f32.mrf.mxu0  ;;  %v2851_v18 = vsub.f32 %v6346_v52, %v7293_v10 }
 0x25d   : > { %3188 = vmatprep.subr.mxu1 %v6276_v58  ;;  %2825 = vmatprep.mubr.f32.mxu0 %v7297_v13  ;;  %v2153_v25 = vpop.f32.mrf.mxu1 }
 0x25e   : > { %3190 = vmatpush1.msra.mxu1 %v6258_v30  ;;  %2972 = vmatprep.mubr.f32.mxu1 %v7297_v13  ;;  %v6372_v29 = vadd.f32 %v2153_v25, %v2010_v35  ;;  %v2041_v28 = vpop.f32.mrf.mxu0  ;;  %v2852_v53 = vand.u32 4294901760, %v2851_v18 }
 0x25f   : > { %3192 = vmatprep.subr.mxu1 %v6244_v43  ;;  %v2158_v11 = vpop.f32.mrf.mxu1 }
 0x260   : > { %3194 = vmatpush1.msra.mxu1 %v6239_v40  ;;  %2831 = vmatmul.mubr.f32.gmra.mxu0 %v2830_v16  ;;  %v6383_v41 = vadd.f32 %v2158_v11, %v2019_v55  ;;  %v2043_v35 = vpop.f32.mrf.mxu0  ;;  %v2862_v55 = vsub.f32 %v6362_v5, %v7294_v49  ;;  %v7296_v11 = vand.u32 4294901760, %v6381_v32 }
 0x261   : > { %2974 = vmatmul.mubr.f32.gmra.mxu1 %v6207_v56  ;;  %3462 = vmatprep.subr.mxu1 %v6276_v58  ;;  %v2160_v63 = vpop.f32.mrf.mxu1 }
 0x262   : > { %2836 = vmatprep.mubr.f32.mxu0 %v7297_v13  ;;  %2979 = vmatprep.mubr.f32.mxu1 %v7297_v13  ;;  %v6389_v16 = vadd.f32 %v2160_v63, %v2021_v17  ;;  %v2249_v19 = vpop.f32.mrf.mxu0 }
 0x263   : > { %v2165_v34 = vpop.f32.mrf.mxu1  ;;  %v2250_v25 = vadd.f32 %v2249_v19, %v6269_v51  ;;  %v2126_v51 = vadd.f32 %v6271_v39, %v6216_v44  ;;  %v2133_v39 = vadd.f32 %v6304_v48, %v6234_v0  ;;  %v2140_v0 = vadd.f32 %v6334_v7, %v6264_v2 }
 0x264   : > { %2842 = vmatmul.mubr.f32.gmra.mxu0 %v2841_v14  ;;  %v6396_v58 = vadd.f32 %v2165_v34, %v2030_v60  ;;  %v2251_v10 = vpop.f32.mrf.mxu0  ;;  %v2863_v60 = vand.u32 4294901760, %v2862_v55  ;;  %v2873_v34 = vsub.f32 %v6381_v32, %v7296_v11  ;;  %v2147_v2 = vadd.f32 %v6353_v22, %v6297_v3 }
 0x265   : > { %2981 = vmatmul.mubr.f32.gmra.mxu1 %v6228_v62  ;;  %2847 = vmatprep.mubr.f32.mxu0 %v7297_v13  ;;  %v2167_v17 = vpop.f32.mrf.mxu1 }
 0x266   : > { %2986 = vmatprep.mubr.f32.mxu1 %v7297_v13  ;;  %v6403_v14 = vadd.f32 %v2167_v17, %v2032_v12  ;;  %v2257_v18 = vpop.f32.mrf.mxu0  ;;  %v2252_v12 = vadd.f32 %v2251_v10, %v2126_v51 }
 0x267   : > { %v2172_v63 = vpop.f32.mrf.mxu1  ;;  %v2258_v19 = vadd.f32 %v2257_v18, %v6302_v38 }
 0x268   : > { %2853 = vmatmul.mubr.f32.gmra.mxu0 %v2852_v53  ;;  %v6409_v49 = vadd.f32 %v2172_v63, %v2041_v28  ;;  %v2259_v36 = vpop.f32.mrf.mxu0  ;;  %v2874_v28 = vand.u32 4294901760, %v2873_v34 }
 0x269   : > { %2988 = vmatmul.mubr.f32.gmra.mxu1 %v6253_v45  ;;  %2858 = vmatprep.mubr.f32.mxu0 %v7297_v13  ;;  %v2174_v44 = vpop.f32.mrf.mxu1  ;;  %v2260_v10 = vadd.f32 %v2259_v36, %v2133_v39 }
 0x26a   : > { %2993 = vmatprep.mubr.f32.mxu1 %v7297_v13  ;;  %v6416_v38 = vadd.f32 %v2174_v44, %v2043_v35  ;;  %v2265_v53 = vpop.f32.mrf.mxu0 }
 0x26b   : > { %v2381_v55 = vpop.f32.mrf.mxu1  ;;  %v2266_v17 = vadd.f32 %v2265_v53, %v6326_v8 }
 0x26c   : > { %2864 = vmatmul.mubr.f32.gmra.mxu0 %v2863_v60  ;;  %v6419_v18 = vadd.f32 %v2381_v55, %v2250_v25  ;;  %v2267_v63 = vpop.f32.mrf.mxu0 }
 0x26d   : > { %2995 = vmatmul.mubr.f32.gmra.mxu1 %v6288_v21  ;;  %2869 = vmatprep.mubr.f32.mxu0 %v7297_v13  ;;  %v2383_v11 = vpop.f32.mrf.mxu1  ;;  %v2268_v36 = vadd.f32 %v2267_v63, %v2140_v0 }
 0x26e   : > { %3000 = vmatprep.mubr.f32.mxu1 %v7297_v13  ;;  %v6426_v48 = vadd.f32 %v2383_v11, %v2252_v12  ;;  %v2273_v35 = vpop.f32.mrf.mxu0 }
 0x26f   : > { %v2390_v8 = vpop.f32.mrf.mxu1  ;;  %v2274_v51 = vadd.f32 %v2273_v35, %v6350_v15 }
 0x270   : > { %2875 = vmatmul.mubr.f32.gmra.mxu0 %v2874_v28  ;;  %v6429_v25 = vadd.f32 %v2390_v8, %v2258_v19  ;;  %v2275_v60 = vpop.f32.mrf.mxu0 }
 0x271   : > { %3002 = vmatmul.mubr.f32.gmra.mxu1 %v6324_v57  ;;  %3094 = vmatprep.mubr.f32.mxu0 %v7297_v13  ;;  %v2392_v34 = vpop.f32.mrf.mxu1 }
 0x272   : > { %3007 = vmatprep.mubr.f32.mxu1 %v7297_v13  ;;  %v6436_v7 = vadd.f32 %v2392_v34, %v2260_v10  ;;  %v2281_v11 = vpop.f32.mrf.mxu0 }
 0x273   : > { %v2399_v44 = vpop.f32.mrf.mxu1  ;;  %v2282_v15 = vadd.f32 %v2281_v11, %v6366_v46  ;;  %v2276_v46 = vadd.f32 %v2275_v60, %v2147_v2 }
 0x274   : > { %3097 = vmatmul.mubr.f32.vlgmr.msra.gmra.mxu0 %v6210_v33  ;;  %v6440_v19 = vadd.f32 %v2399_v44, %v2266_v17  ;;  %v2283_v39 = vpop.f32.mrf.mxu0 }
 0x275   : > { %3009 = vmatmul.mubr.f32.gmra.mxu1 %v6348_v31  ;;  %3335 = vmatpush1.msra.mxu0 %v2917_v20  ;;  %v2401_v12 = vpop.f32.mrf.mxu1  ;;  %v2284_v3 = vadd.f32 %v2283_v39, %v6372_v29 }
 0x276   : > { %3339 = vmatprep.subr.mxu0 %v2923_v23  ;;  %3014 = vmatprep.mubr.f32.mxu1 %v7297_v13  ;;  %v6449_v22 = vadd.f32 %v2401_v12, %v2268_v36  ;;  %v2289_v53 = vpop.f32.mrf.mxu0 }
 0x277   : > { %3343 = vmatpush1.msra.mxu0 %v2929_v42  ;;  %3102 = vmatprep.mubr.f32.mxu0 %v7297_v13  ;;  %v2408_v55 = vpop.f32.mrf.mxu1  ;;  %v2290_v6 = vadd.f32 %v2289_v53, %v6383_v41 }
 0x278   : > { %3105 = vmatmul.mubr.f32.gmra.mxu0 %v6222_v9  ;;  %v6456_v20 = vadd.f32 %v2408_v55, %v2274_v51  ;;  %v2291_v4 = vpop.f32.mrf.mxu0 }
 0x279   : > { %3016 = vmatmul.mubr.f32.gmra.mxu1 %v6364_v47  ;;  %3110 = vmatprep.mubr.f32.mxu0 %v7297_v13  ;;  %v2410_v23 = vpop.f32.mrf.mxu1  ;;  %v2292_v29 = vadd.f32 %v2291_v4, %v6389_v16 }
 0x27a   : > { %3227 = vmatprep.mubr.f32.mxu1 %v7297_v13  ;;  %v6462_v61 = vadd.f32 %v2410_v23, %v2276_v46  ;;  %v2297_v42 = vpop.f32.mrf.mxu0 }
 0x27b   : > { %v2417_v17 = vpop.f32.mrf.mxu1  ;;  %v2298_v41 = vadd.f32 %v2297_v42, %v6396_v58 }
 0x27c   : > { %3113 = vmatmul.mubr.f32.gmra.mxu0 %v6251_v26  ;;  %v6466_v28 = vadd.f32 %v2417_v17, %v2282_v15  ;;  %v2299_v63 = vpop.f32.mrf.mxu0 }
 0x27d   : > { %3231 = vmatmul.mubr.f32.vlgmr.msra.gmra.mxu1 %v2795_v37  ;;  %3118 = vmatprep.mubr.f32.mxu0 %v7297_v13  ;;  %v2419_v0 = vpop.f32.mrf.mxu1  ;;  %v2300_v16 = vadd.f32 %v2299_v63, %v6403_v14 }
 0x27e   : > { %3464 = vmatpush1.msra.mxu1 %v6258_v30  ;;  %3236 = vmatprep.mubr.f32.mxu1 %v7297_v13  ;;  %v6474_v10 = vadd.f32 %v2419_v0, %v2284_v3  ;;  %v2305_v58 = vpop.f32.mrf.mxu0 }
 0x27f   : > { %3466 = vmatprep.subr.mxu1 %v6244_v43  ;;  %v2426_v35 = vpop.f32.mrf.mxu1  ;;  %v2306_v8 = vadd.f32 %v2305_v58, %v6409_v49 }
 0x280   : > { %3468 = vmatpush1.msra.mxu1 %v6239_v40  ;;  %3121 = vmatmul.mubr.f32.gmra.mxu0 %v6286_v59  ;;  %v6480_v33 = vadd.f32 %v2426_v35, %v2290_v6  ;;  %v2307_v37 = vpop.f32.mrf.mxu0  ;;  %v7343_v59 = vand.u32 4294901760, %v6319_v54 }
 0x281   : > { %3240 = vmatmul.mubr.f32.gmra.mxu1 %v2806_v24  ;;  %3126 = vmatprep.mubr.f32.mxu0 %v7297_v13  ;;  %v2428_v30 = vpop.f32.mrf.mxu1  ;;  %v2308_v14 = vadd.f32 %v2307_v37, %v6416_v38 }
 0x282   : > { %3245 = vmatprep.mubr.f32.mxu1 %v7297_v13  ;;  %v6487_v43 = vadd.f32 %v2428_v30, %v2292_v29  ;;  %v2522_v49 = vpop.f32.mrf.mxu0 }
 0x283   : > { %v2435_v51 = vpop.f32.mrf.mxu1  ;;  %v2523_v40 = vadd.f32 %v2522_v49, %v6419_v18 }
 0x284   : > { %3129 = vmatmul.mubr.f32.gmra.mxu0 %v6319_v54  ;;  %v6491_v60 = vadd.f32 %v2435_v51, %v2298_v41  ;;  %v2524_v34 = vpop.f32.mrf.mxu0  ;;  %v7344_v54 = vand.u32 4294901760, %v6346_v52 }
 0x285   : > { %3249 = vmatmul.mubr.f32.gmra.mxu1 %v2817_v27  ;;  %3134 = vmatprep.mubr.f32.mxu0 %v7297_v13  ;;  %v2437_v9 = vpop.f32.mrf.mxu1  ;;  %v2525_v24 = vadd.f32 %v2524_v34, %v6426_v48 }
 0x286   : > { %3254 = vmatprep.mubr.f32.mxu1 %v7297_v13  ;;  %v6498_v38 = vadd.f32 %v2437_v9, %v2300_v16  ;;  %v2529_v2 = vpop.f32.mrf.mxu0 }
 0x287   : > { %v2444_v36 = vpop.f32.mrf.mxu1  ;;  %v2530_v18 = vadd.f32 %v2529_v2, %v6429_v25 }
 0x288   : > { %3137 = vmatmul.mubr.f32.gmra.mxu0 %v6346_v52  ;;  %v6502_v11 = vadd.f32 %v2444_v36, %v2306_v8  ;;  %v2531_v44 = vpop.f32.mrf.mxu0  ;;  %v7345_v52 = vand.u32 4294901760, %v6362_v5 }
 0x289   : > { %3258 = vmatmul.mubr.f32.gmra.mxu1 %v2828_v1  ;;  %3142 = vmatprep.mubr.f32.mxu0 %v7297_v13  ;;  %v2446_v26 = vpop.f32.mrf.mxu1  ;;  %v2532_v27 = vadd.f32 %v2531_v44, %v6436_v7 }
 0x28a   : > { %3263 = vmatprep.mubr.f32.mxu1 %v7297_v13  ;;  %v6509_v48 = vadd.f32 %v2446_v26, %v2308_v14  ;;  %v2536_v15 = vpop.f32.mrf.mxu0 }
 0x28b   : > { %v2645_v39 = vpop.f32.mrf.mxu1  ;;  %v2537_v25 = vadd.f32 %v2536_v15, %v6440_v19 }
 0x28c   : > { %3145 = vmatmul.mubr.f32.gmra.mxu0 %v6362_v5  ;;  %v6513_v12 = vadd.f32 %v2645_v39, %v2523_v40  ;;  %v2538_v3 = vpop.f32.mrf.mxu0  ;;  %v7346_v5 = vand.u32 4294901760, %v6381_v32 }
 0x28d   : > { %3267 = vmatmul.mubr.f32.gmra.mxu1 %v7343_v59  ;;  %3150 = vmatprep.mubr.f32.mxu0 %v7297_v13  ;;  %v2647_v1 = vpop.f32.mrf.mxu1  ;;  %v2539_v7 = vadd.f32 %v2538_v3, %v6449_v22 }
 0x28e   : > { %3272 = vmatprep.mubr.f32.mxu1 %v7297_v13  ;;  %v6520_v46 = vadd.f32 %v2647_v1, %v2525_v24  ;;  %v2543_v53 = vpop.f32.mrf.mxu0 }
 0x28f   : > { %v2652_v55 = vpop.f32.mrf.mxu1  ;;  %v2544_v19 = vadd.f32 %v2543_v53, %v6456_v20 }
 0x290   : > { %3153 = vmatmul.mubr.f32.gmra.mxu0 %v6381_v32  ;;  %v6524_v6 = vadd.f32 %v2652_v55, %v2530_v18  ;;  %v2545_v4 = vpop.f32.mrf.mxu0 }
 0x291   : > { %3276 = vmatmul.mubr.f32.gmra.mxu1 %v7344_v54  ;;  %3376 = vmatprep.mubr.f32.mxu0 %v7297_v13  ;;  %v2654_v23 = vpop.f32.mrf.mxu1  ;;  %v2546_v22 = vadd.f32 %v2545_v4, %v6462_v61 }
 0x292   : > { %3281 = vmatprep.mubr.f32.mxu1 %v7297_v13  ;;  %v6531_v29 = vadd.f32 %v2654_v23, %v2532_v27  ;;  %v2550_v42 = vpop.f32.mrf.mxu0 }
 0x293   : > { %v2659_v17 = vpop.f32.mrf.mxu1  ;;  %v2551_v20 = vadd.f32 %v2550_v42, %v6466_v28 }
 0x294   : > { %3378 = vmatmul.mubr.f32.vlgmr.msra.gmra.mxu0 %v6196_v50  ;;  %v6535_v41 = vadd.f32 %v2659_v17, %v2537_v25  ;;  %v2552_v63 = vpop.f32.mrf.mxu0 }
 0x295   : > { %3285 = vmatmul.mubr.f32.gmra.mxu1 %v7345_v52  ;;  %3383 = vmatprep.mubr.f32.mxu0 %v7297_v13  ;;  %v2661_v0 = vpop.f32.mrf.mxu1  ;;  %v2553_v61 = vadd.f32 %v2552_v63, %v6474_v10 }
 0x296   : > { %3290 = vmatprep.mubr.f32.mxu1 %v7297_v13  ;;  %v6542_v16 = vadd.f32 %v2661_v0, %v2539_v7  ;;  %v2557_v58 = vpop.f32.mrf.mxu0 }
 0x297   : > { %v2666_v35 = vpop.f32.mrf.mxu1  ;;  %v2558_v28 = vadd.f32 %v2557_v58, %v6480_v33 }
 0x298   : > { %3385 = vmatmul.mubr.f32.gmra.mxu0 %v6207_v56  ;;  %v6546_v8 = vadd.f32 %v2666_v35, %v2544_v19  ;;  %v2559_v37 = vpop.f32.mrf.mxu0 }
 0x299   : > { %3294 = vmatmul.mubr.f32.gmra.mxu1 %v7346_v5  ;;  %3390 = vmatprep.mubr.f32.mxu0 %v7297_v13  ;;  %v2668_v30 = vpop.f32.mrf.mxu1  ;;  %v2560_v10 = vadd.f32 %v2559_v37, %v6487_v43 }
 0x29a   : > { %3501 = vmatprep.mubr.f32.mxu1 %v7297_v13  ;;  %v6553_v14 = vadd.f32 %v2668_v30, %v2546_v22  ;;  %v2564_v49 = vpop.f32.mrf.mxu0 }
 0x29b   : > { %v2673_v51 = vpop.f32.mrf.mxu1  ;;  %v2565_v33 = vadd.f32 %v2564_v49, %v6491_v60 }
 0x29c   : > { %3392 = vmatmul.mubr.f32.gmra.mxu0 %v6228_v62  ;;  %v6557_v40 = vadd.f32 %v2673_v51, %v2551_v20  ;;  %v2566_v34 = vpop.f32.mrf.mxu0 }
 0x29d   : > { %3503 = vmatmul.mubr.f32.vlgmr.msra.gmra.mxu1 %v6196_v50  ;;  %3397 = vmatprep.mubr.f32.mxu0 %v7297_v13  ;;  %v2675_v32 = vpop.f32.mrf.mxu1  ;;  %v2567_v43 = vadd.f32 %v2566_v34, %v6498_v38 }
 0x29e   : > { %3508 = vmatprep.mubr.f32.mxu1 %v7297_v13  ;;  %v6563_v9 = vadd.f32 %v2675_v32, %v2553_v61  ;;  %v2571_v24 = vpop.f32.mrf.mxu0 }
 0x29f   : > { %v2680_v2 = vpop.f32.mrf.mxu1  ;;  %v2572_v60 = vadd.f32 %v2571_v24, %v6502_v11 }
 0x2a0   : > { %3399 = vmatmul.mubr.f32.gmra.mxu0 %v6253_v45  ;;  %v6567_v36 = vadd.f32 %v2680_v2, %v2558_v28 }
 0x2a1   : > { %3510 = vmatmul.mubr.f32.gmra.mxu1 %v6207_v56  ;;  %3404 = vmatprep.mubr.f32.mxu0 %v7297_v13  ;;  %v2682_v50 = vpop.f32.mrf.mxu1 }
 0x2a2   : > { %3515 = vmatprep.mubr.f32.mxu1 %v7297_v13  ;;  %v6572_v38 = vadd.f32 %v2682_v50, %v2560_v10 }
 0x2a3   : > { %v2687_v18 = vpop.f32.mrf.mxu1 }
 0x2a4   : > { %3406 = vmatmul.mubr.f32.gmra.mxu0 %v6288_v21  ;;  %v6575_v44 = vadd.f32 %v2687_v18, %v2565_v33 }
 0x2a5   : > { %3517 = vmatmul.mubr.f32.gmra.mxu1 %v6228_v62  ;;  %3411 = vmatprep.mubr.f32.mxu0 %v7297_v13  ;;  %v2689_v11 = vpop.f32.mrf.mxu1  ;;  %v6600_v62 = vpop.f32.mrf.mxu0 }
 0x2a6   : > { %3522 = vmatprep.mubr.f32.mxu1 %v7297_v13  ;;  %v6580_v56 = vadd.f32 %v2689_v11, %v2567_v43 }
 0x2a7   : > { %v2694_v26 = vpop.f32.mrf.mxu1 }
 0x2a8   : > { %3413 = vmatmul.mubr.f32.gmra.mxu0 %v6324_v57  ;;  %v6583_v27 = vadd.f32 %v2694_v26, %v2572_v60 }
 0x2a9   : > { %3524 = vmatmul.mubr.f32.gmra.mxu1 %v6253_v45  ;;  %3418 = vmatprep.mubr.f32.mxu0 %v7297_v13  ;;  %v6605_v3 = vpop.f32.mrf.mxu1 }
 0x2aa   : > { %3529 = vmatprep.mubr.f32.mxu1 %v7297_v13 }
 0x2ac   : > { %3420 = vmatmul.mubr.f32.gmra.mxu0 %v6348_v31 }
 0x2ad   : > { %3531 = vmatmul.mubr.f32.gmra.mxu1 %v6288_v21  ;;  %3425 = vmatprep.mubr.f32.mxu0 %v7297_v13 }
 0x2ae   : > { %3536 = vmatprep.mubr.f32.mxu1 %v7297_v13 }
 0x2b0   : > { %3427 = vmatmul.mubr.f32.gmra.mxu0 %v6364_v47 }
 0x2b1   : > { %3538 = vmatmul.mubr.f32.gmra.mxu1 %v6324_v57  ;;  %3750 = vmatprep.mubr.f32.mxu0 %v7297_v13 }
 0x2b2   : > { %3543 = vmatprep.mubr.f32.mxu1 %v7297_v13 }
 0x2b5   : > { %3545 = vmatmul.mubr.f32.gmra.mxu1 %v6348_v31 }
 0x2b6   : > { %3550 = vmatprep.mubr.f32.mxu1 %v7297_v13 }
 0x2b9   : > { %3552 = vmatmul.mubr.f32.gmra.mxu1 %v6364_v47 }
 0x2ba   : > { %3939 = vmatprep.mubr.f32.mxu1 %v7297_v13 }
 0x314   : > { %v2799_v45 = vpop.f32.mrf.mxu0 }
 0x315   : > { %v2800_v21 = vadd.f32 %v2799_v45, %v6513_v12 }
 0x316   : > { %v2801_v15 = vpop.f32.mrf.mxu0 }
 0x317   : > { %v2802_v57 = vadd.f32 %v2801_v15, %v6520_v46 }
 0x318   : > { %v2810_v39 = vpop.f32.mrf.mxu0 }
 0x319   : > { %v2811_v25 = vadd.f32 %v2810_v39, %v6524_v6 }
 0x31a   : > { %v2812_v31 = vpop.f32.mrf.mxu0 }
 0x31b   : > { %v2813_v59 = vadd.f32 %v2812_v31, %v6531_v29 }
 0x31c   : > { %v2821_v1 = vpop.f32.mrf.mxu0  ;;  %v2968_v47 = vpop.f32.mrf.mxu1 }
 0x31d   : > { %v2822_v7 = vadd.f32 %v2821_v1, %v6535_v41  ;;  %v2969_v53 = vadd.f32 %v2968_v47, %v2800_v21 }
 0x31e   : > { %v2823_v55 = vpop.f32.mrf.mxu0  ;;  %v2970_v19 = vpop.f32.mrf.mxu1 }
 0x31f   : > { %v2824_v12 = vadd.f32 %v2823_v55, %v6542_v16  ;;  %v2971_v4 = vadd.f32 %v2970_v19, %v2802_v57 }
 0x320   : > { %v2832_v54 = vpop.f32.mrf.mxu0 }
 0x321   : > { %v2833_v46 = vadd.f32 %v2832_v54, %v6546_v8  ;;  %v2975_v23 = vpop.f32.mrf.mxu1 }
 0x322   : > { %v2976_v6 = vadd.f32 %v2975_v23, %v2811_v25  ;;  %v2834_v22 = vpop.f32.mrf.mxu0 }
 0x323   : > { %v2835_v42 = vadd.f32 %v2834_v22, %v6553_v14  ;;  %v2977_v17 = vpop.f32.mrf.mxu1 }
 0x324   : > { %v2978_v29 = vadd.f32 %v2977_v17, %v2813_v59  ;;  %v2843_v20 = vpop.f32.mrf.mxu0 }
 0x325   : > { %v2844_v63 = vadd.f32 %v2843_v20, %v6557_v40  ;;  %v2982_v41 = vpop.f32.mrf.mxu1 }
 0x326   : > { %v6613_v52 = vadd.f32 %v2982_v41, %v2822_v7  ;;  %v2845_v0 = vpop.f32.mrf.mxu0 }
 0x327   : > { %v2846_v61 = vadd.f32 %v2845_v0, %v6563_v9  ;;  %v2984_v16 = vpop.f32.mrf.mxu1 }
 0x328   : > { %v6616_v58 = vadd.f32 %v2984_v16, %v2824_v12  ;;  %v2854_v35 = vpop.f32.mrf.mxu0 }
 0x329   : > { %v2855_v28 = vadd.f32 %v2854_v35, %v6567_v36  ;;  %v2989_v8 = vpop.f32.mrf.mxu1 }
 0x32a   : > { %v6619_v37 = vadd.f32 %v2989_v8, %v2833_v46  ;;  %v2856_v5 = vpop.f32.mrf.mxu0 }
 0x32b   : > { %v2857_v30 = vadd.f32 %v2856_v5, %v6572_v38  ;;  %v2991_v10 = vpop.f32.mrf.mxu1 }
 0x32c   : > { %v6622_v14 = vadd.f32 %v2991_v10, %v2835_v42  ;;  %v2865_v49 = vpop.f32.mrf.mxu0  ;;  %v3630_v10 = vld [vmem:[%s7262_s7] sm:$0xff] }
 0x32d   : > { %v2866_v51 = vadd.f32 %v2865_v49, %v6575_v44  ;;  %v2996_v33 = vpop.f32.mrf.mxu1 }
 0x32e   : > { %v6625_v40 = vadd.f32 %v2996_v33, %v2844_v63  ;;  %v6627_v34 = vpop.f32.mrf.mxu0 }
 0x32f   : > { %v2998_v32 = vpop.f32.mrf.mxu1 }
 0x330   : > { %v6629_v43 = vadd.f32 %v2998_v32, %v2846_v61  ;;  %v6631_v9 = vpop.f32.mrf.mxu0  ;;  %v3659_v32 = vsel %vm1133_vm6, %v3630_v10, 0 }
 0x331   : > { %v3003_v24 = vpop.f32.mrf.mxu1 }
 0x332   : > { %v6633_v2 = vadd.f32 %v3003_v24, %v2855_v28  ;;  %v6635_v60 = vpop.f32.mrf.mxu0  ;;  %v6701_v24 = vpop.permute.xlu1 %3595 }
 0x333   : > { %v3005_v36 = vpop.f32.mrf.mxu1  ;;  %7348 = vst [vmem:[#allocation6_spill] sm:$0xff] %v6701_v24 }
 0x334   : > { %v6637_v50 = vadd.f32 %v3005_v36, %v2857_v30  ;;  %v3098_v38 = vpop.f32.mrf.mxu0 }
 0x335   : > { %v3010_v18 = vpop.f32.mrf.mxu1  ;;  %v3099_v44 = vadd.f32 %v3098_v38, %v2969_v53 }
 0x336   : > { %v6639_v11 = vadd.f32 %v3010_v18, %v2866_v51  ;;  %v3100_v26 = vpop.f32.mrf.mxu0 }
 0x337   : > { %v6641_v45 = vpop.f32.mrf.mxu1  ;;  %v3101_v21 = vadd.f32 %v3100_v26, %v2971_v4 }
 0x338   : > { %v3106_v15 = vpop.f32.mrf.mxu0 }
 0x339   : > { %v6643_v57 = vpop.f32.mrf.mxu1  ;;  %v3107_v39 = vadd.f32 %v3106_v15, %v2976_v6 }
 0x33a   : > { %v3108_v25 = vpop.f32.mrf.mxu0 }
 0x33b   : > { %v6645_v31 = vpop.f32.mrf.mxu1  ;;  %v3109_v59 = vadd.f32 %v3108_v25, %v2978_v29  ;;  %v6720_v25 = vpop.permute.xlu1 %3585 }
 0x33c   : > { %v6647_v1 = vpop.f32.mrf.mxu0  ;;  %7351 = vst [vmem:[#allocation9_spill] sm:$0xff] %v6720_v25  ;;  %v2574_v25 = vadd.f32 %v6600_v62, %v6509_v48 }
 0x33d   : > { %v3232_v47 = vpop.f32.mrf.mxu1 }
 0x33e   : > { %v6649_v7 = vadd.f32 %v3232_v47, %v3099_v44  ;;  %v6651_v53 = vpop.f32.mrf.mxu0  ;;  %v6709_v44 = vand.u32 4294901760, %v3659_v32  ;;  %v2697_v62 = vadd.f32 %v6605_v3, %v2574_v25 }
 0x33f   : > { %v3234_v55 = vpop.f32.mrf.mxu1 }
 0x340   : > { %v6653_v19 = vadd.f32 %v3234_v55, %v3101_v21  ;;  %v6655_v12 = vpop.f32.mrf.mxu0  ;;  %7349 = vst [vmem:[#allocation7_spill] sm:$0xff] %v6709_v44  ;;  %v6725_v47 = vsub.f32 %v3659_v32, %v6709_v44  ;;  %v6741_v32 = vpop.permute.xlu1 %3580 }
 0x341   : > { %v3241_v4 = vpop.f32.mrf.mxu1  ;;  %7359 = vst [vmem:[#allocation17_spill] sm:$0xff] %v6741_v32 }
 0x342   : > { %v6657_v54 = vadd.f32 %v3241_v4, %v3107_v39  ;;  %v6659_v46 = vpop.f32.mrf.mxu0  ;;  %v3631_v39 = vld [vmem:[%s7262_s7 + $0x8] sm:$0xff]  ;;  %7353 = vst [vmem:[#allocation11_spill] sm:$0xff] %v6725_v47  ;;  %v7304_v24 = vand.u32 4294901760, %v6725_v47 }
 0x343   : > { %v3243_v23 = vpop.f32.mrf.mxu1 }
 0x344   : > { %v6661_v6 = vadd.f32 %v3243_v23, %v3109_v59  ;;  %v6663_v22 = vpop.f32.mrf.mxu0  ;;  %v3662_v23 = vsel %vm1133_vm6, %v3631_v39, 0  ;;  %v3632_v39 = vld [vmem:[%s7262_s7 + $0x10] sm:$0xff] }
 0x345   : > { %v6665_v42 = vpop.f32.mrf.mxu1 }
 0x346   : > { %7347 = vst [vmem:[#allocation5_spill] sm:$0xff] %v6661_v6  ;;  %v6667_v17 = vpop.f32.mrf.mxu0  ;;  %v6737_v6 = vand.u32 4294901760, %v3662_v23 }
 0x347   : > { %v6669_v29 = vpop.f32.mrf.mxu1 }
 0x348   : > { %v6671_v20 = vpop.f32.mrf.mxu0  ;;  %7358 = vst [vmem:[#allocation16_spill] sm:$0xff] %v6737_v6  ;;  %v6760_v48 = vsub.f32 %v3662_v23, %v6737_v6  ;;  %v6775_v23 = vpop.permute.xlu1 %3570 }
 0x349   : > { %v6673_v63 = vpop.f32.mrf.mxu1 }
 0x34a   : > { %v6675_v41 = vpop.f32.mrf.mxu0 }
 0x34b   : > { %v6677_v0 = vpop.f32.mrf.mxu1 }
 0x34c   : > { %v6679_v61 = vpop.f32.mrf.mxu0 }
 0x34d   : > { %v6681_v16 = vpop.f32.mrf.mxu1 }
 0x34e   : > { %v6683_v35 = vpop.f32.mrf.mxu0 }
 0x34f   : > { %v6685_v28 = vpop.f32.mrf.mxu1 }
 0x350   : > { %v6687_v8 = vpop.f32.mrf.mxu0 }
 0x351   : > { %v6689_v5 = vpop.f32.mrf.mxu1 }
 0x352   : > { %v6691_v30 = vpop.f32.mrf.mxu0 }
 0x353   : > { %v6696_v49 = vpop.f32.mrf.mxu1 }
 0x354   : > { %v3379_v51 = vpop.f32.mrf.mxu0 }
 0x355   : > { %v6698_v33 = vpop.f32.mrf.mxu1  ;;  %v3380_v3 = vadd.f32 %v3379_v51, %v6649_v7  ;;  %v3147_v7 = vadd.f32 %v6679_v61, %v6639_v11 }
 0x356   : > { %v6703_v36 = vpop.f32.mrf.mxu0 }
 0x357   : > { %v6705_v38 = vpop.f32.mrf.mxu1 }
 0x358   : > { %v6707_v18 = vpop.f32.mrf.mxu0 }
 0x359   : > { %v6711_v26 = vpop.f32.mrf.mxu1 }
 0x35a   : > { %v6713_v21 = vpop.f32.mrf.mxu0 }
 0x35b   : > { %7350 = vst [vmem:[#allocation8_spill] sm:$0xff] %v6713_v21  ;;  %v6715_v15 = vpop.f32.mrf.mxu1 }
 0x35c   : > { %v6722_v59 = vpop.f32.mrf.mxu0 }
 0x35d   : > { %7352 = vst [vmem:[#allocation10_spill] sm:$0xff] %v6722_v59  ;;  %v3504_v55 = vpop.f32.mrf.mxu1 }
 0x35e   : > { %v6727_v4 = vpop.f32.mrf.mxu0 }
 0x35f   : > { %7354 = vst [vmem:[#allocation12_spill] sm:$0xff] %v6727_v4  ;;  %v6730_v10 = vpop.f32.mrf.mxu1 }
 0x360   : > { %7355 = vst [vmem:[#allocation13_spill] sm:$0xff] %v6730_v10  ;;  %v6732_v13 = vpop.f32.mrf.mxu0 }
 0x361   : > { %7356 = vst [vmem:[#allocation14_spill] sm:$0xff] %v6732_v13  ;;  %v6735_v21 = vpop.f32.mrf.mxu1 }
 0x362   : > { %7357 = vst [vmem:[#allocation15_spill] sm:$0xff] %v6735_v21  ;;  %v6743_v44 = vpop.f32.mrf.mxu0  ;;  %v6755_v21 = vsub.f32 %v6725_v47, %v7304_v24  ;;  %v2877_v24 = vadd.f32 %v6631_v9, %v6583_v27  ;;  %v2879_v47 = vadd.f32 %v6635_v60, %v2697_v62  ;;  %v3117_v60 = vadd.f32 %v6651_v53, %v6616_v58 }
 0x363   : > { %7360 = vst [vmem:[#allocation18_spill] sm:$0xff] %v6743_v44  ;;  %v6745_v4 = vpop.f32.mrf.mxu1  ;;  %v2868_v44 = vadd.f32 %v6627_v34, %v6580_v56  ;;  %v7311_v34 = vand.u32 4294901760, %v6760_v48 }
 0x364   : > { %7361 = vst [vmem:[#allocation19_spill] sm:$0xff] %v6745_v4  ;;  %v6750_v13 = vpop.f32.mrf.mxu0  ;;  %v6764_v4 = vsel %vm1133_vm6, %v3632_v39, 0  ;;  %v3115_v39 = vadd.f32 %v6647_v1, %v6613_v52  ;;  %v3018_v27 = vadd.f32 %v6643_v57, %v2877_v24  ;;  %v3020_v9 = vadd.f32 %v6645_v31, %v2879_v47  ;;  %v7365_v24 = vld [vmem:[#allocation8_spill] sm:$0xff] }
 0x365   : > { %7362 = vst [vmem:[#allocation20_spill] sm:$0xff] %v6750_v13  ;;  %v6757_v10 = vpop.f32.mrf.mxu1  ;;  %v6768_v13 = vpop.permute.xlu0 %3590  ;;  %v3013_v25 = vadd.f32 %v6641_v45, %v2868_v44  ;;  %v3123_v45 = vadd.f32 %v6655_v12, %v6619_v37  ;;  %v3125_v52 = vadd.f32 %v6659_v46, %v6622_v14  ;;  %v3131_v1 = vadd.f32 %v6663_v22, %v6625_v40 }
 0x366   : > { %7363 = vst [vmem:[#allocation21_spill] sm:$0xff] %v6757_v10  ;;  %v3409_v32 = vpop.f32.mrf.mxu0  ;;  %v6785_v10 = vand.u32 4294901760, %v6764_v4  ;;  %v3251_v62 = vadd.f32 %v6665_v42, %v3115_v39  ;;  %v3133_v31 = vadd.f32 %v6667_v17, %v6629_v43  ;;  %v3253_v58 = vadd.f32 %v6669_v29, %v3117_v60 }
 0x367   : > { %v6770_v59 = vpop.f32.mrf.mxu1  ;;  %v3139_v37 = vadd.f32 %v6671_v20, %v6633_v2  ;;  %v3260_v53 = vadd.f32 %v6673_v63, %v3123_v45  ;;  %v3141_v14 = vadd.f32 %v6675_v41, %v6637_v50  ;;  %v3262_v40 = vadd.f32 %v6677_v0, %v3125_v52  ;;  %v3561_v20 = vpop.permute.xlu1 %3560 }
 0x368   : > { %v3414_v6 = vpop.f32.mrf.mxu0  ;;  %v3505_v46 = vadd.f32 %v3504_v55, %v3380_v3  ;;  %v3269_v42 = vadd.f32 %v6681_v16, %v3131_v1  ;;  %v3149_v17 = vadd.f32 %v6683_v35, %v3013_v25  ;;  %v3271_v2 = vadd.f32 %v6685_v28, %v3133_v31  ;;  %v7366_v55 = vld [vmem:[#allocation10_spill] sm:$0xff]  ;;  %v7371_v1 = vld [vmem:[#allocation12_spill] sm:$0xff] }
 0x369   : > { %v6781_v56 = vpop.f32.mrf.mxu1  ;;  %v6810_v22 = vpop.permute.xlu0 %3575  ;;  %v3155_v29 = vadd.f32 %v6687_v8, %v3018_v27  ;;  %v3278_v50 = vadd.f32 %v6689_v5, %v3139_v37  ;;  %v3157_v41 = vadd.f32 %v6691_v30, %v3020_v9  ;;  %v3280_v11 = vadd.f32 %v6696_v49, %v3141_v14  ;;  %v7364_v5 = vld [vmem:[#allocation5_spill] sm:$0xff]  ;;  %v7368_v39 = vld [vmem:[#allocation15_spill] sm:$0xff] }
 0x36a   : > { %v3416_v44 = vpop.f32.mrf.mxu0  ;;  %v3287_v0 = vadd.f32 %v6698_v33, %v3147_v7  ;;  %v3289_v51 = vadd.f32 %v6705_v38, %v3149_v17  ;;  %v3382_v16 = vadd.f32 %v6703_v36, %v6653_v19  ;;  %v3387_v28 = vadd.f32 %v6707_v18, %v6657_v54  ;;  %v7367_v38 = vld [vmem:[#allocation13_spill] sm:$0xff]  ;;  %v7369_v9 = vld [vmem:[#allocation18_spill] sm:$0xff] }
 0x36b   : > { %v3527_v57 = vpop.f32.mrf.mxu1  ;;  %v3296_v35 = vadd.f32 %v6711_v26, %v3155_v29  ;;  %v3298_v8 = vadd.f32 %v6715_v15, %v3157_v41  ;;  %v3389_v30 = vadd.f32 %v7365_v24, %v7364_v5  ;;  %v6829_v47 = vadd.f32 %v3561_v20, %v3505_v46 }
 0x36c   : > { %v3421_v12 = vpop.f32.mrf.mxu0  ;;  %v3415_v49 = vadd.f32 %v3414_v6, %v3278_v50  ;;  %v3394_v3 = vadd.f32 %v7366_v55, %v3251_v62  ;;  %v3507_v25 = vadd.f32 %v7367_v38, %v3382_v16  ;;  %v3512_v19 = vadd.f32 %v7368_v39, %v3387_v28  ;;  %v7370_v18 = vld [vmem:[#allocation20_spill] sm:$0xff]  ;;  %v7372_v6 = vld [vmem:[#allocation14_spill] sm:$0xff]  ;;  %v7376_v38 = vld [vmem:[#allocation19_spill] sm:$0xff] }
 0x36d   : > { %v3532_v43 = vpop.f32.mrf.mxu1  ;;  %v3410_v36 = vadd.f32 %v3409_v32, %v3271_v2  ;;  %v3566_v27 = vpop.permute.xlu0 %3565  ;;  %v3403_v54 = vadd.f32 %v7369_v9, %v3262_v40  ;;  %v3408_v15 = vadd.f32 %v7370_v18, %v3269_v42  ;;  %v3417_v60 = vadd.f32 %v3416_v44, %v3280_v11  ;;  %v7375_v28 = vld [vmem:[#allocation21_spill] sm:$0xff]  ;;  %v7377_v9 = vld [vmem:[#allocation6_spill] sm:$0xff] }
 0x36e   : > { %v3423_v63 = vpop.f32.mrf.mxu0  ;;  %v3396_v31 = vadd.f32 %v7371_v1, %v3253_v58  ;;  %v3401_v37 = vadd.f32 %v7372_v6, %v3260_v53  ;;  %v3422_v14 = vadd.f32 %v3421_v12, %v3287_v0  ;;  %v3614_v7 = vmax.f32 %v6829_v47, 0.0  ;;  %v7373_v53 = vld [vmem:[#allocation9_spill] sm:$0xff] }
 0x36f   : > { %v3534_v61 = vpop.f32.mrf.mxu1  ;;  %v3528_v46 = vadd.f32 %v3527_v57, %v3403_v54  ;;  %v3533_v17 = vadd.f32 %v3532_v43, %v3408_v15  ;;  %v6839_v29 = vadd.f32 %v3561_v20, %v3507_v25  ;;  %v6841_v40 = vadd.f32 %v3566_v27, %v3512_v19  ;;  %v7374_v57 = vld [vmem:[#allocation17_spill] sm:$0xff] }
 0x370   : > { %v3428_v26 = vpop.f32.mrf.mxu0  ;;  %v3535_v62 = vadd.f32 %v3534_v61, %v3410_v36  ;;  %v3424_v42 = vadd.f32 %v3423_v63, %v3289_v51  ;;  %v3521_v41 = vadd.f32 %v6770_v59, %v3396_v31  ;;  %v3526_v58 = vadd.f32 %v6781_v56, %v3401_v37 }
 0x371   : > { %v3539_v33 = vpop.f32.mrf.mxu1  ;;  %v3429_v61 = vadd.f32 %v3428_v26, %v3296_v35  ;;  %v3519_v5 = vadd.f32 %v7375_v28, %v3394_v3  ;;  %v3605_v63 = vadd.f32 %v6810_v22, %v3528_v46  ;;  %v3606_v51 = vadd.f32 %v7374_v57, %v3533_v17 }
 0x372   : > { %v3540_v45 = vadd.f32 %v3539_v33, %v3415_v49  ;;  %v3430_v44 = vpop.f32.mrf.mxu0  ;;  %v3607_v43 = vadd.f32 %v7374_v57, %v3535_v62  ;;  %v3514_v25 = vadd.f32 %v7376_v38, %v3389_v30  ;;  %v3603_v35 = vadd.f32 %v6775_v23, %v3521_v41 }
 0x373   : > { %v3541_v52 = vpop.f32.mrf.mxu1  ;;  %v3431_v59 = vadd.f32 %v3430_v44, %v3298_v8  ;;  %v3604_v39 = vadd.f32 %v6810_v22, %v3526_v58  ;;  %v3602_v8 = vadd.f32 %v6775_v23, %v3519_v5  ;;  %v3621_v15 = vmax.f32 %v3605_v63, 0.0 }
 0x374   : > { %v3542_v32 = vadd.f32 %v3541_v52, %v3417_v60  ;;  %v3608_v12 = vadd.f32 %v7373_v53, %v3540_v45  ;;  %v3623_v3 = vmax.f32 %v3607_v43, 0.0  ;;  %v3622_v60 = vmax.f32 %v3606_v51, 0.0 }
 0x375   : > { %v3546_v2 = vpop.f32.mrf.mxu1  ;;  %v3601_v1 = vadd.f32 %v3566_v27, %v3514_v25  ;;  %v3619_v31 = vmax.f32 %v3603_v35, 0.0  ;;  %v3620_v6 = vmax.f32 %v3604_v39, 0.0  ;;  %v3616_v17 = vmax.f32 %v6841_v40, 0.0 }
 0x376   : > { %v3547_v50 = vadd.f32 %v3546_v2, %v3422_v14  ;;  %v3609_v11 = vadd.f32 %v7373_v53, %v3542_v32  ;;  %v3624_v19 = vmax.f32 %v3608_v12, 0.0  ;;  %v6867_v14 = vand.u32 4294901760, %v3623_v3 }
 0x377   : > { %v3548_v0 = vpop.f32.mrf.mxu1  ;;  %v3618_v32 = vmax.f32 %v3602_v8, 0.0  ;;  %v6875_v2 = vand.u32 4294901760, %v3622_v60  ;;  %v6880_v27 = vand.u32 4294901760, %v3621_v15  ;;  %v3617_v58 = vmax.f32 %v3601_v1, 0.0 }
 0x378   : > { %v3610_v20 = vadd.f32 %v6768_v13, %v3547_v50  ;;  %v3549_v16 = vadd.f32 %v3548_v0, %v3424_v42  ;;  %v3625_v56 = vmax.f32 %v3609_v11, 0.0  ;;  %v6865_v37 = vand.u32 4294901760, %v3624_v19 }
 0x379   : > { %v3553_v24 = vpop.f32.mrf.mxu1  ;;  %v6890_v53 = vand.u32 4294901760, %v3619_v31  ;;  %v6892_v40 = vand.u32 4294901760, %v3620_v6  ;;  %v6898_v11 = vsub.f32 %v3623_v3, %v6867_v14  ;;  %v6914_v5 = vand.u32 4294901760, %v3618_v32 }
 0x37a   : > { %v3626_v49 = vmax.f32 %v3610_v20, 0.0  ;;  %v3611_v33 = vadd.f32 %v6768_v13, %v3549_v16  ;;  %v3554_v55 = vadd.f32 %v3553_v24, %v3429_v61  ;;  %v6860_v13 = vand.u32 4294901760, %v3625_v56 }
 0x37b   : > { %v3555_v36 = vpop.f32.mrf.mxu1  ;;  %v6895_v12 = vsub.f32 %v3624_v19, %v6865_v37  ;;  %v3615_v61 = vmax.f32 %v6839_v29, 0.0  ;;  %v6907_v20 = vand.u32 4294901760, %v3616_v17  ;;  %v6910_v16 = vsub.f32 %v3622_v60, %v6875_v2 }
 0x37c   : > { %v3627_v26 = vmax.f32 %v3611_v33, 0.0  ;;  %v3612_v54 = vadd.f32 %v7377_v9, %v3554_v55  ;;  %v3556_v18 = vadd.f32 %v3555_v36, %v3431_v59  ;;  %v6858_v45 = vand.u32 4294901760, %v3626_v49 }
 0x37d   : > { %v6883_v44 = vsub.f32 %v3625_v56, %v6860_v13  ;;  %v6917_v63 = vsub.f32 %v3621_v15, %v6880_v27  ;;  %v6922_v59 = vand.u32 4294901760, %v3617_v58  ;;  %v6925_v24 = vsub.f32 %v3620_v6, %v6892_v40 }
 0x37e   : > { %v6862_v30 = vand.u32 4294901760, %v3627_v26  ;;  %v3628_v52 = vmax.f32 %v3612_v54, 0.0  ;;  %v3613_v22 = vadd.f32 %v7377_v9, %v3556_v18  ;;  %v6878_v42 = vsub.f32 %v3626_v49, %v6858_v45  ;;  %v3633_v18 = vld [vmem:[%s7262_s7 + $0x18] sm:$0xff] }
 0x37f   : > { %v3837_v29 = vand.u32 4294901760, %v6883_v44  ;;  %v3843_v56 = vand.u32 4294901760, %v6895_v12  ;;  %v6933_v33 = vsub.f32 %v3619_v31, %v6890_v53  ;;  %v3849_v25 = vand.u32 4294901760, %v6898_v11 }
 0x380   : > { %v6870_v23 = vsub.f32 %v3627_v26, %v6862_v30  ;;  %v6872_v62 = vand.u32 4294901760, %v3628_v52  ;;  %v3629_v46 = vmax.f32 %v3613_v22, 0.0  ;;  %v3831_v28 = vand.u32 4294901760, %v6878_v42 }
 0x381   : > { %v6945_v35 = vand.u32 4294901760, %v3614_v7  ;;  %v6947_v39 = vand.u32 4294901760, %v3615_v61  ;;  %v3855_v19 = vand.u32 4294901760, %v6910_v16  ;;  %v6955_v3 = vsub.f32 %v3618_v32, %v6914_v5 }
 0x382   : > { %v6886_v50 = vsub.f32 %v3628_v52, %v6872_v62  ;;  %v6888_v41 = vand.u32 4294901760, %v3629_v46  ;;  %v3825_v43 = vand.u32 4294901760, %v6870_v23  ;;  %v3832_v36 = vsub.f32 %v6878_v42, %v3831_v28 }
 0x383   : > { %v3838_v9 = vsub.f32 %v6883_v44, %v3837_v29  ;;  %v3861_v54 = vand.u32 4294901760, %v6917_v63  ;;  %v6966_v8 = vsub.f32 %v3617_v58, %v6922_v59  ;;  %v7310_v15 = vand.u32 4294901760, %v6925_v24 }
 0x384   : > { %v3819_v0 = vand.u32 4294901760, %v6886_v50  ;;  %v6902_v57 = vsub.f32 %v3629_v46, %v6888_v41  ;;  %3687 = vmatprep.subr.mxu0 %v6888_v41  ;;  %v3826_v38 = vsub.f32 %v6870_v23, %v3825_v43  ;;  %v3844_v52 = vsub.f32 %v6895_v12, %v3843_v56 }
 0x385   : > { %3689 = vmatpush1.msra.mxu0 %v6872_v62  ;;  %v6974_v22 = vsub.f32 %v3616_v17, %v6907_v20  ;;  %v3850_v31 = vsub.f32 %v6898_v11, %v3849_v25  ;;  %v7309_v6 = vand.u32 4294901760, %v6933_v33  ;;  %v6982_v46 = vsub.f32 %v3615_v61, %v6947_v39 }
 0x386   : > { %3691 = vmatprep.subr.mxu0 %v6862_v30  ;;  %v3813_v51 = vand.u32 4294901760, %v6902_v57  ;;  %v3820_v49 = vsub.f32 %v6886_v50, %v3819_v0  ;;  %v3827_v1 = vand.u32 4294901760, %v3826_v38  ;;  %v3833_v32 = vand.u32 4294901760, %v3832_v36 }
 0x387   : > { %3693 = vmatpush1.msra.mxu0 %v6858_v45  ;;  %v3856_v17 = vsub.f32 %v6910_v16, %v3855_v19  ;;  %v3668_v58 = vsel %vm1133_vm6, %v3633_v18, 0  ;;  %v3862_v61 = vsub.f32 %v6917_v63, %v3861_v54  ;;  %v6996_v38 = vsub.f32 %v6764_v4, %v6785_v10 }
 0x388   : > { %3695 = vmatprep.subr.mxu0 %v6860_v13  ;;  %v3814_v55 = vsub.f32 %v6902_v57, %v3813_v51  ;;  %v3821_v60 = vand.u32 4294901760, %v3820_v49  ;;  %v7312_v49 = vand.u32 4294901760, %v6955_v3  ;;  %v7001_v36 = vsub.f32 %v3614_v7, %v6945_v35 }
 0x389   : > { %3697 = vmatpush1.msra.mxu0 %v6865_v37  ;;  %v3885_v18 = vand.u32 4294901760, %v6966_v8  ;;  %v3851_v4 = vand.u32 4294901760, %v3850_v31  ;;  %v3874_v47 = vsub.f32 %v6933_v33, %v7309_v6  ;;  %v7013_v7 = vand.u32 4294901760, %v3668_v58 }
 0x38a   : > { %3699 = vmatprep.subr.mxu0 %v6867_v14  ;;  %v3815_v26 = vand.u32 4294901760, %v3814_v55  ;;  %v3839_v55 = vand.u32 4294901760, %v3838_v9  ;;  %v3868_v9 = vsub.f32 %v6925_v24, %v7310_v15  ;;  %v3863_v31 = vand.u32 4294901760, %v3862_v61 }
 0x38b   : > { %3701 = vmatpush1.msra.mxu0 %v6875_v2  ;;  %v3775_v6 = vand.u32 4294901760, %v6996_v38  ;;  %v3903_v15 = vand.u32 4294901760, %v7001_v36  ;;  %v3875_v61 = vand.u32 4294901760, %v3874_v47 }
 0x38c   : > { %3703 = vmatprep.subr.mxu0 %v6880_v27  ;;  %3816 = vmatprep.subr.mxu1 %v3815_v26  ;;  %v3845_v26 = vand.u32 4294901760, %v3844_v52  ;;  %v3857_v52 = vand.u32 4294901760, %v3856_v17  ;;  %v3869_v17 = vand.u32 4294901760, %v3868_v9 }
 0x38d   : > { %3705 = vmatpush1.msra.mxu0 %v6892_v40  ;;  %3822 = vmatpush1.msra.mxu1 %v3821_v60  ;;  %v3891_v60 = vand.u32 4294901760, %v6974_v22 }
 0x38e   : > { %3707 = vmatprep.subr.mxu0 %v6890_v53  ;;  %3828 = vmatprep.subr.mxu1 %v3827_v1  ;;  %v3765_v1 = vsub.f32 %v6760_v48, %v7311_v34  ;;  %v7378_v34 = vand.u32 4294901760, %v6755_v21 }
 0x38f   : > { %3709 = vmatpush1.msra.mxu0 %v6914_v5  ;;  %3834 = vmatpush1.msra.mxu1 %v3833_v32  ;;  %v3897_v32 = vand.u32 4294901760, %v6982_v46 }
 0x390   : > { %3711 = vmatprep.subr.mxu0 %v6922_v59  ;;  %3840 = vmatprep.subr.mxu1 %v3839_v55  ;;  %v3880_v55 = vsub.f32 %v6955_v3, %v7312_v49  ;;  %v7036_v49 = vsub.f32 %v3668_v58, %v7013_v7  ;;  %v3766_v9 = vand.u32 4294901760, %v3765_v1  ;;  %v7379_v58 = vmov 0.0  }
 0x391   : > { %3713 = vmatpush1.msra.mxu0 %v6907_v20  ;;  %3846 = vmatpush1.msra.mxu1 %v3845_v26  ;;  %v3886_v26 = vsub.f32 %v6966_v8, %v3885_v18  ;;  %v3904_v1 = vsub.f32 %v7001_v36, %v3903_v15 }
 0x392   : > { %3715 = vmatprep.subr.mxu0 %v6947_v39  ;;  %3852 = vmatprep.subr.mxu1 %v3851_v4  ;;  %v3892_v4 = vsub.f32 %v6974_v22, %v3891_v60  ;;  %v3881_v21 = vand.u32 4294901760, %v3880_v55 }
 0x393   : > { %3717 = vmatpush1.msra.mxu0 %v6945_v35  ;;  %3858 = vmatpush1.msra.mxu1 %v3857_v52  ;;  %v3898_v52 = vsub.f32 %v6982_v46, %v3897_v32  ;;  %v3887_v47 = vand.u32 4294901760, %v3886_v26  ;;  %v3905_v26 = vand.u32 4294901760, %v3904_v1 }
 0x394   : > { %3756 = vmatmul.mubr.f32.vlgmr.msra.gmra.mxu0 %v7378_v34  ;;  %3864 = vmatprep.subr.mxu1 %v3863_v31  ;;  %v3776_v34 = vsub.f32 %v6996_v38, %v3775_v6  ;;  %v3893_v31 = vand.u32 4294901760, %v3892_v4 }
 0x395   : > { %3986 = vmatprep.subr.mxu0 %v6902_v57  ;;  %3870 = vmatpush1.msra.mxu1 %v3869_v17  ;;  %v3786_v17 = vand.u32 4294901760, %v7036_v49  ;;  %v3899_v55 = vand.u32 4294901760, %v3898_v52 }
 0x396   : > { %3989 = vmatpush1.msra.mxu0 %v6886_v50  ;;  %3876 = vmatprep.subr.mxu1 %v3875_v61  ;;  %v3777_v61 = vand.u32 4294901760, %v3776_v34  ;;  %v7382_v34 = vld [vmem:[#allocation11_spill] sm:$0xff]  ;;  %v7386_v50 = vand.u32 4294901760, %v6955_v3 }
 0x397   : > { %3992 = vmatprep.subr.mxu0 %v6870_v23  ;;  %3761 = vmatprep.mubr.f32.mxu0 %v7379_v58  ;;  %v3787_v4 = vsub.f32 %v7036_v49, %v3786_v17  ;;  %v7383_v23 = vand.u32 4294901760, %v7382_v34 }
 0x398   : > { %3882 = vmatpush1.msra.mxu1 %v3881_v21  ;;  %3995 = vmatpush1.msra.mxu0 %v6878_v42  ;;  %v7381_v21 = vld [vmem:[#allocation16_spill] sm:$0xff]  ;;  %v7384_v42 = vand.u32 4294901760, %v6925_v24 }
 0x399   : > { %3767 = vmatmul.mubr.f32.gmra.mxu0 %v3766_v9  ;;  %3888 = vmatprep.subr.mxu1 %v3887_v47  ;;  %v7380_v9 = vld [vmem:[#allocation7_spill] sm:$0xff]  ;;  %v3788_v52 = vand.u32 4294901760, %v3787_v4 }
 0x39a   : > { %3998 = vmatprep.subr.mxu0 %v6883_v44  ;;  %3894 = vmatpush1.msra.mxu1 %v3893_v31  ;;  %v7385_v44 = vand.u32 4294901760, %v6933_v33 }
 0x39b   : > { %4001 = vmatpush1.msra.mxu0 %v6895_v12  ;;  %3900 = vmatprep.subr.mxu1 %v3899_v55 }
 0x39c   : > { %4004 = vmatprep.subr.mxu0 %v6898_v11  ;;  %3772 = vmatprep.mubr.f32.mxu0 %v7379_v58 }
 0x39d   : > { %3906 = vmatpush1.msra.mxu1 %v3905_v26  ;;  %4007 = vmatpush1.msra.mxu0 %v6910_v16 }
 0x39e   : > { %3778 = vmatmul.mubr.f32.gmra.mxu0 %v3777_v61  ;;  %3941 = vmatmul.mubr.f32.vlgmr.msra.gmra.mxu1 %v7380_v9 }
 0x39f   : > { %4010 = vmatprep.subr.mxu0 %v6917_v63  ;;  %4114 = vmatprep.subr.mxu1 %v6888_v41 }
 0x3a0   : > { %4013 = vmatpush1.msra.mxu0 %v6925_v24  ;;  %4116 = vmatpush1.msra.mxu1 %v6872_v62 }
 0x3a1   : > { %4016 = vmatprep.subr.mxu0 %v6933_v33  ;;  %4118 = vmatprep.subr.mxu1 %v6862_v30 }
 0x3a2   : > { %3783 = vmatprep.mubr.f32.mxu0 %v7379_v58  ;;  %3946 = vmatprep.mubr.f32.mxu1 %v7379_v58 }
 0x3a3   : > { %4019 = vmatpush1.msra.mxu0 %v6955_v3  ;;  %4120 = vmatpush1.msra.mxu1 %v6858_v45 }
 0x3a4   : > { %3789 = vmatmul.mubr.f32.gmra.mxu0 %v3788_v52  ;;  %3948 = vmatmul.mubr.f32.gmra.mxu1 %v7381_v21 }
 0x3a5   : > { %4022 = vmatprep.subr.mxu0 %v6966_v8  ;;  %4122 = vmatprep.subr.mxu1 %v6860_v13 }
 0x3a6   : > { %4025 = vmatpush1.msra.mxu0 %v6974_v22  ;;  %4124 = vmatpush1.msra.mxu1 %v6865_v37  ;;  %v3646_v22 = vpop.permute.xlu1 %3645 }
 0x3a7   : > { %4028 = vmatprep.subr.mxu0 %v6982_v46  ;;  %4126 = vmatprep.subr.mxu1 %v6867_v14 }
 0x3a8   : > { %3953 = vmatprep.mubr.f32.mxu1 %v7379_v58  ;;  %4031 = vmatpush1.msra.mxu0 %v7001_v36 }
 0x3a9   : > { %4064 = vmatprep.mubr.f32.mxu0 %v7379_v58  ;;  %4128 = vmatpush1.msra.mxu1 %v6875_v2 }
 0x3aa   : > { %3955 = vmatmul.mubr.f32.gmra.mxu1 %v6785_v10  ;;  %4067 = vmatmul.mubr.f32.vlgmr.msra.gmra.mxu0 %v7382_v34  ;;  %v3656_v34 = vpop.permute.xlu1 %3655 }
 0x3ab   : > { %4130 = vmatprep.subr.mxu1 %v6880_v27  ;;  %4233 = vmatprep.subr.mxu0 %v3813_v51 }
 0x3ac   : > { %4132 = vmatpush1.msra.mxu1 %v6892_v40  ;;  %4237 = vmatpush1.msra.mxu0 %v3819_v0 }
 0x3ad   : > { %4134 = vmatprep.subr.mxu1 %v6890_v53  ;;  %4241 = vmatprep.subr.mxu0 %v3825_v43 }
 0x3ae   : > { %3960 = vmatprep.mubr.f32.mxu1 %v7379_v58  ;;  %4072 = vmatprep.mubr.f32.mxu0 %v7379_v58 }
 0x3af   : > { %4136 = vmatpush1.msra.mxu1 %v6914_v5  ;;  %4245 = vmatpush1.msra.mxu0 %v3831_v28 }
 0x3b0   : > { %3962 = vmatmul.mubr.f32.gmra.mxu1 %v7013_v7  ;;  %4075 = vmatmul.mubr.f32.gmra.mxu0 %v6760_v48 }
 0x3b1   : > { %4138 = vmatprep.subr.mxu1 %v6922_v59  ;;  %4249 = vmatprep.subr.mxu0 %v3837_v29 }
 0x3b2   : > { %4140 = vmatpush1.msra.mxu1 %v6907_v20  ;;  %4253 = vmatpush1.msra.mxu0 %v3843_v56 }
 0x3b3   : > { %4142 = vmatprep.subr.mxu1 %v6947_v39  ;;  %4257 = vmatprep.subr.mxu0 %v3849_v25  ;;  %v3641_v25 = vpop.permute.xlu0 %3640 }
 0x3b4   : > { %4080 = vmatprep.mubr.f32.mxu0 %v7379_v58  ;;  %4144 = vmatpush1.msra.mxu1 %v6945_v35 }
 0x3b5   : > { %4177 = vmatprep.mubr.f32.mxu1 %v7379_v58  ;;  %4261 = vmatpush1.msra.mxu0 %v3855_v19 }
 0x3b6   : > { %4083 = vmatmul.mubr.f32.gmra.mxu0 %v6996_v38  ;;  %4181 = vmatmul.mubr.f32.vlgmr.msra.gmra.mxu1 %v7383_v23 }
 0x3b7   : > { %4265 = vmatprep.subr.mxu0 %v3861_v54  ;;  %4372 = vmatprep.subr.mxu1 %v6888_v41  ;;  %v7387_v41 = vand.u32 4294901760, %v6760_v48 }
 0x3b8   : > { %4269 = vmatpush1.msra.mxu0 %v7384_v42  ;;  %4374 = vmatpush1.msra.mxu1 %v6872_v62 }
 0x3b9   : > { %4273 = vmatprep.subr.mxu0 %v7385_v44  ;;  %4376 = vmatprep.subr.mxu1 %v6862_v30 }
 0x3ba   : > { %4088 = vmatprep.mubr.f32.mxu0 %v7379_v58  ;;  %4186 = vmatprep.mubr.f32.mxu1 %v7379_v58 }
 0x3bb   : > { %4277 = vmatpush1.msra.mxu0 %v7386_v50  ;;  %4378 = vmatpush1.msra.mxu1 %v6858_v45 }
 0x3bc   : > { %4091 = vmatmul.mubr.f32.gmra.mxu0 %v7036_v49  ;;  %4190 = vmatmul.mubr.f32.gmra.mxu1 %v7387_v41 }
 0x3bd   : > { %4281 = vmatprep.subr.mxu0 %v3885_v18  ;;  %4380 = vmatprep.subr.mxu1 %v6860_v13  ;;  %v3651_v18 = vpop.permute.xlu0 %3650 }
 0x3be   : > { %4285 = vmatpush1.msra.mxu0 %v3891_v60  ;;  %4382 = vmatpush1.msra.mxu1 %v6865_v37 }
 0x3bf   : > { %4289 = vmatprep.subr.mxu0 %v3897_v32  ;;  %4384 = vmatprep.subr.mxu1 %v6867_v14 }
 0x3c0   : > { %4195 = vmatprep.mubr.f32.mxu1 %v7379_v58  ;;  %4293 = vmatpush1.msra.mxu0 %v3903_v15 }
 0x3c1   : > { %4326 = vmatprep.mubr.f32.mxu0 %v7379_v58  ;;  %4386 = vmatpush1.msra.mxu1 %v6875_v2 }
 0x3c2   : > { %4199 = vmatmul.mubr.f32.gmra.mxu1 %v3775_v6  ;;  %4328 = vmatmul.mubr.f32.vlgmr.msra.gmra.mxu0 %v7380_v9 }
 0x3c3   : > { %4388 = vmatprep.subr.mxu1 %v6880_v27  ;;  %4204 = vmatprep.mubr.f32.mxu1 %v7379_v58 }
 0x3c4   : > { %4390 = vmatpush1.msra.mxu1 %v6892_v40  ;;  %4333 = vmatprep.mubr.f32.mxu0 %v7379_v58 }
 0x3c5   : > { %4392 = vmatprep.subr.mxu1 %v6890_v53 }
 0x3c6   : > { %4394 = vmatpush1.msra.mxu1 %v6914_v5  ;;  %4335 = vmatmul.mubr.f32.gmra.mxu0 %v7381_v21 }
 0x3c7   : > { %4208 = vmatmul.mubr.f32.gmra.mxu1 %v3786_v17  ;;  %4396 = vmatprep.subr.mxu1 %v6922_v59 }
 0x3c8   : > { %4398 = vmatpush1.msra.mxu1 %v6907_v20  ;;  %4340 = vmatprep.mubr.f32.mxu0 %v7379_v58 }
 0x3c9   : > { %4400 = vmatprep.subr.mxu1 %v6947_v39  ;;  %4435 = vmatprep.mubr.f32.mxu1 %v7379_v58 }
 0x3ca   : > { %4402 = vmatpush1.msra.mxu1 %v6945_v35  ;;  %4342 = vmatmul.mubr.f32.gmra.mxu0 %v6785_v10 }
 0x3cb   : > { %4437 = vmatmul.mubr.f32.vlgmr.msra.gmra.mxu1 %v7380_v9  ;;  %4347 = vmatprep.mubr.f32.mxu0 %v7379_v58 }
 0x3cc   : > { %4442 = vmatprep.mubr.f32.mxu1 %v7379_v58 }
 0x3ce   : > { %4349 = vmatmul.mubr.f32.gmra.mxu0 %v7013_v7 }
 0x3cf   : > { %4444 = vmatmul.mubr.f32.gmra.mxu1 %v7381_v21 }
 0x3d0   : > { %4449 = vmatprep.mubr.f32.mxu1 %v7379_v58 }
 0x3d3   : > { %4451 = vmatmul.mubr.f32.gmra.mxu1 %v6785_v10 }
 0x3d4   : > { %4456 = vmatprep.mubr.f32.mxu1 %v7379_v58 }
 0x3d7   : > { %4458 = vmatmul.mubr.f32.gmra.mxu1 %v7013_v7 }
 0x454   : > { %v3757_v48 = vpop.f32.mrf.mxu0 }
 0x455   : > { %v3758_v35 = vadd.f32 %v3757_v48, %v3641_v25 }
 0x456   : > { %v3759_v45 = vpop.f32.mrf.mxu0 }
 0x457   : > { %v3760_v3 = vadd.f32 %v3759_v45, %v3641_v25 }
 0x459   : > { %v3768_v13 = vpop.f32.mrf.mxu0 }
 0x45a   : > { %v3769_v6 = vadd.f32 %v3768_v13, %v3646_v22 }
 0x45b   : > { %v3770_v30 = vpop.f32.mrf.mxu0 }
 0x45c   : > { %v3771_v60 = vadd.f32 %v3770_v30, %v3646_v22 }
 0x45e   : > { %v3779_v37 = vpop.f32.mrf.mxu0  ;;  %v3942_v14 = vpop.f32.mrf.mxu1 }
 0x45f   : > { %v3943_v54 = vadd.f32 %v3942_v14, %v3758_v35  ;;  %v3780_v1 = vadd.f32 %v3779_v37, %v3651_v18 }
 0x460   : > { %v3781_v62 = vpop.f32.mrf.mxu0  ;;  %v3944_v2 = vpop.f32.mrf.mxu1 }
 0x461   : > { %v3945_v46 = vadd.f32 %v3944_v2, %v3760_v3  ;;  %v3782_v9 = vadd.f32 %v3781_v62, %v3651_v18 }
 0x464   : > { %v3790_v27 = vpop.f32.mrf.mxu0  ;;  %v3949_v53 = vpop.f32.mrf.mxu1 }
 0x465   : > { %v3950_v7 = vadd.f32 %v3949_v53, %v3769_v6  ;;  %v3791_v41 = vadd.f32 %v3790_v27, %v3656_v34 }
 0x466   : > { %v7177_v40 = vpop.f32.mrf.mxu0  ;;  %v3951_v12 = vpop.f32.mrf.mxu1 }
 0x467   : > { %v3952_v17 = vadd.f32 %v3951_v12, %v3771_v60  ;;  %v3793_v12 = vadd.f32 %v7177_v40, %v3656_v34 }
 0x46a   : > { %v3956_v11 = vpop.f32.mrf.mxu1  ;;  %v4068_v0 = vpop.f32.mrf.mxu0 }
 0x46b   : > { %v4069_v49 = vadd.f32 %v4068_v0, %v3943_v54  ;;  %v3957_v52 = vadd.f32 %v3956_v11, %v3780_v1 }
 0x46c   : > { %v3958_v10 = vpop.f32.mrf.mxu1  ;;  %v4070_v57 = vpop.f32.mrf.mxu0 }
 0x46d   : > { %v4071_v32 = vadd.f32 %v4070_v57, %v3945_v46  ;;  %v3959_v48 = vadd.f32 %v3958_v10, %v3782_v9 }
 0x470   : > { %v3963_v43 = vpop.f32.mrf.mxu1  ;;  %v4076_v20 = vpop.f32.mrf.mxu0 }
 0x471   : > { %v4077_v55 = vadd.f32 %v4076_v20, %v3950_v7  ;;  %v3964_v0 = vadd.f32 %v3963_v43, %v3791_v41 }
 0x472   : > { %v7179_v16 = vpop.f32.mrf.mxu1  ;;  %v4078_v28 = vpop.f32.mrf.mxu0 }
 0x473   : > { %v4079_v23 = vadd.f32 %v4078_v28, %v3952_v17  ;;  %v3966_v28 = vadd.f32 %v7179_v16, %v3793_v12 }
 0x476   : > { %v4084_v5 = vpop.f32.mrf.mxu0  ;;  %v4182_v63 = vpop.f32.mrf.mxu1 }
 0x477   : > { %v4183_v58 = vadd.f32 %v4182_v63, %v4069_v49  ;;  %v4085_v45 = vadd.f32 %v4084_v5, %v3957_v52 }
 0x478   : > { %v4086_v51 = vpop.f32.mrf.mxu0  ;;  %v4184_v29 = vpop.f32.mrf.mxu1 }
 0x479   : > { %v4185_v61 = vadd.f32 %v4184_v29, %v4071_v32  ;;  %v4087_v62 = vadd.f32 %v4086_v51, %v3959_v48 }
 0x47c   : > { %v4092_v59 = vpop.f32.mrf.mxu0  ;;  %v4191_v24 = vpop.f32.mrf.mxu1 }
 0x47d   : > { %v4192_v42 = vadd.f32 %v4191_v24, %v4077_v55  ;;  %v4093_v5 = vadd.f32 %v4092_v59, %v3964_v0 }
 0x47e   : > { %v7181_v56 = vpop.f32.mrf.mxu0  ;;  %v4193_v33 = vpop.f32.mrf.mxu1 }
 0x47f   : > { %v4194_v37 = vadd.f32 %v4193_v33, %v4079_v23  ;;  %v4095_v33 = vadd.f32 %v7181_v56, %v3966_v28 }
 0x482   : > { %v4200_v39 = vpop.f32.mrf.mxu1  ;;  %v4329_v19 = vpop.f32.mrf.mxu0 }
 0x483   : > { %v4330_v26 = vadd.f32 %v4329_v19, %v4183_v58  ;;  %v4201_v57 = vadd.f32 %v4200_v39, %v4085_v45 }
 0x484   : > { %v4202_v8 = vpop.f32.mrf.mxu1  ;;  %v4331_v15 = vpop.f32.mrf.mxu0 }
 0x485   : > { %v4332_v44 = vadd.f32 %v4331_v15, %v4185_v61  ;;  %v4203_v24 = vadd.f32 %v4202_v8, %v4087_v62 }
 0x486   : > { %v4336_v38 = vpop.f32.mrf.mxu0 }
 0x487   : > { %v4209_v36 = vpop.f32.mrf.mxu1  ;;  %v4337_v14 = vadd.f32 %v4336_v38, %v4192_v42 }
 0x488   : > { %v4338_v47 = vpop.f32.mrf.mxu0  ;;  %v4210_v35 = vadd.f32 %v4209_v36, %v4093_v5 }
 0x489   : > { %v4211_v31 = vpop.f32.mrf.mxu1  ;;  %v4339_v20 = vadd.f32 %v4338_v47, %v4194_v37 }
 0x48a   : > { %v4343_v4 = vpop.f32.mrf.mxu0  ;;  %v4212_v54 = vadd.f32 %v4211_v31, %v4095_v33 }
 0x48b   : > { %v4438_v21 = vpop.f32.mrf.mxu1  ;;  %v4344_v40 = vadd.f32 %v4343_v4, %v4201_v57 }
 0x48c   : > { %v4439_v50 = vadd.f32 %v4438_v21, %v4330_v26  ;;  %v4345_v13 = vpop.f32.mrf.mxu0 }
 0x48d   : > { %v4440_v30 = vpop.f32.mrf.mxu1  ;;  %v4346_v39 = vadd.f32 %v4345_v13, %v4203_v24 }
 0x48e   : > { %v4464_v2 = vmax.f32 %v4439_v50, 0.0  ;;  %v4441_v53 = vadd.f32 %v4440_v30, %v4332_v44  ;;  %v4350_v63 = vpop.f32.mrf.mxu0 }
 0x48f   : > { %v4445_v11 = vpop.f32.mrf.mxu1  ;;  %v4351_v8 = vadd.f32 %v4350_v63, %v4210_v35 }
 0x490   : > { %4472 = vst [vmem:[%s7187_s29] sm:$0xff] %v4464_v2  ;;  %v4465_v27 = vmax.f32 %v4441_v53, 0.0  ;;  %v4446_v10 = vadd.f32 %v4445_v11, %v4337_v14  ;;  %v4352_v59 = vpop.f32.mrf.mxu0 }
 0x491   : > { %v4447_v29 = vpop.f32.mrf.mxu1  ;;  %v4353_v6 = vadd.f32 %v4352_v59, %v4212_v54 }
 0x492   : > { %4473 = vst [vmem:[%s7187_s29 + $0x8] sm:$0xff] %v4465_v27  ;;  %v4466_v43 = vmax.f32 %v4446_v10, 0.0  ;;  %v4448_v51 = vadd.f32 %v4447_v29, %v4339_v20 }
 0x493   : > { %v4452_v25 = vpop.f32.mrf.mxu1 }
 0x494   : > { %4474 = vst [vmem:[%s7187_s29 + $0x10] sm:$0xff] %v4466_v43  ;;  %v4467_v19 = vmax.f32 %v4448_v51, 0.0  ;;  %v4453_v16 = vadd.f32 %v4452_v25, %v4344_v40 }
 0x495   : > { %v4454_v3 = vpop.f32.mrf.mxu1 }
 0x496   : > { %4475 = vst [vmem:[%s7187_s29 + $0x18] sm:$0xff] %v4467_v19  ;;  %v4468_v15 = vmax.f32 %v4453_v16, 0.0  ;;  %v4455_v22 = vadd.f32 %v4454_v3, %v4346_v39 }
 0x497   : > { %v4459_v56 = vpop.f32.mrf.mxu1 }
 0x498   : > { %4476 = vst [vmem:[%s7187_s29 + $0x20] sm:$0xff] %v4468_v15  ;;  %v4469_v46 = vmax.f32 %v4455_v22, 0.0  ;;  %v4460_v49 = vadd.f32 %v4459_v56, %v4351_v8 }
 0x499   : > { %v4461_v38 = vpop.f32.mrf.mxu1 }
 0x49a   : > { %4477 = vst [vmem:[%s7187_s29 + $0x28] sm:$0xff] %v4469_v46  ;;  %v4470_v36 = vmax.f32 %v4460_v49, 0.0  ;;  %v4462_v18 = vadd.f32 %v4461_v38, %v4353_v6 }
 0x49c   : > { %4478 = vst [vmem:[%s7187_s29 + $0x30] sm:$0xff] %v4470_v36  ;;  %v4471_v60 = vmax.f32 %v4462_v18, 0.0 }
 0x49e   : > { %4479 = vst [vmem:[%s7187_s29 + $0x38] sm:$0xff] %v4471_v60 }
 0x49f   : > { %4744 = shalt.err (!%p4741_p5)
}
 0x4a0   : > { %s4745_s27 = scalar_lea.hbm %s7202_s20, 1024  ;;  %s4749_s16 = scalar_lea.hbm %s7264_s9, 2048 }
 0x4a1   : > { %p4746_p6 = scmp.ne.s32.totalorder %s7202_s20, %s4745_s27  ;;  %p4750_p10 = scmp.lt.s32.totalorder %s7202_s20, %s7264_s9 }
 0x4a2   : > { %p4751_p11 = scmp.lt.s32.totalorder %s4749_s16, %s4745_s27 }
 0x4a3   : > { %p4747_p7 = pnand %p4746_p6, %p4906_p4 }
 0x4a4   : > { %p4752_p12 = por %p4751_p11, %p4750_p10 }
 0x4a5   : > { %p4748_p9 = pneg %p4747_p7 }
 0x4a7   : > { %p4753_p13 = pnand %p4752_p12, %p4748_p9 }
 0x4a9   : > { %4756 = shalt.err (!%p4753_p13)
}
 0x4aa   : > { %s4814_s24 = smov 256   ;;  %s4815_s26 = smov 16  }
 0x4ab   : > { %4641 = dma.vmem_to_hbm [thread:$0]  (%p4906_p4), %s7204_s23, 1024, %s7202_s20, %s7210_s12, %s4814_s24, %s4814_s24, %s4815_s26  }
 0x4ac PF: > { %p4647_p0 = scmp.ge.s32.totalorder %s4807_s14, 2  ;;  %s4511_s28 = sand.u32 1, %s4787_s30  }
 0x4ad   : > { %s4512_s27 = scalar_lea.sflag [#allocation3], %s4511_s28 }
 0x4ae   : > { %p4644_p1 = pnand %p4647_p0, %p4913_p8 }
 0x4b0   : > { %p4645_p2 = pneg %p4644_p1 }
 0x4b2   : > { %4782 = dma.done.wait (%p4645_p2), %s4512_s27, 1024  }
 0x4b3   : > { %4784 = vsyncadd (%p4645_p2), %s4512_s27, 4294966272  ;;  %s22_s14 = sadd.s32 1, %s4807_s14   ;;  %s7388_s30 = smov %s4791_s10 }
 0x4b4   : > { %p19_p3 = scmp.ge.s32.totalorder %s22_s14, 4   ;;  %s7389_s10 = smov %s4795_s11 }
 0x4b5   : > { %s7390_s11 = smov %s4919_s22  ;;  %s7391_s12 = smov %s4803_s13 }
 0x4b6   : > { %s7392_s13 = smov %s7394_s17  ;;  %21 = sbr.rel (!%p19_p3) target bundleno = 4 (0x4), region = 100 }
 0x4bb   :  { %4517 = vsyncpa [#allocation3], 1 }
 0x4bc   :  { %4519 = vsyncpa [#allocation3 + $0x1], 1 }

</bundles_post_ra>
